<compile_context>
chip_gen: v7x
topology: tpu7x:2x2x1
jax: 0.10.0
libtpu: 0.0.40
codegen_flags: <defaults>
</compile_context>

<pallas_src>
import jax
import jax.numpy as jnp
from jax import lax
from jax.experimental import pallas as pl
from jax.experimental.pallas import tpu as pltpu

TM = 256
BN_EPS = 1e-5


def _round_up(x, m):
    return ((x + m - 1) // m) * m


def _pick_tm(rows, cap=TM):
    tm = min(cap, _round_up(rows, 8))
    # v7x megacore: ensure >= 2 parallel grid steps whenever the row count allows it.
    if rows > 8 and pl.cdiv(rows, tm) < 2:
        tm = max(8, _round_up(pl.cdiv(rows, 2), 8))
    return tm


# ------------------------------------------------------------------ Pallas kernels

def _stem_matmul_bn_relu_kernel(a_ref, b_ref, s_ref, t_ref, o_ref):
    # stem: im2col'd 7x7/s2 conv fused with norm0 + relu
    y = jnp.dot(a_ref[...], b_ref[...], preferred_element_type=jnp.float32)
    o_ref[...] = jnp.maximum(y * s_ref[...] + t_ref[...], 0.0).astype(o_ref.dtype)


def _make_dense_layer_kernel(h, w, c_off, growth):
    # One fused SpotTune dense layer (branch already selected via index_map):
    #   bn1 -> relu -> conv1x1 (big-K over the concat buffer) -> bn2 -> relu
    #   -> 3x3 pad=1 conv as 9 shifted-window matmuls on a flat padded VMEM scratch
    #   -> copy concat buffer + append the new growth channels.
    hw = h * w
    pad_off = w + 1                         # leading zero rows in the flat scratch

    def kernel(mask_ref, buf_ref, s1_ref, t1_ref, w1_ref, s2_ref, t2_ref, w2_ref,
               out_ref, zpad_ref):
        del mask_ref                        # branch selection happened in the index_maps
        x = buf_ref[0]                                              # (hw, Ctot) bf16
        a = jnp.maximum(x.astype(jnp.float32) * s1_ref[0] + t1_ref[0], 0.0)
        z = jnp.dot(a.astype(jnp.bfloat16), w1_ref[0],
                    preferred_element_type=jnp.float32)             # (hw, bwidth)
        z = jnp.maximum(z * s2_ref[0] + t2_ref[0], 0.0)             # bn2 + relu (f32)

        # stage z into the flat spatially-padded scratch (stays in VMEM, never HBM)
        zpad_ref[...] = jnp.zeros_like(zpad_ref)
        zpad_ref[pl.ds(pad_off, hw), :] = z

        # 9 taps grouped by kj; left/right spatial-column edges of the kj=0/kj=2 groups
        # are masked with a static iota mask instead of materializing column padding.
        accs = []
        for kj in range(3):
            acc = jnp.zeros((hw, growth), jnp.float32)
            for ki in range(3):
                base = pad_off + (ki - 1) * w + (kj - 1)
                tap = zpad_ref[pl.ds(base, hw), :].astype(jnp.bfloat16)
                acc = acc + jnp.dot(tap, w2_ref[0, ki * 3 + kj],
                                    preferred_element_type=jnp.float32)
            accs.append(acc)
        col = lax.broadcasted_iota(jnp.int32, (hw, 1), 0) % w
        new = (jnp.where(col != 0, accs[0], 0.0) + accs[1] +
               jnp.where(col != (w - 1), accs[2], 0.0))

        # lane-dense copy of the concat buffer + narrow store of the new feature slice
        out_ref[0] = x
        out_ref[0, :, c_off:c_off + growth] = new.astype(out_ref.dtype)

    return kernel


def _make_transition_kernel(cout, hw_out, c_next):
    # Fused transition (branch selected via index_map):
    #   bn -> relu -> 2x2 avg pool (pooling matmul, commuted before the 1x1 conv)
    #   -> conv1x1 -> write into the next block's zero-padded concat buffer.
    def kernel(mask_ref, buf_ref, s_ref, t_ref, w_ref, pmat_ref, out_ref):
        del mask_ref
        x = buf_ref[0].astype(jnp.float32)                          # (hw, Cin)
        a = jnp.maximum(x * s_ref[0] + t_ref[0], 0.0).astype(jnp.bfloat16)
        pooled = jnp.dot(pmat_ref[...], a,
                         preferred_element_type=jnp.float32)        # (hw_out, Cin)
        y = jnp.dot(pooled.astype(jnp.bfloat16), w_ref[0],
                    preferred_element_type=jnp.float32)             # (hw_out, cout)
        out_ref[0] = jnp.zeros((hw_out, c_next), out_ref.dtype)
        out_ref[0, :, 0:cout] = y.astype(out_ref.dtype)

    return kernel


def _head_pool_kernel(buf_ref, s_ref, t_ref, out_ref):
    # per-sample: norm5 -> relu -> global average pool  ->  (1, C)
    x = buf_ref[0].astype(jnp.float32)
    a = jnp.maximum(x * s_ref[0] + t_ref[0], 0.0)
    out_ref[0] = jnp.mean(a, axis=0, keepdims=True)


def _head_fc_kernel(p_ref, w_ref, b_ref, o_ref):
    # one (N, C) x (C, ncls) bf16 matmul + bias + sigmoid
    logits = jnp.dot(p_ref[...], w_ref[...],
                     preferred_element_type=jnp.float32) + b_ref[...]
    o_ref[...] = 1.0 / (1.0 + jnp.exp(-logits))


# ------------------------------------------------------------------ param prep helpers

def bn_scale_shift(bn):
    gamma, beta, mean, var = bn
    scale = gamma / jnp.sqrt(var + BN_EPS)
    shift = beta - mean * scale
    return scale, shift


def prep_dense_pair(lp, plp, cin, c_total):
    bwidth = lp['conv1'].shape[0]

    def one(p):
        s1, t1 = bn_scale_shift(p['norm1'])                         # (cin,)
        s1 = jnp.pad(s1, (0, c_total - cin))
        t1 = jnp.pad(t1, (0, c_total - cin))
        w1 = jnp.pad(p['conv1'][:, :, 0, 0].T, ((0, c_total - cin), (0, 0)))
        s2, t2 = bn_scale_shift(p['norm2'])                         # (bwidth,)
        w2 = jnp.stack([p['conv2'][:, :, i, j].T
                        for i in range(3) for j in range(3)])       # (9, bwidth, growth)
        return s1, t1, w1, s2, t2, w2

    a, b = one(lp), one(plp)                                        # branch 0 / branch 1
    s1 = jnp.stack([a[0], b[0]]).reshape(2, 1, c_total)
    t1 = jnp.stack([a[1], b[1]]).reshape(2, 1, c_total)
    w1 = jnp.stack([a[2], b[2]]).astype(jnp.bfloat16)
    s2 = jnp.stack([a[3], b[3]]).reshape(2, 1, bwidth)
    t2 = jnp.stack([a[4], b[4]]).reshape(2, 1, bwidth)
    w2 = jnp.stack([a[5], b[5]]).astype(jnp.bfloat16)
    return s1, t1, w1, s2, t2, w2


def prep_transition_pair(p, pp, c_in):
    def one(q):
        s, t = bn_scale_shift(q['norm'])
        return s, t, q['conv'][:, :, 0, 0].T                        # (c_in, cout)

    a, b = one(p), one(pp)
    s = jnp.stack([a[0], b[0]]).reshape(2, 1, c_in)
    t = jnp.stack([a[1], b[1]]).reshape(2, 1, c_in)
    w = jnp.stack([a[2], b[2]]).astype(jnp.bfloat16)
    return s, t, w


def make_pool_matrix(h, w):
    # (hw_out, hw) matrix that performs AvgPool2d(2,2) (with PyTorch's odd-dim truncation)
    ho, wo = h // 2, w // 2
    oh = jnp.arange(ho * wo) // wo
    ow = jnp.arange(ho * wo) % wo
    base = 2 * oh * w + 2 * ow
    m = jnp.zeros((ho * wo, h * w), jnp.float32)
    for dh in range(2):
        for dw in range(2):
            m = m + jax.nn.one_hot(base + dh * w + dw, h * w, dtype=jnp.float32)
    return 0.25 * m


def im2col(x, kh, kw, stride, pad):
    # only used for the 7x7/s2 stem conv (Cin=3, runs once).
    n, h, w, c = x.shape
    xp = jnp.pad(x, ((0, 0), (pad, pad), (pad, pad), (0, 0)))
    ho = (h + 2 * pad - kh) // stride + 1
    wo = (w + 2 * pad - kw) // stride + 1
    cols = []
    for i in range(kh):
        for j in range(kw):
            cols.append(xp[:, i:i + stride * ho:stride, j:j + stride * wo:stride, :])
    cols = jnp.concatenate(cols, axis=-1)
    return cols.reshape(n * ho * wo, kh * kw * c), (n, ho, wo)


def max_pool_3x3_s2_p1(x):
    return lax.reduce_window(x, jnp.array(-jnp.inf, x.dtype), lax.max,
                             (1, 3, 3, 1), (1, 2, 2, 1),
                             ((0, 0), (1, 1), (1, 1), (0, 0)))


# ------------------------------------------------------------------ Pallas wrappers

def stem_forward(x, conv0, norm0):
    cout = conv0.shape[0]
    cols, (n, ho, wo) = im2col(x, 7, 7, 2, 3)
    rows, k = cols.shape
    kp = _round_up(k, 128)                       # pad contraction dim to aligned lanes
    cols = jnp.pad(cols, ((0, 0), (0, kp - k))).astype(jnp.bfloat16)
    wm = jnp.transpose(conv0, (2, 3, 1, 0)).reshape(k, cout)
    wm = jnp.pad(wm, ((0, kp - k), (0, 0))).astype(jnp.bfloat16)
    s0, t0 = bn_scale_shift(norm0)
    tm = _pick_tm(rows)
    out = pl.pallas_call(
        _stem_matmul_bn_relu_kernel,
        out_shape=jax.ShapeDtypeStruct((rows, cout), jnp.bfloat16),
        grid=(pl.cdiv(rows, tm),),
        in_specs=[pl.BlockSpec((tm, kp), lambda i: (i, 0)),
                  pl.BlockSpec((kp, cout), lambda i: (0, 0)),
                  pl.BlockSpec((1, cout), lambda i: (0, 0)),
                  pl.BlockSpec((1, cout), lambda i: (0, 0))],
        out_specs=pl.BlockSpec((tm, cout), lambda i: (i, 0)),
        compiler_params=pltpu.CompilerParams(dimension_semantics=("parallel",)),
    )(cols, wm, s0.reshape(1, cout), t0.reshape(1, cout))
    feat = out.reshape(n, ho, wo, cout)
    return max_pool_3x3_s2_p1(feat)


def dense_layer_forward(buf, lp, plp, mask, n, h, w, cin, c_total):
    hw = h * w
    growth = lp['conv2'].shape[0]
    bwidth = lp['conv1'].shape[0]
    s1, t1, w1, s2, t2, w2 = prep_dense_pair(lp, plp, cin, c_total)
    scratch_rows = _round_up((h + 2) * w + 2, 8)

    grid_spec = pltpu.PrefetchScalarGridSpec(
        num_scalar_prefetch=1,
        grid=(n,),
        in_specs=[
            pl.BlockSpec((1, hw, c_total), lambda i, m: (i, 0, 0)),
            # SpotTune: only the selected branch's params are DMA'd (binary policy)
            pl.BlockSpec((1, 1, c_total), lambda i, m: (m[i], 0, 0)),
            pl.BlockSpec((1, 1, c_total), lambda i, m: (m[i], 0, 0)),
            pl.BlockSpec((1, c_total, bwidth), lambda i, m: (m[i], 0, 0)),
            pl.BlockSpec((1, 1, bwidth), lambda i, m: (m[i], 0, 0)),
            pl.BlockSpec((1, 1, bwidth), lambda i, m: (m[i], 0, 0)),
            pl.BlockSpec((1, 9, bwidth, growth), lambda i, m: (m[i], 0, 0, 0)),
        ],
        out_specs=pl.BlockSpec((1, hw, c_total), lambda i, m: (i, 0, 0)),
        scratch_shapes=[pltpu.VMEM((scratch_rows, bwidth), jnp.float32)],
    )
    # TODO(synk): dropout for drop_rate > 0 not implemented (eval-mode dropout is identity).
    return pl.pallas_call(
        _make_dense_layer_kernel(h, w, cin, growth),
        out_shape=jax.ShapeDtypeStruct((n, hw, c_total), jnp.bfloat16),
        grid_spec=grid_spec,
        compiler_params=pltpu.CompilerParams(dimension_semantics=("parallel",)),
    )(mask, buf, s1, t1, w1, s2, t2, w2)


def transition_forward(buf, blk, mask, n, h, w, c_in, cout, c_next):
    hw = h * w
    hw_out = (h // 2) * (w // 2)
    s, t, wconv = prep_transition_pair(blk['trans'], blk['trans_par'], c_in)
    pmat = make_pool_matrix(h, w).astype(jnp.bfloat16)

    grid_spec = pltpu.PrefetchScalarGridSpec(
        num_scalar_prefetch=1,
        grid=(n,),
        in_specs=[
            pl.BlockSpec((1, hw, c_in), lambda i, m: (i, 0, 0)),
            pl.BlockSpec((1, 1, c_in), lambda i, m: (m[i], 0, 0)),
            pl.BlockSpec((1, 1, c_in), lambda i, m: (m[i], 0, 0)),
            pl.BlockSpec((1, c_in, cout), lambda i, m: (m[i], 0, 0)),
            pl.BlockSpec((hw_out, hw), lambda i, m: (0, 0)),
        ],
        out_specs=pl.BlockSpec((1, hw_out, c_next), lambda i, m: (i, 0, 0)),
    )
    return pl.pallas_call(
        _make_transition_kernel(cout, hw_out, c_next),
        out_shape=jax.ShapeDtypeStruct((n, hw_out, c_next), jnp.bfloat16),
        grid_spec=grid_spec,
        compiler_params=pltpu.CompilerParams(dimension_semantics=("parallel",)),
    )(mask, buf, s, t, wconv, pmat)


def head_forward(buf, norm5, fc_w, fc_b, n, hw, c):
    s5, t5 = bn_scale_shift(norm5)
    pooled = pl.pallas_call(
        _head_pool_kernel,
        out_shape=jax.ShapeDtypeStruct((n, 1, c), jnp.float32),
        grid=(n,),
        in_specs=[pl.BlockSpec((1, hw, c), lambda i: (i, 0, 0)),
                  pl.BlockSpec((1, 1, c), lambda i: (0, 0, 0)),
                  pl.BlockSpec((1, 1, c), lambda i: (0, 0, 0))],
        out_specs=pl.BlockSpec((1, 1, c), lambda i: (i, 0, 0)),
        compiler_params=pltpu.CompilerParams(dimension_semantics=("parallel",)),
    )(buf, s5.reshape(1, 1, c), t5.reshape(1, 1, c))

    pooled2 = pooled.reshape(n, c).astype(jnp.bfloat16)
    ncls = fc_w.shape[0]
    wt = fc_w.T.astype(jnp.bfloat16)
    return pl.pallas_call(
        _head_fc_kernel,
        out_shape=jax.ShapeDtypeStruct((n, ncls), jnp.float32),
        grid=(1,),
        in_specs=[pl.BlockSpec((n, c), lambda i: (0, 0)),
                  pl.BlockSpec((c, ncls), lambda i: (0, 0)),
                  pl.BlockSpec((1, ncls), lambda i: (0, 0))],
        out_specs=pl.BlockSpec((n, ncls), lambda i: (0, 0)),
    )(pooled2, wt, fc_b.reshape(1, ncls))


# ------------------------------------------------------------------ model forward

def st_densenet_forward(params, x_nchw, policy):
    x = jnp.transpose(x_nchw, (0, 2, 3, 1)).astype(jnp.float32)     # NCHW -> NHWC
    feat = stem_forward(x, params['conv0'], params['norm0'])        # (n, h, w, c0) bf16
    # Reference's first blend uses self.features(x) for BOTH branches -> exact no-op.
    n, h, w, c0 = feat.shape
    buf = feat.reshape(n, h * w, c0)

    blocks = params['blocks']
    pol_idx = 1
    cur_c, cur_h, cur_w = c0, h, w
    i = 0
    while i < len(blocks):
        blk = blocks[i]
        if 'layers' in blk:                                          # _DenseBlock pair
            num_layers = len(blk['layers'])
            growth = blk['layers'][0]['conv2'].shape[0]
            c_total = cur_c + num_layers * growth
            if buf.shape[-1] < c_total:      # zero slots for features not yet computed
                buf = jnp.pad(buf, ((0, 0), (0, 0), (0, c_total - buf.shape[-1])))
            for l in range(num_layers):
                mask = policy[:, pol_idx + l].astype(jnp.int32)
                buf = dense_layer_forward(buf, blk['layers'][l], blk['par_layers'][l],
                                          mask, n, cur_h, cur_w,
                                          cur_c + l * growth, c_total)
            cur_c = c_total
            pol_idx += num_layers
        else:                                                        # _Transition pair
            nxt = blocks[i + 1]
            growth_n = nxt['layers'][0]['conv2'].shape[0]
            cout = blk['trans']['conv'].shape[0]
            c_next = cout + len(nxt['layers']) * growth_n
            mask = policy[:, pol_idx].astype(jnp.int32)
            buf = transition_forward(buf, blk, mask, n, cur_h, cur_w,
                                     cur_c, cout, c_next)
            cur_h //= 2
            cur_w //= 2
            cur_c = cout
            pol_idx += 1
        i += 1

    return head_forward(buf, params['norm5'], params['fc_w'], params['fc_b'],
                        n, cur_h * cur_w, cur_c)


# ------------------------------------------------------------------ deterministic init

class KeyGen:
    def __init__(self, seed):
        self.key = jax.random.PRNGKey(seed)

    def __call__(self):
        self.key, sub = jax.random.split(self.key)
        return sub


def init_conv(kg, cout, cin, kh, kw):
    fan_in = cin * kh * kw
    return jax.random.normal(kg(), (cout, cin, kh, kw), jnp.float32) / jnp.sqrt(fan_in)


def init_bn(kg, c):
    gamma = 1.0 + 0.1 * jax.random.normal(kg(), (c,), jnp.float32)
    beta = 0.1 * jax.random.normal(kg(), (c,), jnp.float32)
    mean = 0.1 * jax.random.normal(kg(), (c,), jnp.float32)
    var = 1.0 + 0.1 * jax.random.uniform(kg(), (c,), jnp.float32)
    return (gamma, beta, mean, var)


def init_dense_layer(kg, cin, bn_size, growth):
    return dict(norm1=init_bn(kg, cin),
                conv1=init_conv(kg, bn_size * growth, cin, 1, 1),
                norm2=init_bn(kg, bn_size * growth),
                conv2=init_conv(kg, growth, bn_size * growth, 3, 3))


def init_transition(kg, cin):
    return dict(norm=init_bn(kg, cin), conv=init_conv(kg, cin // 2, cin, 1, 1))


def init_st_densenet(seed, growth_rate, block_config, num_init_features, bn_size, num_classes):
    kg = KeyGen(seed)
    params = {}
    params['conv0'] = init_conv(kg, num_init_features, 3, 7, 7)
    params['norm0'] = init_bn(kg, num_init_features)
    num_features = num_init_features
    blocks = []
    for i, num_layers in enumerate(block_config):
        layers, par_layers = [], []
        for l in range(num_layers):
            cin = num_features + l * growth_rate
            layers.append(init_dense_layer(kg, cin, bn_size, growth_rate))
            par_layers.append(init_dense_layer(kg, cin, bn_size, growth_rate))
        blocks.append(dict(layers=layers, par_layers=par_layers))
        num_features += num_layers * growth_rate
        if i != len(block_config) - 1:
            blocks.append(dict(trans=init_transition(kg, num_features),
                               trans_par=init_transition(kg, num_features)))
            num_features //= 2
    params['blocks'] = blocks
    params['norm5'] = init_bn(kg, num_features)
    params['fc_w'] = jax.random.normal(kg(), (num_classes, num_features),
                                       jnp.float32) / jnp.sqrt(num_features)
    params['fc_b'] = 0.01 * jax.random.normal(kg(), (num_classes,), jnp.float32)
    return params, num_features


# ------------------------------------------------------------------ main

if __name__ == "__main__":
    # small StDenseNet: growth_rate=8, blocks=(2,2), 16 init features, bn_size=2
    growth_rate = 8
    block_config = (2, 2)
    num_init_features = 16
    bn_size = 2
    num_classes = 28

    params, _ = init_st_densenet(0, growth_rate, block_config,
                                 num_init_features, bn_size, num_classes)

    key = jax.random.PRNGKey(0)
    kx, kp = jax.random.split(key)
    x = jax.random.normal(kx, (2, 3, 16, 16), jnp.float32)           # NCHW, like PyTorch
    num_policy = 1 + sum(block_config) + (len(block_config) - 1)     # = 6 policy columns
    policy = jax.random.bernoulli(kp, 0.5, (2, num_policy)).astype(jnp.float32)

    fwd = jax.jit(st_densenet_forward)
    out = fwd(params, x, policy)
    jax.block_until_ready(out)
    assert out.shape == (2, num_classes)
    assert bool(jnp.all(jnp.isfinite(out)))
    print("KERNEL_OK")
</pallas_src>

<mosaic_0001>
module attributes {stable_mosaic.version = 11 : i64} {
  func.func @_stem_matmul_bn_relu_kernel(%arg0: i32, %arg1: memref<64x256xbf16, #tpu.memory_space<vmem>>, %arg2: memref<256x16xbf16, #tpu.memory_space<vmem>>, %arg3: memref<1x16xf32, #tpu.memory_space<vmem>>, %arg4: memref<1x16xf32, #tpu.memory_space<vmem>>, %arg5: memref<64x16xbf16, #tpu.memory_space<vmem>>) attributes {dimension_semantics = [#tpu.dimension_semantics<parallel>], iteration_bounds = array<i64: 2>, scalar_prefetch = 0 : i64, scratch_operands = 0 : i64, tpu.core_type = #tpu.core_type<tc>, window_params = [{transform_indices = @transform_0, window_bounds = array<i64: 64, 256>}, {pipeline_mode = #tpu.pipeline_mode<synchronous>, transform_indices = @transform_1, window_bounds = array<i64: 256, 16>}, {pipeline_mode = #tpu.pipeline_mode<synchronous>, transform_indices = @transform_2, window_bounds = array<i64: 1, 16>}, {pipeline_mode = #tpu.pipeline_mode<synchronous>, transform_indices = @transform_3, window_bounds = array<i64: 1, 16>}, {transform_indices = @transform_4, window_bounds = array<i64: 64, 16>}]} {
    %c0 = arith.constant 0 : index
    %c0_0 = arith.constant 0 : index
    %0 = vector.load %arg1[%c0, %c0_0] : memref<64x256xbf16, #tpu.memory_space<vmem>>, vector<64x256xbf16>
    %c0_1 = arith.constant 0 : index
    %c0_2 = arith.constant 0 : index
    %1 = vector.load %arg2[%c0_1, %c0_2] : memref<256x16xbf16, #tpu.memory_space<vmem>>, vector<256x16xbf16>
    %cst = arith.constant dense<0.000000e+00> : vector<64x16xf32>
    %2 = tpu.matmul %0, %1, %cst {dimension_numbers = #tpu.dot_dimension_numbers<[1], [0], [0], [1], [0, 0, 1, 1], [], []>} : vector<64x256xbf16>, vector<256x16xbf16>, vector<64x16xf32> -> vector<64x16xf32>
    %c0_3 = arith.constant 0 : index
    %c0_4 = arith.constant 0 : index
    %3 = vector.load %arg3[%c0_3, %c0_4] : memref<1x16xf32, #tpu.memory_space<vmem>>, vector<1x16xf32>
    %4 = vector.broadcast %3 : vector<1x16xf32> to vector<64x16xf32>
    %5 = arith.mulf %2, %4 : vector<64x16xf32>
    %c0_5 = arith.constant 0 : index
    %c0_6 = arith.constant 0 : index
    %6 = vector.load %arg4[%c0_5, %c0_6] : memref<1x16xf32, #tpu.memory_space<vmem>>, vector<1x16xf32>
    %7 = vector.broadcast %6 : vector<1x16xf32> to vector<64x16xf32>
    %8 = arith.addf %5, %7 : vector<64x16xf32>
    %cst_7 = arith.constant 0.000000e+00 : f32
    %9 = vector.broadcast %cst_7 : f32 to vector<64x16xf32>
    %10 = arith.maximumf %8, %9 : vector<64x16xf32>
    %11 = arith.truncf %10 : vector<64x16xf32> to vector<64x16xbf16>
    %c0_8 = arith.constant 0 : index
    %c0_9 = arith.constant 0 : index
    %12 = vector.load %arg5[%c0_8, %c0_9] : memref<64x16xbf16, #tpu.memory_space<vmem>>, vector<64x16xbf16>
    tpu.vector_store %arg5[%c0_8, %c0_9], %11 {strides = array<i32>} : memref<64x16xbf16, #tpu.memory_space<vmem>>, vector<64x16xbf16>,
    return
  }
  func.func @transform_0(%arg0: i32) -> (i32, i32) {
    %c0_i32 = arith.constant 0 : i32
    %c0_i32_0 = arith.constant 0 : i32
    return %arg0, %c0_i32 : i32, i32
  }
  func.func @transform_1(%arg0: i32) -> (i32, i32) {
    %c0_i32 = arith.constant 0 : i32
    %c0_i32_0 = arith.constant 0 : i32
    %c0_i32_1 = arith.constant 0 : i32
    return %c0_i32, %c0_i32_0 : i32, i32
  }
  func.func @transform_2(%arg0: i32) -> (i32, i32) {
    %c0_i32 = arith.constant 0 : i32
    %c0_i32_0 = arith.constant 0 : i32
    %c0_i32_1 = arith.constant 0 : i32
    return %c0_i32, %c0_i32_0 : i32, i32
  }
  func.func @transform_3(%arg0: i32) -> (i32, i32) {
    %c0_i32 = arith.constant 0 : i32
    %c0_i32_0 = arith.constant 0 : i32
    %c0_i32_1 = arith.constant 0 : i32
    return %c0_i32, %c0_i32_0 : i32, i32
  }
  func.func @transform_4(%arg0: i32) -> (i32, i32) {
    %c0_i32 = arith.constant 0 : i32
    %c0_i32_0 = arith.constant 0 : i32
    return %arg0, %c0_i32 : i32, i32
  }
}

module attributes {stable_mosaic.version = 11 : i64} {
  func.func @kernel(%arg0: i32, %arg1: memref<2xi32, #tpu.memory_space<smem>>, %arg2: memref<1x16x32xbf16, #tpu.memory_space<vmem>>, %arg3: memref<1x1x32xf32, #tpu.memory_space<vmem>>, %arg4: memref<1x1x32xf32, #tpu.memory_space<vmem>>, %arg5: memref<1x32x16xbf16, #tpu.memory_space<vmem>>, %arg6: memref<1x1x16xf32, #tpu.memory_space<vmem>>, %arg7: memref<1x1x16xf32, #tpu.memory_space<vmem>>, %arg8: memref<1x9x16x8xbf16, #tpu.memory_space<vmem>>, %arg9: memref<1x16x32xbf16, #tpu.memory_space<vmem>>, %arg10: memref<32x16xf32, #tpu.memory_space<vmem>>) attributes {dimension_semantics = [#tpu.dimension_semantics<parallel>], iteration_bounds = array<i64: 2>, scalar_prefetch = 1 : i64, scratch_operands = 1 : i64, tpu.core_type = #tpu.core_type<tc>, window_params = [{transform_indices = @transform_0, window_bounds = array<i64: 1, 16, 32>}, {transform_indices = @transform_1, window_bounds = array<i64: 1, 1, 32>}, {transform_indices = @transform_2, window_bounds = array<i64: 1, 1, 32>}, {transform_indices = @transform_3, window_bounds = array<i64: 1, 32, 16>}, {transform_indices = @transform_4, window_bounds = array<i64: 1, 1, 16>}, {transform_indices = @transform_5, window_bounds = array<i64: 1, 1, 16>}, {transform_indices = @transform_6, window_bounds = array<i64: 1, 9, 16, 8>}, {transform_indices = @transform_7, window_bounds = array<i64: 1, 16, 32>}]} {
    %c0 = arith.constant 0 : index
    %c0_0 = arith.constant 0 : index
    %c0_1 = arith.constant 0 : index
    %0 = vector.load %arg2[%c0, %c0_0, %c0_1] : memref<1x16x32xbf16, #tpu.memory_space<vmem>>, vector<1x16x32xbf16>
    %1 = vector.shape_cast %0 : vector<1x16x32xbf16> to vector<16x32xbf16>
    %2 = arith.extf %1 : vector<16x32xbf16> to vector<16x32xf32>
    %c0_2 = arith.constant 0 : index
    %c0_3 = arith.constant 0 : index
    %c0_4 = arith.constant 0 : index
    %3 = vector.load %arg3[%c0_2, %c0_3, %c0_4] : memref<1x1x32xf32, #tpu.memory_space<vmem>>, vector<1x1x32xf32>
    %4 = vector.shape_cast %3 : vector<1x1x32xf32> to vector<1x32xf32>
    %5 = vector.broadcast %4 : vector<1x32xf32> to vector<16x32xf32>
    %6 = arith.mulf %2, %5 : vector<16x32xf32>
    %c0_5 = arith.constant 0 : index
    %c0_6 = arith.constant 0 : index
    %c0_7 = arith.constant 0 : index
    %7 = vector.load %arg4[%c0_5, %c0_6, %c0_7] : memref<1x1x32xf32, #tpu.memory_space<vmem>>, vector<1x1x32xf32>
    %8 = vector.shape_cast %7 : vector<1x1x32xf32> to vector<1x32xf32>
    %9 = vector.broadcast %8 : vector<1x32xf32> to vector<16x32xf32>
    %10 = arith.addf %6, %9 : vector<16x32xf32>
    %cst = arith.constant 0.000000e+00 : f32
    %11 = vector.broadcast %cst : f32 to vector<16x32xf32>
    %12 = arith.maximumf %10, %11 : vector<16x32xf32>
    %13 = arith.truncf %12 : vector<16x32xf32> to vector<16x32xbf16>
    %c0_8 = arith.constant 0 : index
    %c0_9 = arith.constant 0 : index
    %c0_10 = arith.constant 0 : index
    %14 = vector.load %arg5[%c0_8, %c0_9, %c0_10] : memref<1x32x16xbf16, #tpu.memory_space<vmem>>, vector<1x32x16xbf16>
    %15 = vector.shape_cast %14 : vector<1x32x16xbf16> to vector<32x16xbf16>
    %cst_11 = arith.constant dense<0.000000e+00> : vector<16x16xf32>
    %16 = tpu.matmul %13, %15, %cst_11 {dimension_numbers = #tpu.dot_dimension_numbers<[1], [0], [0], [1], [0, 0, 1, 1], [], []>} : vector<16x32xbf16>, vector<32x16xbf16>, vector<16x16xf32> -> vector<16x16xf32>
    %c0_12 = arith.constant 0 : index
    %c0_13 = arith.constant 0 : index
    %c0_14 = arith.constant 0 : index
    %17 = vector.load %arg6[%c0_12, %c0_13, %c0_14] : memref<1x1x16xf32, #tpu.memory_space<vmem>>, vector<1x1x16xf32>
    %18 = vector.shape_cast %17 : vector<1x1x16xf32> to vector<1x16xf32>
    %19 = vector.broadcast %18 : vector<1x16xf32> to vector<16x16xf32>
    %20 = arith.mulf %16, %19 : vector<16x16xf32>
    %c0_15 = arith.constant 0 : index
    %c0_16 = arith.constant 0 : index
    %c0_17 = arith.constant 0 : index
    %21 = vector.load %arg7[%c0_15, %c0_16, %c0_17] : memref<1x1x16xf32, #tpu.memory_space<vmem>>, vector<1x1x16xf32>
    %22 = vector.shape_cast %21 : vector<1x1x16xf32> to vector<1x16xf32>
    %23 = vector.broadcast %22 : vector<1x16xf32> to vector<16x16xf32>
    %24 = arith.addf %20, %23 : vector<16x16xf32>
    %cst_18 = arith.constant 0.000000e+00 : f32
    %25 = vector.broadcast %cst_18 : f32 to vector<16x16xf32>
    %26 = arith.maximumf %24, %25 : vector<16x16xf32>
    %cst_19 = arith.constant 0.000000e+00 : f32
    %27 = vector.broadcast %cst_19 : f32 to vector<32x16xf32>
    %c0_20 = arith.constant 0 : index
    %c0_21 = arith.constant 0 : index
    %28 = vector.load %arg10[%c0_20, %c0_21] : memref<32x16xf32, #tpu.memory_space<vmem>>, vector<32x16xf32>
    tpu.vector_store %arg10[%c0_20, %c0_21], %27 {strides = array<i32>} : memref<32x16xf32, #tpu.memory_space<vmem>>, vector<32x16xf32>,
    %c5 = arith.constant 5 : index
    %c0_22 = arith.constant 0 : index
    %29 = vector.load %arg10[%c5, %c0_22] : memref<32x16xf32, #tpu.memory_space<vmem>>, vector<16x16xf32>
    tpu.vector_store %arg10[%c5, %c0_22], %26 {strides = array<i32>} : memref<32x16xf32, #tpu.memory_space<vmem>>, vector<16x16xf32>,
    %cst_23 = arith.constant 0.000000e+00 : f32
    %30 = vector.broadcast %cst_23 : f32 to vector<16x8xf32>
    %c0_24 = arith.constant 0 : index
    %c0_25 = arith.constant 0 : index
    %31 = vector.load %arg10[%c0_24, %c0_25] : memref<32x16xf32, #tpu.memory_space<vmem>>, vector<16x16xf32>
    %32 = arith.truncf %31 : vector<16x16xf32> to vector<16x16xbf16>
    %c0_26 = arith.constant 0 : index
    %c0_27 = arith.constant 0 : index
    %c0_28 = arith.constant 0 : index
    %c0_29 = arith.constant 0 : index
    %33 = vector.load %arg8[%c0_26, %c0_27, %c0_28, %c0_29] : memref<1x9x16x8xbf16, #tpu.memory_space<vmem>>, vector<1x1x16x8xbf16>
    %34 = vector.shape_cast %33 : vector<1x1x16x8xbf16> to vector<16x8xbf16>
    %cst_30 = arith.constant dense<0.000000e+00> : vector<16x8xf32>
    %35 = tpu.matmul %32, %34, %cst_30 {dimension_numbers = #tpu.dot_dimension_numbers<[1], [0], [0], [1], [0, 0, 1, 1], [], []>} : vector<16x16xbf16>, vector<16x8xbf16>, vector<16x8xf32> -> vector<16x8xf32>
    %36 = arith.addf %30, %35 : vector<16x8xf32>
    %c4 = arith.constant 4 : index
    %c0_31 = arith.constant 0 : index
    %37 = vector.load %arg10[%c4, %c0_31] : memref<32x16xf32, #tpu.memory_space<vmem>>, vector<16x16xf32>
    %38 = arith.truncf %37 : vector<16x16xf32> to vector<16x16xbf16>
    %c0_32 = arith.constant 0 : index
    %c3 = arith.constant 3 : index
    %c0_33 = arith.constant 0 : index
    %c0_34 = arith.constant 0 : index
    %39 = vector.load %arg8[%c0_32, %c3, %c0_33, %c0_34] : memref<1x9x16x8xbf16, #tpu.memory_space<vmem>>, vector<1x1x16x8xbf16>
    %40 = vector.shape_cast %39 : vector<1x1x16x8xbf16> to vector<16x8xbf16>
    %cst_35 = arith.constant dense<0.000000e+00> : vector<16x8xf32>
    %41 = tpu.matmul %38, %40, %cst_35 {dimension_numbers = #tpu.dot_dimension_numbers<[1], [0], [0], [1], [0, 0, 1, 1], [], []>} : vector<16x16xbf16>, vector<16x8xbf16>, vector<16x8xf32> -> vector<16x8xf32>
    %42 = arith.addf %36, %41 : vector<16x8xf32>
    %c8 = arith.constant 8 : index
    %c0_36 = arith.constant 0 : index
    %43 = vector.load %arg10[%c8, %c0_36] : memref<32x16xf32, #tpu.memory_space<vmem>>, vector<16x16xf32>
    %44 = arith.truncf %43 : vector<16x16xf32> to vector<16x16xbf16>
    %c0_37 = arith.constant 0 : index
    %c6 = arith.constant 6 : index
    %c0_38 = arith.constant 0 : index
    %c0_39 = arith.constant 0 : index
    %45 = vector.load %arg8[%c0_37, %c6, %c0_38, %c0_39] : memref<1x9x16x8xbf16, #tpu.memory_space<vmem>>, vector<1x1x16x8xbf16>
    %46 = vector.shape_cast %45 : vector<1x1x16x8xbf16> to vector<16x8xbf16>
    %cst_40 = arith.constant dense<0.000000e+00> : vector<16x8xf32>
    %47 = tpu.matmul %44, %46, %cst_40 {dimension_numbers = #tpu.dot_dimension_numbers<[1], [0], [0], [1], [0, 0, 1, 1], [], []>} : vector<16x16xbf16>, vector<16x8xbf16>, vector<16x8xf32> -> vector<16x8xf32>
    %48 = arith.addf %42, %47 : vector<16x8xf32>
    %cst_41 = arith.constant 0.000000e+00 : f32
    %49 = vector.broadcast %cst_41 : f32 to vector<16x8xf32>
    %c1 = arith.constant 1 : index
    %c0_42 = arith.constant 0 : index
    %50 = vector.load %arg10[%c1, %c0_42] : memref<32x16xf32, #tpu.memory_space<vmem>>, vector<16x16xf32>
    %51 = arith.truncf %50 : vector<16x16xf32> to vector<16x16xbf16>
    %c0_43 = arith.constant 0 : index
    %c1_44 = arith.constant 1 : index
    %c0_45 = arith.constant 0 : index
    %c0_46 = arith.constant 0 : index
    %52 = vector.load %arg8[%c0_43, %c1_44, %c0_45, %c0_46] : memref<1x9x16x8xbf16, #tpu.memory_space<vmem>>, vector<1x1x16x8xbf16>
    %53 = vector.shape_cast %52 : vector<1x1x16x8xbf16> to vector<16x8xbf16>
    %cst_47 = arith.constant dense<0.000000e+00> : vector<16x8xf32>
    %54 = tpu.matmul %51, %53, %cst_47 {dimension_numbers = #tpu.dot_dimension_numbers<[1], [0], [0], [1], [0, 0, 1, 1], [], []>} : vector<16x16xbf16>, vector<16x8xbf16>, vector<16x8xf32> -> vector<16x8xf32>
    %55 = arith.addf %49, %54 : vector<16x8xf32>
    %c5_48 = arith.constant 5 : index
    %c0_49 = arith.constant 0 : index
    %56 = vector.load %arg10[%c5_48, %c0_49] : memref<32x16xf32, #tpu.memory_space<vmem>>, vector<16x16xf32>
    %57 = arith.truncf %56 : vector<16x16xf32> to vector<16x16xbf16>
    %c0_50 = arith.constant 0 : index
    %c4_51 = arith.constant 4 : index
    %c0_52 = arith.constant 0 : index
    %c0_53 = arith.constant 0 : index
    %58 = vector.load %arg8[%c0_50, %c4_51, %c0_52, %c0_53] : memref<1x9x16x8xbf16, #tpu.memory_space<vmem>>, vector<1x1x16x8xbf16>
    %59 = vector.shape_cast %58 : vector<1x1x16x8xbf16> to vector<16x8xbf16>
    %cst_54 = arith.constant dense<0.000000e+00> : vector<16x8xf32>
    %60 = tpu.matmul %57, %59, %cst_54 {dimension_numbers = #tpu.dot_dimension_numbers<[1], [0], [0], [1], [0, 0, 1, 1], [], []>} : vector<16x16xbf16>, vector<16x8xbf16>, vector<16x8xf32> -> vector<16x8xf32>
    %61 = arith.addf %55, %60 : vector<16x8xf32>
    %c9 = arith.constant 9 : index
    %c0_55 = arith.constant 0 : index
    %62 = vector.load %arg10[%c9, %c0_55] : memref<32x16xf32, #tpu.memory_space<vmem>>, vector<16x16xf32>
    %63 = arith.truncf %62 : vector<16x16xf32> to vector<16x16xbf16>
    %c0_56 = arith.constant 0 : index
    %c7 = arith.constant 7 : index
    %c0_57 = arith.constant 0 : index
    %c0_58 = arith.constant 0 : index
    %64 = vector.load %arg8[%c0_56, %c7, %c0_57, %c0_58] : memref<1x9x16x8xbf16, #tpu.memory_space<vmem>>, vector<1x1x16x8xbf16>
    %65 = vector.shape_cast %64 : vector<1x1x16x8xbf16> to vector<16x8xbf16>
    %cst_59 = arith.constant dense<0.000000e+00> : vector<16x8xf32>
    %66 = tpu.matmul %63, %65, %cst_59 {dimension_numbers = #tpu.dot_dimension_numbers<[1], [0], [0], [1], [0, 0, 1, 1], [], []>} : vector<16x16xbf16>, vector<16x8xbf16>, vector<16x8xf32> -> vector<16x8xf32>
    %67 = arith.addf %61, %66 : vector<16x8xf32>
    %cst_60 = arith.constant 0.000000e+00 : f32
    %68 = vector.broadcast %cst_60 : f32 to vector<16x8xf32>
    %c2 = arith.constant 2 : index
    %c0_61 = arith.constant 0 : index
    %69 = vector.load %arg10[%c2, %c0_61] : memref<32x16xf32, #tpu.memory_space<vmem>>, vector<16x16xf32>
    %70 = arith.truncf %69 : vector<16x16xf32> to vector<16x16xbf16>
    %c0_62 = arith.constant 0 : index
    %c2_63 = arith.constant 2 : index
    %c0_64 = arith.constant 0 : index
    %c0_65 = arith.constant 0 : index
    %71 = vector.load %arg8[%c0_62, %c2_63, %c0_64, %c0_65] : memref<1x9x16x8xbf16, #tpu.memory_space<vmem>>, vector<1x1x16x8xbf16>
    %72 = vector.shape_cast %71 : vector<1x1x16x8xbf16> to vector<16x8xbf16>
    %cst_66 = arith.constant dense<0.000000e+00> : vector<16x8xf32>
    %73 = tpu.matmul %70, %72, %cst_66 {dimension_numbers = #tpu.dot_dimension_numbers<[1], [0], [0], [1], [0, 0, 1, 1], [], []>} : vector<16x16xbf16>, vector<16x8xbf16>, vector<16x8xf32> -> vector<16x8xf32>
    %74 = arith.addf %68, %73 : vector<16x8xf32>
    %c6_67 = arith.constant 6 : index
    %c0_68 = arith.constant 0 : index
    %75 = vector.load %arg10[%c6_67, %c0_68] : memref<32x16xf32, #tpu.memory_space<vmem>>, vector<16x16xf32>
    %76 = arith.truncf %75 : vector<16x16xf32> to vector<16x16xbf16>
    %c0_69 = arith.constant 0 : index
    %c5_70 = arith.constant 5 : index
    %c0_71 = arith.constant 0 : index
    %c0_72 = arith.constant 0 : index
    %77 = vector.load %arg8[%c0_69, %c5_70, %c0_71, %c0_72] : memref<1x9x16x8xbf16, #tpu.memory_space<vmem>>, vector<1x1x16x8xbf16>
    %78 = vector.shape_cast %77 : vector<1x1x16x8xbf16> to vector<16x8xbf16>
    %cst_73 = arith.constant dense<0.000000e+00> : vector<16x8xf32>
    %79 = tpu.matmul %76, %78, %cst_73 {dimension_numbers = #tpu.dot_dimension_numbers<[1], [0], [0], [1], [0, 0, 1, 1], [], []>} : vector<16x16xbf16>, vector<16x8xbf16>, vector<16x8xf32> -> vector<16x8xf32>
    %80 = arith.addf %74, %79 : vector<16x8xf32>
    %c10 = arith.constant 10 : index
    %c0_74 = arith.constant 0 : index
    %81 = vector.load %arg10[%c10, %c0_74] : memref<32x16xf32, #tpu.memory_space<vmem>>, vector<16x16xf32>
    %82 = arith.truncf %81 : vector<16x16xf32> to vector<16x16xbf16>
    %c0_75 = arith.constant 0 : index
    %c8_76 = arith.constant 8 : index
    %c0_77 = arith.constant 0 : index
    %c0_78 = arith.constant 0 : index
    %83 = vector.load %arg8[%c0_75, %c8_76, %c0_77, %c0_78] : memref<1x9x16x8xbf16, #tpu.memory_space<vmem>>, vector<1x1x16x8xbf16>
    %84 = vector.shape_cast %83 : vector<1x1x16x8xbf16> to vector<16x8xbf16>
    %cst_79 = arith.constant dense<0.000000e+00> : vector<16x8xf32>
    %85 = tpu.matmul %82, %84, %cst_79 {dimension_numbers = #tpu.dot_dimension_numbers<[1], [0], [0], [1], [0, 0, 1, 1], [], []>} : vector<16x16xbf16>, vector<16x8xbf16>, vector<16x8xf32> -> vector<16x8xf32>
    %86 = arith.addf %80, %85 : vector<16x8xf32>
    %87 = tpu.iota {dimensions = array<i32: 0>} : vector<16x1xi32>
    %c4_i32 = arith.constant 4 : i32
    %c0_i32 = arith.constant 0 : i32
    %88 = arith.cmpi eq, %c4_i32, %c0_i32 : i32
    %c1_i32 = arith.constant 1 : i32
    %89 = arith.select %88, %c1_i32, %c4_i32 : i32
    %90 = vector.broadcast %89 : i32 to vector<16x1xi32>
    %91 = arith.remsi %87, %90 : vector<16x1xi32>
    %c0_i32_80 = arith.constant 0 : i32
    %92 = vector.broadcast %c0_i32_80 : i32 to vector<16x1xi32>
    %93 = arith.cmpi ne, %91, %92 : vector<16x1xi32>
    %c0_i32_81 = arith.constant 0 : i32
    %94 = vector.broadcast %c0_i32_81 : i32 to vector<16x1xi32>
    %95 = arith.cmpi slt, %91, %94 : vector<16x1xi32>
    %c0_i32_82 = arith.constant 0 : i32
    %96 = arith.cmpi slt, %89, %c0_i32_82 : i32
    %97 = vector.broadcast %96 : i1 to vector<16x1xi1>
    %98 = vector.broadcast %97 : vector<16x1xi1> to vector<16x1xi1>
    %99 = arith.xori %95, %98 : vector<16x1xi1>
    %100 = arith.andi %99, %93 : vector<16x1xi1>
    %101 = vector.broadcast %89 : i32 to vector<16x1xi32>
    %102 = arith.addi %91, %101 : vector<16x1xi32>
    %103 = arith.select %100, %102, %91 : vector<16x1xi1>, vector<16x1xi32>
    %c0_i32_83 = arith.constant 0 : i32
    %104 = vector.broadcast %c0_i32_83 : i32 to vector<16x1xi32>
    %105 = arith.cmpi ne, %103, %104 : vector<16x1xi32>
    %cst_84 = arith.constant 0.000000e+00 : f32
    %106 = vector.shape_cast %105 : vector<16x1xi1> to vector<16x1xi1>
    %107 = vector.broadcast %106 : vector<16x1xi1> to vector<16x8xi1>
    %108 = vector.broadcast %cst_84 : f32 to vector<16x8xf32>
    %109 = arith.select %107, %48, %108 : vector<16x8xi1>, vector<16x8xf32>
    %110 = arith.addf %109, %67 : vector<16x8xf32>
    %c3_i32 = arith.constant 3 : i32
    %111 = vector.broadcast %c3_i32 : i32 to vector<16x1xi32>
    %112 = arith.cmpi ne, %103, %111 : vector<16x1xi32>
    %cst_85 = arith.constant 0.000000e+00 : f32
    %113 = vector.shape_cast %112 : vector<16x1xi1> to vector<16x1xi1>
    %114 = vector.broadcast %113 : vector<16x1xi1> to vector<16x8xi1>
    %115 = vector.broadcast %cst_85 : f32 to vector<16x8xf32>
    %116 = arith.select %114, %86, %115 : vector<16x8xi1>, vector<16x8xf32>
    %117 = arith.addf %110, %116 : vector<16x8xf32>
    %c0_86 = arith.constant 0 : index
    %c0_87 = arith.constant 0 : index
    %c0_88 = arith.constant 0 : index
    %118 = vector.load %arg9[%c0_86, %c0_87, %c0_88] : memref<1x16x32xbf16, #tpu.memory_space<vmem>>, vector<1x16x32xbf16>
    %119 = vector.shape_cast %118 : vector<1x16x32xbf16> to vector<16x32xbf16>
    %120 = vector.shape_cast %1 : vector<16x32xbf16> to vector<1x16x32xbf16>
    tpu.vector_store %arg9[%c0_86, %c0_87, %c0_88], %120 {strides = array<i32>} : memref<1x16x32xbf16, #tpu.memory_space<vmem>>, vector<1x16x32xbf16>,
    %121 = arith.truncf %117 : vector<16x8xf32> to vector<16x8xbf16>
    %c0_89 = arith.constant 0 : index
    %c0_90 = arith.constant 0 : index
    %c16 = arith.constant 16 : index
    %122 = vector.load %arg9[%c0_89, %c0_90, %c16] : memref<1x16x32xbf16, #tpu.memory_space<vmem>>, vector<1x16x8xbf16>
    %123 = vector.shape_cast %122 : vector<1x16x8xbf16> to vector<16x8xbf16>
    %124 = vector.shape_cast %121 : vector<16x8xbf16> to vector<1x16x8xbf16>
    tpu.vector_store %arg9[%c0_89, %c0_90, %c16], %124 {strides = array<i32>} : memref<1x16x32xbf16, #tpu.memory_space<vmem>>, vector<1x16x8xbf16>,
    return
  }
  func.func @transform_0(%arg0: i32, %arg1: memref<2xi32, #tpu.memory_space<smem>>) -> (i32, i32, i32) {
    %c0_i32 = arith.constant 0 : i32
    %c0_i32_0 = arith.constant 0 : i32
    %c0_i32_1 = arith.constant 0 : i32
    return %arg0, %c0_i32, %c0_i32_0 : i32, i32, i32
  }
  func.func @transform_1(%arg0: i32, %arg1: memref<2xi32, #tpu.memory_space<smem>>) -> (i32, i32, i32) {
    %0 = arith.index_cast %arg0 : i32 to index
    %1 = memref.load %arg1[%0] : memref<2xi32, #tpu.memory_space<smem>>
    %c0_i32 = arith.constant 0 : i32
    %c0_i32_0 = arith.constant 0 : i32
    %c0_i32_1 = arith.constant 0 : i32
    return %1, %c0_i32, %c0_i32_0 : i32, i32, i32
  }
  func.func @transform_2(%arg0: i32, %arg1: memref<2xi32, #tpu.memory_space<smem>>) -> (i32, i32, i32) {
    %0 = arith.index_cast %arg0 : i32 to index
    %1 = memref.load %arg1[%0] : memref<2xi32, #tpu.memory_space<smem>>
    %c0_i32 = arith.constant 0 : i32
    %c0_i32_0 = arith.constant 0 : i32
    %c0_i32_1 = arith.constant 0 : i32
    return %1, %c0_i32, %c0_i32_0 : i32, i32, i32
  }
  func.func @transform_3(%arg0: i32, %arg1: memref<2xi32, #tpu.memory_space<smem>>) -> (i32, i32, i32) {
    %0 = arith.index_cast %arg0 : i32 to index
    %1 = memref.load %arg1[%0] : memref<2xi32, #tpu.memory_space<smem>>
    %c0_i32 = arith.constant 0 : i32
    %c0_i32_0 = arith.constant 0 : i32
    %c0_i32_1 = arith.constant 0 : i32
    return %1, %c0_i32, %c0_i32_0 : i32, i32, i32
  }
  func.func @transform_4(%arg0: i32, %arg1: memref<2xi32, #tpu.memory_space<smem>>) -> (i32, i32, i32) {
    %0 = arith.index_cast %arg0 : i32 to index
    %1 = memref.load %arg1[%0] : memref<2xi32, #tpu.memory_space<smem>>
    %c0_i32 = arith.constant 0 : i32
    %c0_i32_0 = arith.constant 0 : i32
    %c0_i32_1 = arith.constant 0 : i32
    return %1, %c0_i32, %c0_i32_0 : i32, i32, i32
  }
  func.func @transform_5(%arg0: i32, %arg1: memref<2xi32, #tpu.memory_space<smem>>) -> (i32, i32, i32) {
    %0 = arith.index_cast %arg0 : i32 to index
    %1 = memref.load %arg1[%0] : memref<2xi32, #tpu.memory_space<smem>>
    %c0_i32 = arith.constant 0 : i32
    %c0_i32_0 = arith.constant 0 : i32
    %c0_i32_1 = arith.constant 0 : i32
    return %1, %c0_i32, %c0_i32_0 : i32, i32, i32
  }
  func.func @transform_6(%arg0: i32, %arg1: memref<2xi32, #tpu.memory_space<smem>>) -> (i32, i32, i32, i32) {
    %0 = arith.index_cast %arg0 : i32 to index
    %1 = memref.load %arg1[%0] : memref<2xi32, #tpu.memory_space<smem>>
    %c0_i32 = arith.constant 0 : i32
    %c0_i32_0 = arith.constant 0 : i32
    %c0_i32_1 = arith.constant 0 : i32
    %c0_i32_2 = arith.constant 0 : i32
    return %1, %c0_i32, %c0_i32_0, %c0_i32_1 : i32, i32, i32, i32
  }
  func.func @transform_7(%arg0: i32, %arg1: memref<2xi32, #tpu.memory_space<smem>>) -> (i32, i32, i32) {
    %c0_i32 = arith.constant 0 : i32
    %c0_i32_0 = arith.constant 0 : i32
    %c0_i32_1 = arith.constant 0 : i32
    return %arg0, %c0_i32, %c0_i32_0 : i32, i32, i32
  }
}

module attributes {stable_mosaic.version = 11 : i64} {
  func.func @kernel(%arg0: i32, %arg1: memref<2xi32, #tpu.memory_space<smem>>, %arg2: memref<1x16x32xbf16, #tpu.memory_space<vmem>>, %arg3: memref<1x1x32xf32, #tpu.memory_space<vmem>>, %arg4: memref<1x1x32xf32, #tpu.memory_space<vmem>>, %arg5: memref<1x32x16xbf16, #tpu.memory_space<vmem>>, %arg6: memref<1x1x16xf32, #tpu.memory_space<vmem>>, %arg7: memref<1x1x16xf32, #tpu.memory_space<vmem>>, %arg8: memref<1x9x16x8xbf16, #tpu.memory_space<vmem>>, %arg9: memref<1x16x32xbf16, #tpu.memory_space<vmem>>, %arg10: memref<32x16xf32, #tpu.memory_space<vmem>>) attributes {dimension_semantics = [#tpu.dimension_semantics<parallel>], iteration_bounds = array<i64: 2>, scalar_prefetch = 1 : i64, scratch_operands = 1 : i64, tpu.core_type = #tpu.core_type<tc>, window_params = [{transform_indices = @transform_0, window_bounds = array<i64: 1, 16, 32>}, {transform_indices = @transform_1, window_bounds = array<i64: 1, 1, 32>}, {transform_indices = @transform_2, window_bounds = array<i64: 1, 1, 32>}, {transform_indices = @transform_3, window_bounds = array<i64: 1, 32, 16>}, {transform_indices = @transform_4, window_bounds = array<i64: 1, 1, 16>}, {transform_indices = @transform_5, window_bounds = array<i64: 1, 1, 16>}, {transform_indices = @transform_6, window_bounds = array<i64: 1, 9, 16, 8>}, {transform_indices = @transform_7, window_bounds = array<i64: 1, 16, 32>}]} {
    %c0 = arith.constant 0 : index
    %c0_0 = arith.constant 0 : index
    %c0_1 = arith.constant 0 : index
    %0 = vector.load %arg2[%c0, %c0_0, %c0_1] : memref<1x16x32xbf16, #tpu.memory_space<vmem>>, vector<1x16x32xbf16>
    %1 = vector.shape_cast %0 : vector<1x16x32xbf16> to vector<16x32xbf16>
    %2 = arith.extf %1 : vector<16x32xbf16> to vector<16x32xf32>
    %c0_2 = arith.constant 0 : index
    %c0_3 = arith.constant 0 : index
    %c0_4 = arith.constant 0 : index
    %3 = vector.load %arg3[%c0_2, %c0_3, %c0_4] : memref<1x1x32xf32, #tpu.memory_space<vmem>>, vector<1x1x32xf32>
    %4 = vector.shape_cast %3 : vector<1x1x32xf32> to vector<1x32xf32>
    %5 = vector.broadcast %4 : vector<1x32xf32> to vector<16x32xf32>
    %6 = arith.mulf %2, %5 : vector<16x32xf32>
    %c0_5 = arith.constant 0 : index
    %c0_6 = arith.constant 0 : index
    %c0_7 = arith.constant 0 : index
    %7 = vector.load %arg4[%c0_5, %c0_6, %c0_7] : memref<1x1x32xf32, #tpu.memory_space<vmem>>, vector<1x1x32xf32>
    %8 = vector.shape_cast %7 : vector<1x1x32xf32> to vector<1x32xf32>
    %9 = vector.broadcast %8 : vector<1x32xf32> to vector<16x32xf32>
    %10 = arith.addf %6, %9 : vector<16x32xf32>
    %cst = arith.constant 0.000000e+00 : f32
    %11 = vector.broadcast %cst : f32 to vector<16x32xf32>
    %12 = arith.maximumf %10, %11 : vector<16x32xf32>
    %13 = arith.truncf %12 : vector<16x32xf32> to vector<16x32xbf16>
    %c0_8 = arith.constant 0 : index
    %c0_9 = arith.constant 0 : index
    %c0_10 = arith.constant 0 : index
    %14 = vector.load %arg5[%c0_8, %c0_9, %c0_10] : memref<1x32x16xbf16, #tpu.memory_space<vmem>>, vector<1x32x16xbf16>
    %15 = vector.shape_cast %14 : vector<1x32x16xbf16> to vector<32x16xbf16>
    %cst_11 = arith.constant dense<0.000000e+00> : vector<16x16xf32>
    %16 = tpu.matmul %13, %15, %cst_11 {dimension_numbers = #tpu.dot_dimension_numbers<[1], [0], [0], [1], [0, 0, 1, 1], [], []>} : vector<16x32xbf16>, vector<32x16xbf16>, vector<16x16xf32> -> vector<16x16xf32>
    %c0_12 = arith.constant 0 : index
    %c0_13 = arith.constant 0 : index
    %c0_14 = arith.constant 0 : index
    %17 = vector.load %arg6[%c0_12, %c0_13, %c0_14] : memref<1x1x16xf32, #tpu.memory_space<vmem>>, vector<1x1x16xf32>
    %18 = vector.shape_cast %17 : vector<1x1x16xf32> to vector<1x16xf32>
    %19 = vector.broadcast %18 : vector<1x16xf32> to vector<16x16xf32>
    %20 = arith.mulf %16, %19 : vector<16x16xf32>
    %c0_15 = arith.constant 0 : index
    %c0_16 = arith.constant 0 : index
    %c0_17 = arith.constant 0 : index
    %21 = vector.load %arg7[%c0_15, %c0_16, %c0_17] : memref<1x1x16xf32, #tpu.memory_space<vmem>>, vector<1x1x16xf32>
    %22 = vector.shape_cast %21 : vector<1x1x16xf32> to vector<1x16xf32>
    %23 = vector.broadcast %22 : vector<1x16xf32> to vector<16x16xf32>
    %24 = arith.addf %20, %23 : vector<16x16xf32>
    %cst_18 = arith.constant 0.000000e+00 : f32
    %25 = vector.broadcast %cst_18 : f32 to vector<16x16xf32>
    %26 = arith.maximumf %24, %25 : vector<16x16xf32>
    %cst_19 = arith.constant 0.000000e+00 : f32
    %27 = vector.broadcast %cst_19 : f32 to vector<32x16xf32>
    %c0_20 = arith.constant 0 : index
    %c0_21 = arith.constant 0 : index
    %28 = vector.load %arg10[%c0_20, %c0_21] : memref<32x16xf32, #tpu.memory_space<vmem>>, vector<32x16xf32>
    tpu.vector_store %arg10[%c0_20, %c0_21], %27 {strides = array<i32>} : memref<32x16xf32, #tpu.memory_space<vmem>>, vector<32x16xf32>,
    %c5 = arith.constant 5 : index
    %c0_22 = arith.constant 0 : index
    %29 = vector.load %arg10[%c5, %c0_22] : memref<32x16xf32, #tpu.memory_space<vmem>>, vector<16x16xf32>
    tpu.vector_store %arg10[%c5, %c0_22], %26 {strides = array<i32>} : memref<32x16xf32, #tpu.memory_space<vmem>>, vector<16x16xf32>,
    %cst_23 = arith.constant 0.000000e+00 : f32
    %30 = vector.broadcast %cst_23 : f32 to vector<16x8xf32>
    %c0_24 = arith.constant 0 : index
    %c0_25 = arith.constant 0 : index
    %31 = vector.load %arg10[%c0_24, %c0_25] : memref<32x16xf32, #tpu.memory_space<vmem>>, vector<16x16xf32>
    %32 = arith.truncf %31 : vector<16x16xf32> to vector<16x16xbf16>
    %c0_26 = arith.constant 0 : index
    %c0_27 = arith.constant 0 : index
    %c0_28 = arith.constant 0 : index
    %c0_29 = arith.constant 0 : index
    %33 = vector.load %arg8[%c0_26, %c0_27, %c0_28, %c0_29] : memref<1x9x16x8xbf16, #tpu.memory_space<vmem>>, vector<1x1x16x8xbf16>
    %34 = vector.shape_cast %33 : vector<1x1x16x8xbf16> to vector<16x8xbf16>
    %cst_30 = arith.constant dense<0.000000e+00> : vector<16x8xf32>
    %35 = tpu.matmul %32, %34, %cst_30 {dimension_numbers = #tpu.dot_dimension_numbers<[1], [0], [0], [1], [0, 0, 1, 1], [], []>} : vector<16x16xbf16>, vector<16x8xbf16>, vector<16x8xf32> -> vector<16x8xf32>
    %36 = arith.addf %30, %35 : vector<16x8xf32>
    %c4 = arith.constant 4 : index
    %c0_31 = arith.constant 0 : index
    %37 = vector.load %arg10[%c4, %c0_31] : memref<32x16xf32, #tpu.memory_space<vmem>>, vector<16x16xf32>
    %38 = arith.truncf %37 : vector<16x16xf32> to vector<16x16xbf16>
    %c0_32 = arith.constant 0 : index
    %c3 = arith.constant 3 : index
    %c0_33 = arith.constant 0 : index
    %c0_34 = arith.constant 0 : index
    %39 = vector.load %arg8[%c0_32, %c3, %c0_33, %c0_34] : memref<1x9x16x8xbf16, #tpu.memory_space<vmem>>, vector<1x1x16x8xbf16>
    %40 = vector.shape_cast %39 : vector<1x1x16x8xbf16> to vector<16x8xbf16>
    %cst_35 = arith.constant dense<0.000000e+00> : vector<16x8xf32>
    %41 = tpu.matmul %38, %40, %cst_35 {dimension_numbers = #tpu.dot_dimension_numbers<[1], [0], [0], [1], [0, 0, 1, 1], [], []>} : vector<16x16xbf16>, vector<16x8xbf16>, vector<16x8xf32> -> vector<16x8xf32>
    %42 = arith.addf %36, %41 : vector<16x8xf32>
    %c8 = arith.constant 8 : index
    %c0_36 = arith.constant 0 : index
    %43 = vector.load %arg10[%c8, %c0_36] : memref<32x16xf32, #tpu.memory_space<vmem>>, vector<16x16xf32>
    %44 = arith.truncf %43 : vector<16x16xf32> to vector<16x16xbf16>
    %c0_37 = arith.constant 0 : index
    %c6 = arith.constant 6 : index
    %c0_38 = arith.constant 0 : index
    %c0_39 = arith.constant 0 : index
    %45 = vector.load %arg8[%c0_37, %c6, %c0_38, %c0_39] : memref<1x9x16x8xbf16, #tpu.memory_space<vmem>>, vector<1x1x16x8xbf16>
    %46 = vector.shape_cast %45 : vector<1x1x16x8xbf16> to vector<16x8xbf16>
    %cst_40 = arith.constant dense<0.000000e+00> : vector<16x8xf32>
    %47 = tpu.matmul %44, %46, %cst_40 {dimension_numbers = #tpu.dot_dimension_numbers<[1], [0], [0], [1], [0, 0, 1, 1], [], []>} : vector<16x16xbf16>, vector<16x8xbf16>, vector<16x8xf32> -> vector<16x8xf32>
    %48 = arith.addf %42, %47 : vector<16x8xf32>
    %cst_41 = arith.constant 0.000000e+00 : f32
    %49 = vector.broadcast %cst_41 : f32 to vector<16x8xf32>
    %c1 = arith.constant 1 : index
    %c0_42 = arith.constant 0 : index
    %50 = vector.load %arg10[%c1, %c0_42] : memref<32x16xf32, #tpu.memory_space<vmem>>, vector<16x16xf32>
    %51 = arith.truncf %50 : vector<16x16xf32> to vector<16x16xbf16>
    %c0_43 = arith.constant 0 : index
    %c1_44 = arith.constant 1 : index
    %c0_45 = arith.constant 0 : index
    %c0_46 = arith.constant 0 : index
    %52 = vector.load %arg8[%c0_43, %c1_44, %c0_45, %c0_46] : memref<1x9x16x8xbf16, #tpu.memory_space<vmem>>, vector<1x1x16x8xbf16>
    %53 = vector.shape_cast %52 : vector<1x1x16x8xbf16> to vector<16x8xbf16>
    %cst_47 = arith.constant dense<0.000000e+00> : vector<16x8xf32>
    %54 = tpu.matmul %51, %53, %cst_47 {dimension_numbers = #tpu.dot_dimension_numbers<[1], [0], [0], [1], [0, 0, 1, 1], [], []>} : vector<16x16xbf16>, vector<16x8xbf16>, vector<16x8xf32> -> vector<16x8xf32>
    %55 = arith.addf %49, %54 : vector<16x8xf32>
    %c5_48 = arith.constant 5 : index
    %c0_49 = arith.constant 0 : index
    %56 = vector.load %arg10[%c5_48, %c0_49] : memref<32x16xf32, #tpu.memory_space<vmem>>, vector<16x16xf32>
    %57 = arith.truncf %56 : vector<16x16xf32> to vector<16x16xbf16>
    %c0_50 = arith.constant 0 : index
    %c4_51 = arith.constant 4 : index
    %c0_52 = arith.constant 0 : index
    %c0_53 = arith.constant 0 : index
    %58 = vector.load %arg8[%c0_50, %c4_51, %c0_52, %c0_53] : memref<1x9x16x8xbf16, #tpu.memory_space<vmem>>, vector<1x1x16x8xbf16>
    %59 = vector.shape_cast %58 : vector<1x1x16x8xbf16> to vector<16x8xbf16>
    %cst_54 = arith.constant dense<0.000000e+00> : vector<16x8xf32>
    %60 = tpu.matmul %57, %59, %cst_54 {dimension_numbers = #tpu.dot_dimension_numbers<[1], [0], [0], [1], [0, 0, 1, 1], [], []>} : vector<16x16xbf16>, vector<16x8xbf16>, vector<16x8xf32> -> vector<16x8xf32>
    %61 = arith.addf %55, %60 : vector<16x8xf32>
    %c9 = arith.constant 9 : index
    %c0_55 = arith.constant 0 : index
    %62 = vector.load %arg10[%c9, %c0_55] : memref<32x16xf32, #tpu.memory_space<vmem>>, vector<16x16xf32>
    %63 = arith.truncf %62 : vector<16x16xf32> to vector<16x16xbf16>
    %c0_56 = arith.constant 0 : index
    %c7 = arith.constant 7 : index
    %c0_57 = arith.constant 0 : index
    %c0_58 = arith.constant 0 : index
    %64 = vector.load %arg8[%c0_56, %c7, %c0_57, %c0_58] : memref<1x9x16x8xbf16, #tpu.memory_space<vmem>>, vector<1x1x16x8xbf16>
    %65 = vector.shape_cast %64 : vector<1x1x16x8xbf16> to vector<16x8xbf16>
    %cst_59 = arith.constant dense<0.000000e+00> : vector<16x8xf32>
    %66 = tpu.matmul %63, %65, %cst_59 {dimension_numbers = #tpu.dot_dimension_numbers<[1], [0], [0], [1], [0, 0, 1, 1], [], []>} : vector<16x16xbf16>, vector<16x8xbf16>, vector<16x8xf32> -> vector<16x8xf32>
    %67 = arith.addf %61, %66 : vector<16x8xf32>
    %cst_60 = arith.constant 0.000000e+00 : f32
    %68 = vector.broadcast %cst_60 : f32 to vector<16x8xf32>
    %c2 = arith.constant 2 : index
    %c0_61 = arith.constant 0 : index
    %69 = vector.load %arg10[%c2, %c0_61] : memref<32x16xf32, #tpu.memory_space<vmem>>, vector<16x16xf32>
    %70 = arith.truncf %69 : vector<16x16xf32> to vector<16x16xbf16>
    %c0_62 = arith.constant 0 : index
    %c2_63 = arith.constant 2 : index
    %c0_64 = arith.constant 0 : index
    %c0_65 = arith.constant 0 : index
    %71 = vector.load %arg8[%c0_62, %c2_63, %c0_64, %c0_65] : memref<1x9x16x8xbf16, #tpu.memory_space<vmem>>, vector<1x1x16x8xbf16>
    %72 = vector.shape_cast %71 : vector<1x1x16x8xbf16> to vector<16x8xbf16>
    %cst_66 = arith.constant dense<0.000000e+00> : vector<16x8xf32>
    %73 = tpu.matmul %70, %72, %cst_66 {dimension_numbers = #tpu.dot_dimension_numbers<[1], [0], [0], [1], [0, 0, 1, 1], [], []>} : vector<16x16xbf16>, vector<16x8xbf16>, vector<16x8xf32> -> vector<16x8xf32>
    %74 = arith.addf %68, %73 : vector<16x8xf32>
    %c6_67 = arith.constant 6 : index
    %c0_68 = arith.constant 0 : index
    %75 = vector.load %arg10[%c6_67, %c0_68] : memref<32x16xf32, #tpu.memory_space<vmem>>, vector<16x16xf32>
    %76 = arith.truncf %75 : vector<16x16xf32> to vector<16x16xbf16>
    %c0_69 = arith.constant 0 : index
    %c5_70 = arith.constant 5 : index
    %c0_71 = arith.constant 0 : index
    %c0_72 = arith.constant 0 : index
    %77 = vector.load %arg8[%c0_69, %c5_70, %c0_71, %c0_72] : memref<1x9x16x8xbf16, #tpu.memory_space<vmem>>, vector<1x1x16x8xbf16>
    %78 = vector.shape_cast %77 : vector<1x1x16x8xbf16> to vector<16x8xbf16>
    %cst_73 = arith.constant dense<0.000000e+00> : vector<16x8xf32>
    %79 = tpu.matmul %76, %78, %cst_73 {dimension_numbers = #tpu.dot_dimension_numbers<[1], [0], [0], [1], [0, 0, 1, 1], [], []>} : vector<16x16xbf16>, vector<16x8xbf16>, vector<16x8xf32> -> vector<16x8xf32>
    %80 = arith.addf %74, %79 : vector<16x8xf32>
    %c10 = arith.constant 10 : index
    %c0_74 = arith.constant 0 : index
    %81 = vector.load %arg10[%c10, %c0_74] : memref<32x16xf32, #tpu.memory_space<vmem>>, vector<16x16xf32>
    %82 = arith.truncf %81 : vector<16x16xf32> to vector<16x16xbf16>
    %c0_75 = arith.constant 0 : index
    %c8_76 = arith.constant 8 : index
    %c0_77 = arith.constant 0 : index
    %c0_78 = arith.constant 0 : index
    %83 = vector.load %arg8[%c0_75, %c8_76, %c0_77, %c0_78] : memref<1x9x16x8xbf16, #tpu.memory_space<vmem>>, vector<1x1x16x8xbf16>
    %84 = vector.shape_cast %83 : vector<1x1x16x8xbf16> to vector<16x8xbf16>
    %cst_79 = arith.constant dense<0.000000e+00> : vector<16x8xf32>
    %85 = tpu.matmul %82, %84, %cst_79 {dimension_numbers = #tpu.dot_dimension_numbers<[1], [0], [0], [1], [0, 0, 1, 1], [], []>} : vector<16x16xbf16>, vector<16x8xbf16>, vector<16x8xf32> -> vector<16x8xf32>
    %86 = arith.addf %80, %85 : vector<16x8xf32>
    %87 = tpu.iota {dimensions = array<i32: 0>} : vector<16x1xi32>
    %c4_i32 = arith.constant 4 : i32
    %c0_i32 = arith.constant 0 : i32
    %88 = arith.cmpi eq, %c4_i32, %c0_i32 : i32
    %c1_i32 = arith.constant 1 : i32
    %89 = arith.select %88, %c1_i32, %c4_i32 : i32
    %90 = vector.broadcast %89 : i32 to vector<16x1xi32>
    %91 = arith.remsi %87, %90 : vector<16x1xi32>
    %c0_i32_80 = arith.constant 0 : i32
    %92 = vector.broadcast %c0_i32_80 : i32 to vector<16x1xi32>
    %93 = arith.cmpi ne, %91, %92 : vector<16x1xi32>
    %c0_i32_81 = arith.constant 0 : i32
    %94 = vector.broadcast %c0_i32_81 : i32 to vector<16x1xi32>
    %95 = arith.cmpi slt, %91, %94 : vector<16x1xi32>
    %c0_i32_82 = arith.constant 0 : i32
    %96 = arith.cmpi slt, %89, %c0_i32_82 : i32
    %97 = vector.broadcast %96 : i1 to vector<16x1xi1>
    %98 = vector.broadcast %97 : vector<16x1xi1> to vector<16x1xi1>
    %99 = arith.xori %95, %98 : vector<16x1xi1>
    %100 = arith.andi %99, %93 : vector<16x1xi1>
    %101 = vector.broadcast %89 : i32 to vector<16x1xi32>
    %102 = arith.addi %91, %101 : vector<16x1xi32>
    %103 = arith.select %100, %102, %91 : vector<16x1xi1>, vector<16x1xi32>
    %c0_i32_83 = arith.constant 0 : i32
    %104 = vector.broadcast %c0_i32_83 : i32 to vector<16x1xi32>
    %105 = arith.cmpi ne, %103, %104 : vector<16x1xi32>
    %cst_84 = arith.constant 0.000000e+00 : f32
    %106 = vector.shape_cast %105 : vector<16x1xi1> to vector<16x1xi1>
    %107 = vector.broadcast %106 : vector<16x1xi1> to vector<16x8xi1>
    %108 = vector.broadcast %cst_84 : f32 to vector<16x8xf32>
    %109 = arith.select %107, %48, %108 : vector<16x8xi1>, vector<16x8xf32>
    %110 = arith.addf %109, %67 : vector<16x8xf32>
    %c3_i32 = arith.constant 3 : i32
    %111 = vector.broadcast %c3_i32 : i32 to vector<16x1xi32>
    %112 = arith.cmpi ne, %103, %111 : vector<16x1xi32>
    %cst_85 = arith.constant 0.000000e+00 : f32
    %113 = vector.shape_cast %112 : vector<16x1xi1> to vector<16x1xi1>
    %114 = vector.broadcast %113 : vector<16x1xi1> to vector<16x8xi1>
    %115 = vector.broadcast %cst_85 : f32 to vector<16x8xf32>
    %116 = arith.select %114, %86, %115 : vector<16x8xi1>, vector<16x8xf32>
    %117 = arith.addf %110, %116 : vector<16x8xf32>
    %c0_86 = arith.constant 0 : index
    %c0_87 = arith.constant 0 : index
    %c0_88 = arith.constant 0 : index
    %118 = vector.load %arg9[%c0_86, %c0_87, %c0_88] : memref<1x16x32xbf16, #tpu.memory_space<vmem>>, vector<1x16x32xbf16>
    %119 = vector.shape_cast %118 : vector<1x16x32xbf16> to vector<16x32xbf16>
    %120 = vector.shape_cast %1 : vector<16x32xbf16> to vector<1x16x32xbf16>
    tpu.vector_store %arg9[%c0_86, %c0_87, %c0_88], %120 {strides = array<i32>} : memref<1x16x32xbf16, #tpu.memory_space<vmem>>, vector<1x16x32xbf16>,
    %121 = arith.truncf %117 : vector<16x8xf32> to vector<16x8xbf16>
    %c0_89 = arith.constant 0 : index
    %c0_90 = arith.constant 0 : index
    %c24 = arith.constant 24 : index
    %122 = vector.load %arg9[%c0_89, %c0_90, %c24] : memref<1x16x32xbf16, #tpu.memory_space<vmem>>, vector<1x16x8xbf16>
    %123 = vector.shape_cast %122 : vector<1x16x8xbf16> to vector<16x8xbf16>
    %124 = vector.shape_cast %121 : vector<16x8xbf16> to vector<1x16x8xbf16>
    tpu.vector_store %arg9[%c0_89, %c0_90, %c24], %124 {strides = array<i32>} : memref<1x16x32xbf16, #tpu.memory_space<vmem>>, vector<1x16x8xbf16>,
    return
  }
  func.func @transform_0(%arg0: i32, %arg1: memref<2xi32, #tpu.memory_space<smem>>) -> (i32, i32, i32) {
    %c0_i32 = arith.constant 0 : i32
    %c0_i32_0 = arith.constant 0 : i32
    %c0_i32_1 = arith.constant 0 : i32
    return %arg0, %c0_i32, %c0_i32_0 : i32, i32, i32
  }
  func.func @transform_1(%arg0: i32, %arg1: memref<2xi32, #tpu.memory_space<smem>>) -> (i32, i32, i32) {
    %0 = arith.index_cast %arg0 : i32 to index
    %1 = memref.load %arg1[%0] : memref<2xi32, #tpu.memory_space<smem>>
    %c0_i32 = arith.constant 0 : i32
    %c0_i32_0 = arith.constant 0 : i32
    %c0_i32_1 = arith.constant 0 : i32
    return %1, %c0_i32, %c0_i32_0 : i32, i32, i32
  }
  func.func @transform_2(%arg0: i32, %arg1: memref<2xi32, #tpu.memory_space<smem>>) -> (i32, i32, i32) {
    %0 = arith.index_cast %arg0 : i32 to index
    %1 = memref.load %arg1[%0] : memref<2xi32, #tpu.memory_space<smem>>
    %c0_i32 = arith.constant 0 : i32
    %c0_i32_0 = arith.constant 0 : i32
    %c0_i32_1 = arith.constant 0 : i32
    return %1, %c0_i32, %c0_i32_0 : i32, i32, i32
  }
  func.func @transform_3(%arg0: i32, %arg1: memref<2xi32, #tpu.memory_space<smem>>) -> (i32, i32, i32) {
    %0 = arith.index_cast %arg0 : i32 to index
    %1 = memref.load %arg1[%0] : memref<2xi32, #tpu.memory_space<smem>>
    %c0_i32 = arith.constant 0 : i32
    %c0_i32_0 = arith.constant 0 : i32
    %c0_i32_1 = arith.constant 0 : i32
    return %1, %c0_i32, %c0_i32_0 : i32, i32, i32
  }
  func.func @transform_4(%arg0: i32, %arg1: memref<2xi32, #tpu.memory_space<smem>>) -> (i32, i32, i32) {
    %0 = arith.index_cast %arg0 : i32 to index
    %1 = memref.load %arg1[%0] : memref<2xi32, #tpu.memory_space<smem>>
    %c0_i32 = arith.constant 0 : i32
    %c0_i32_0 = arith.constant 0 : i32
    %c0_i32_1 = arith.constant 0 : i32
    return %1, %c0_i32, %c0_i32_0 : i32, i32, i32
  }
  func.func @transform_5(%arg0: i32, %arg1: memref<2xi32, #tpu.memory_space<smem>>) -> (i32, i32, i32) {
    %0 = arith.index_cast %arg0 : i32 to index
    %1 = memref.load %arg1[%0] : memref<2xi32, #tpu.memory_space<smem>>
    %c0_i32 = arith.constant 0 : i32
    %c0_i32_0 = arith.constant 0 : i32
    %c0_i32_1 = arith.constant 0 : i32
    return %1, %c0_i32, %c0_i32_0 : i32, i32, i32
  }
  func.func @transform_6(%arg0: i32, %arg1: memref<2xi32, #tpu.memory_space<smem>>) -> (i32, i32, i32, i32) {
    %0 = arith.index_cast %arg0 : i32 to index
    %1 = memref.load %arg1[%0] : memref<2xi32, #tpu.memory_space<smem>>
    %c0_i32 = arith.constant 0 : i32
    %c0_i32_0 = arith.constant 0 : i32
    %c0_i32_1 = arith.constant 0 : i32
    %c0_i32_2 = arith.constant 0 : i32
    return %1, %c0_i32, %c0_i32_0, %c0_i32_1 : i32, i32, i32, i32
  }
  func.func @transform_7(%arg0: i32, %arg1: memref<2xi32, #tpu.memory_space<smem>>) -> (i32, i32, i32) {
    %c0_i32 = arith.constant 0 : i32
    %c0_i32_0 = arith.constant 0 : i32
    %c0_i32_1 = arith.constant 0 : i32
    return %arg0, %c0_i32, %c0_i32_0 : i32, i32, i32
  }
}

module attributes {stable_mosaic.version = 11 : i64} {
  func.func @kernel(%arg0: i32, %arg1: memref<2xi32, #tpu.memory_space<smem>>, %arg2: memref<1x4x32xbf16, #tpu.memory_space<vmem>>, %arg3: memref<1x1x32xf32, #tpu.memory_space<vmem>>, %arg4: memref<1x1x32xf32, #tpu.memory_space<vmem>>, %arg5: memref<1x32x16xbf16, #tpu.memory_space<vmem>>, %arg6: memref<1x1x16xf32, #tpu.memory_space<vmem>>, %arg7: memref<1x1x16xf32, #tpu.memory_space<vmem>>, %arg8: memref<1x9x16x8xbf16, #tpu.memory_space<vmem>>, %arg9: memref<1x4x32xbf16, #tpu.memory_space<vmem>>, %arg10: memref<16x16xf32, #tpu.memory_space<vmem>>) attributes {dimension_semantics = [#tpu.dimension_semantics<parallel>], iteration_bounds = array<i64: 2>, scalar_prefetch = 1 : i64, scratch_operands = 1 : i64, tpu.core_type = #tpu.core_type<tc>, window_params = [{transform_indices = @transform_0, window_bounds = array<i64: 1, 4, 32>}, {transform_indices = @transform_1, window_bounds = array<i64: 1, 1, 32>}, {transform_indices = @transform_2, window_bounds = array<i64: 1, 1, 32>}, {transform_indices = @transform_3, window_bounds = array<i64: 1, 32, 16>}, {transform_indices = @transform_4, window_bounds = array<i64: 1, 1, 16>}, {transform_indices = @transform_5, window_bounds = array<i64: 1, 1, 16>}, {transform_indices = @transform_6, window_bounds = array<i64: 1, 9, 16, 8>}, {transform_indices = @transform_7, window_bounds = array<i64: 1, 4, 32>}]} {
    %c0 = arith.constant 0 : index
    %c0_0 = arith.constant 0 : index
    %c0_1 = arith.constant 0 : index
    %0 = vector.load %arg2[%c0, %c0_0, %c0_1] : memref<1x4x32xbf16, #tpu.memory_space<vmem>>, vector<1x4x32xbf16>
    %1 = vector.shape_cast %0 : vector<1x4x32xbf16> to vector<4x32xbf16>
    %2 = arith.extf %1 : vector<4x32xbf16> to vector<4x32xf32>
    %c0_2 = arith.constant 0 : index
    %c0_3 = arith.constant 0 : index
    %c0_4 = arith.constant 0 : index
    %3 = vector.load %arg3[%c0_2, %c0_3, %c0_4] : memref<1x1x32xf32, #tpu.memory_space<vmem>>, vector<1x1x32xf32>
    %4 = vector.shape_cast %3 : vector<1x1x32xf32> to vector<1x32xf32>
    %5 = vector.broadcast %4 : vector<1x32xf32> to vector<4x32xf32>
    %6 = arith.mulf %2, %5 : vector<4x32xf32>
    %c0_5 = arith.constant 0 : index
    %c0_6 = arith.constant 0 : index
    %c0_7 = arith.constant 0 : index
    %7 = vector.load %arg4[%c0_5, %c0_6, %c0_7] : memref<1x1x32xf32, #tpu.memory_space<vmem>>, vector<1x1x32xf32>
    %8 = vector.shape_cast %7 : vector<1x1x32xf32> to vector<1x32xf32>
    %9 = vector.broadcast %8 : vector<1x32xf32> to vector<4x32xf32>
    %10 = arith.addf %6, %9 : vector<4x32xf32>
    %cst = arith.constant 0.000000e+00 : f32
    %11 = vector.broadcast %cst : f32 to vector<4x32xf32>
    %12 = arith.maximumf %10, %11 : vector<4x32xf32>
    %13 = arith.truncf %12 : vector<4x32xf32> to vector<4x32xbf16>
    %c0_8 = arith.constant 0 : index
    %c0_9 = arith.constant 0 : index
    %c0_10 = arith.constant 0 : index
    %14 = vector.load %arg5[%c0_8, %c0_9, %c0_10] : memref<1x32x16xbf16, #tpu.memory_space<vmem>>, vector<1x32x16xbf16>
    %15 = vector.shape_cast %14 : vector<1x32x16xbf16> to vector<32x16xbf16>
    %cst_11 = arith.constant dense<0.000000e+00> : vector<4x16xf32>
    %16 = tpu.matmul %13, %15, %cst_11 {dimension_numbers = #tpu.dot_dimension_numbers<[1], [0], [0], [1], [0, 0, 1, 1], [], []>} : vector<4x32xbf16>, vector<32x16xbf16>, vector<4x16xf32> -> vector<4x16xf32>
    %c0_12 = arith.constant 0 : index
    %c0_13 = arith.constant 0 : index
    %c0_14 = arith.constant 0 : index
    %17 = vector.load %arg6[%c0_12, %c0_13, %c0_14] : memref<1x1x16xf32, #tpu.memory_space<vmem>>, vector<1x1x16xf32>
    %18 = vector.shape_cast %17 : vector<1x1x16xf32> to vector<1x16xf32>
    %19 = vector.broadcast %18 : vector<1x16xf32> to vector<4x16xf32>
    %20 = arith.mulf %16, %19 : vector<4x16xf32>
    %c0_15 = arith.constant 0 : index
    %c0_16 = arith.constant 0 : index
    %c0_17 = arith.constant 0 : index
    %21 = vector.load %arg7[%c0_15, %c0_16, %c0_17] : memref<1x1x16xf32, #tpu.memory_space<vmem>>, vector<1x1x16xf32>
    %22 = vector.shape_cast %21 : vector<1x1x16xf32> to vector<1x16xf32>
    %23 = vector.broadcast %22 : vector<1x16xf32> to vector<4x16xf32>
    %24 = arith.addf %20, %23 : vector<4x16xf32>
    %cst_18 = arith.constant 0.000000e+00 : f32
    %25 = vector.broadcast %cst_18 : f32 to vector<4x16xf32>
    %26 = arith.maximumf %24, %25 : vector<4x16xf32>
    %cst_19 = arith.constant 0.000000e+00 : f32
    %27 = vector.broadcast %cst_19 : f32 to vector<16x16xf32>
    %c0_20 = arith.constant 0 : index
    %c0_21 = arith.constant 0 : index
    %28 = vector.load %arg10[%c0_20, %c0_21] : memref<16x16xf32, #tpu.memory_space<vmem>>, vector<16x16xf32>
    tpu.vector_store %arg10[%c0_20, %c0_21], %27 {strides = array<i32>} : memref<16x16xf32, #tpu.memory_space<vmem>>, vector<16x16xf32>,
    %c3 = arith.constant 3 : index
    %c0_22 = arith.constant 0 : index
    %29 = vector.load %arg10[%c3, %c0_22] : memref<16x16xf32, #tpu.memory_space<vmem>>, vector<4x16xf32>
    tpu.vector_store %arg10[%c3, %c0_22], %26 {strides = array<i32>} : memref<16x16xf32, #tpu.memory_space<vmem>>, vector<4x16xf32>,
    %cst_23 = arith.constant 0.000000e+00 : f32
    %30 = vector.broadcast %cst_23 : f32 to vector<4x8xf32>
    %c0_24 = arith.constant 0 : index
    %c0_25 = arith.constant 0 : index
    %31 = vector.load %arg10[%c0_24, %c0_25] : memref<16x16xf32, #tpu.memory_space<vmem>>, vector<4x16xf32>
    %32 = arith.truncf %31 : vector<4x16xf32> to vector<4x16xbf16>
    %c0_26 = arith.constant 0 : index
    %c0_27 = arith.constant 0 : index
    %c0_28 = arith.constant 0 : index
    %c0_29 = arith.constant 0 : index
    %33 = vector.load %arg8[%c0_26, %c0_27, %c0_28, %c0_29] : memref<1x9x16x8xbf16, #tpu.memory_space<vmem>>, vector<1x1x16x8xbf16>
    %34 = vector.shape_cast %33 : vector<1x1x16x8xbf16> to vector<16x8xbf16>
    %cst_30 = arith.constant dense<0.000000e+00> : vector<4x8xf32>
    %35 = tpu.matmul %32, %34, %cst_30 {dimension_numbers = #tpu.dot_dimension_numbers<[1], [0], [0], [1], [0, 0, 1, 1], [], []>} : vector<4x16xbf16>, vector<16x8xbf16>, vector<4x8xf32> -> vector<4x8xf32>
    %36 = arith.addf %30, %35 : vector<4x8xf32>
    %c2 = arith.constant 2 : index
    %c0_31 = arith.constant 0 : index
    %37 = vector.load %arg10[%c2, %c0_31] : memref<16x16xf32, #tpu.memory_space<vmem>>, vector<4x16xf32>
    %38 = arith.truncf %37 : vector<4x16xf32> to vector<4x16xbf16>
    %c0_32 = arith.constant 0 : index
    %c3_33 = arith.constant 3 : index
    %c0_34 = arith.constant 0 : index
    %c0_35 = arith.constant 0 : index
    %39 = vector.load %arg8[%c0_32, %c3_33, %c0_34, %c0_35] : memref<1x9x16x8xbf16, #tpu.memory_space<vmem>>, vector<1x1x16x8xbf16>
    %40 = vector.shape_cast %39 : vector<1x1x16x8xbf16> to vector<16x8xbf16>
    %cst_36 = arith.constant dense<0.000000e+00> : vector<4x8xf32>
    %41 = tpu.matmul %38, %40, %cst_36 {dimension_numbers = #tpu.dot_dimension_numbers<[1], [0], [0], [1], [0, 0, 1, 1], [], []>} : vector<4x16xbf16>, vector<16x8xbf16>, vector<4x8xf32> -> vector<4x8xf32>
    %42 = arith.addf %36, %41 : vector<4x8xf32>
    %c4 = arith.constant 4 : index
    %c0_37 = arith.constant 0 : index
    %43 = vector.load %arg10[%c4, %c0_37] : memref<16x16xf32, #tpu.memory_space<vmem>>, vector<4x16xf32>
    %44 = arith.truncf %43 : vector<4x16xf32> to vector<4x16xbf16>
    %c0_38 = arith.constant 0 : index
    %c6 = arith.constant 6 : index
    %c0_39 = arith.constant 0 : index
    %c0_40 = arith.constant 0 : index
    %45 = vector.load %arg8[%c0_38, %c6, %c0_39, %c0_40] : memref<1x9x16x8xbf16, #tpu.memory_space<vmem>>, vector<1x1x16x8xbf16>
    %46 = vector.shape_cast %45 : vector<1x1x16x8xbf16> to vector<16x8xbf16>
    %cst_41 = arith.constant dense<0.000000e+00> : vector<4x8xf32>
    %47 = tpu.matmul %44, %46, %cst_41 {dimension_numbers = #tpu.dot_dimension_numbers<[1], [0], [0], [1], [0, 0, 1, 1], [], []>} : vector<4x16xbf16>, vector<16x8xbf16>, vector<4x8xf32> -> vector<4x8xf32>
    %48 = arith.addf %42, %47 : vector<4x8xf32>
    %cst_42 = arith.constant 0.000000e+00 : f32
    %49 = vector.broadcast %cst_42 : f32 to vector<4x8xf32>
    %c1 = arith.constant 1 : index
    %c0_43 = arith.constant 0 : index
    %50 = vector.load %arg10[%c1, %c0_43] : memref<16x16xf32, #tpu.memory_space<vmem>>, vector<4x16xf32>
    %51 = arith.truncf %50 : vector<4x16xf32> to vector<4x16xbf16>
    %c0_44 = arith.constant 0 : index
    %c1_45 = arith.constant 1 : index
    %c0_46 = arith.constant 0 : index
    %c0_47 = arith.constant 0 : index
    %52 = vector.load %arg8[%c0_44, %c1_45, %c0_46, %c0_47] : memref<1x9x16x8xbf16, #tpu.memory_space<vmem>>, vector<1x1x16x8xbf16>
    %53 = vector.shape_cast %52 : vector<1x1x16x8xbf16> to vector<16x8xbf16>
    %cst_48 = arith.constant dense<0.000000e+00> : vector<4x8xf32>
    %54 = tpu.matmul %51, %53, %cst_48 {dimension_numbers = #tpu.dot_dimension_numbers<[1], [0], [0], [1], [0, 0, 1, 1], [], []>} : vector<4x16xbf16>, vector<16x8xbf16>, vector<4x8xf32> -> vector<4x8xf32>
    %55 = arith.addf %49, %54 : vector<4x8xf32>
    %c3_49 = arith.constant 3 : index
    %c0_50 = arith.constant 0 : index
    %56 = vector.load %arg10[%c3_49, %c0_50] : memref<16x16xf32, #tpu.memory_space<vmem>>, vector<4x16xf32>
    %57 = arith.truncf %56 : vector<4x16xf32> to vector<4x16xbf16>
    %c0_51 = arith.constant 0 : index
    %c4_52 = arith.constant 4 : index
    %c0_53 = arith.constant 0 : index
    %c0_54 = arith.constant 0 : index
    %58 = vector.load %arg8[%c0_51, %c4_52, %c0_53, %c0_54] : memref<1x9x16x8xbf16, #tpu.memory_space<vmem>>, vector<1x1x16x8xbf16>
    %59 = vector.shape_cast %58 : vector<1x1x16x8xbf16> to vector<16x8xbf16>
    %cst_55 = arith.constant dense<0.000000e+00> : vector<4x8xf32>
    %60 = tpu.matmul %57, %59, %cst_55 {dimension_numbers = #tpu.dot_dimension_numbers<[1], [0], [0], [1], [0, 0, 1, 1], [], []>} : vector<4x16xbf16>, vector<16x8xbf16>, vector<4x8xf32> -> vector<4x8xf32>
    %61 = arith.addf %55, %60 : vector<4x8xf32>
    %c5 = arith.constant 5 : index
    %c0_56 = arith.constant 0 : index
    %62 = vector.load %arg10[%c5, %c0_56] : memref<16x16xf32, #tpu.memory_space<vmem>>, vector<4x16xf32>
    %63 = arith.truncf %62 : vector<4x16xf32> to vector<4x16xbf16>
    %c0_57 = arith.constant 0 : index
    %c7 = arith.constant 7 : index
    %c0_58 = arith.constant 0 : index
    %c0_59 = arith.constant 0 : index
    %64 = vector.load %arg8[%c0_57, %c7, %c0_58, %c0_59] : memref<1x9x16x8xbf16, #tpu.memory_space<vmem>>, vector<1x1x16x8xbf16>
    %65 = vector.shape_cast %64 : vector<1x1x16x8xbf16> to vector<16x8xbf16>
    %cst_60 = arith.constant dense<0.000000e+00> : vector<4x8xf32>
    %66 = tpu.matmul %63, %65, %cst_60 {dimension_numbers = #tpu.dot_dimension_numbers<[1], [0], [0], [1], [0, 0, 1, 1], [], []>} : vector<4x16xbf16>, vector<16x8xbf16>, vector<4x8xf32> -> vector<4x8xf32>
    %67 = arith.addf %61, %66 : vector<4x8xf32>
    %cst_61 = arith.constant 0.000000e+00 : f32
    %68 = vector.broadcast %cst_61 : f32 to vector<4x8xf32>
    %c2_62 = arith.constant 2 : index
    %c0_63 = arith.constant 0 : index
    %69 = vector.load %arg10[%c2_62, %c0_63] : memref<16x16xf32, #tpu.memory_space<vmem>>, vector<4x16xf32>
    %70 = arith.truncf %69 : vector<4x16xf32> to vector<4x16xbf16>
    %c0_64 = arith.constant 0 : index
    %c2_65 = arith.constant 2 : index
    %c0_66 = arith.constant 0 : index
    %c0_67 = arith.constant 0 : index
    %71 = vector.load %arg8[%c0_64, %c2_65, %c0_66, %c0_67] : memref<1x9x16x8xbf16, #tpu.memory_space<vmem>>, vector<1x1x16x8xbf16>
    %72 = vector.shape_cast %71 : vector<1x1x16x8xbf16> to vector<16x8xbf16>
    %cst_68 = arith.constant dense<0.000000e+00> : vector<4x8xf32>
    %73 = tpu.matmul %70, %72, %cst_68 {dimension_numbers = #tpu.dot_dimension_numbers<[1], [0], [0], [1], [0, 0, 1, 1], [], []>} : vector<4x16xbf16>, vector<16x8xbf16>, vector<4x8xf32> -> vector<4x8xf32>
    %74 = arith.addf %68, %73 : vector<4x8xf32>
    %c4_69 = arith.constant 4 : index
    %c0_70 = arith.constant 0 : index
    %75 = vector.load %arg10[%c4_69, %c0_70] : memref<16x16xf32, #tpu.memory_space<vmem>>, vector<4x16xf32>
    %76 = arith.truncf %75 : vector<4x16xf32> to vector<4x16xbf16>
    %c0_71 = arith.constant 0 : index
    %c5_72 = arith.constant 5 : index
    %c0_73 = arith.constant 0 : index
    %c0_74 = arith.constant 0 : index
    %77 = vector.load %arg8[%c0_71, %c5_72, %c0_73, %c0_74] : memref<1x9x16x8xbf16, #tpu.memory_space<vmem>>, vector<1x1x16x8xbf16>
    %78 = vector.shape_cast %77 : vector<1x1x16x8xbf16> to vector<16x8xbf16>
    %cst_75 = arith.constant dense<0.000000e+00> : vector<4x8xf32>
    %79 = tpu.matmul %76, %78, %cst_75 {dimension_numbers = #tpu.dot_dimension_numbers<[1], [0], [0], [1], [0, 0, 1, 1], [], []>} : vector<4x16xbf16>, vector<16x8xbf16>, vector<4x8xf32> -> vector<4x8xf32>
    %80 = arith.addf %74, %79 : vector<4x8xf32>
    %c6_76 = arith.constant 6 : index
    %c0_77 = arith.constant 0 : index
    %81 = vector.load %arg10[%c6_76, %c0_77] : memref<16x16xf32, #tpu.memory_space<vmem>>, vector<4x16xf32>
    %82 = arith.truncf %81 : vector<4x16xf32> to vector<4x16xbf16>
    %c0_78 = arith.constant 0 : index
    %c8 = arith.constant 8 : index
    %c0_79 = arith.constant 0 : index
    %c0_80 = arith.constant 0 : index
    %83 = vector.load %arg8[%c0_78, %c8, %c0_79, %c0_80] : memref<1x9x16x8xbf16, #tpu.memory_space<vmem>>, vector<1x1x16x8xbf16>
    %84 = vector.shape_cast %83 : vector<1x1x16x8xbf16> to vector<16x8xbf16>
    %cst_81 = arith.constant dense<0.000000e+00> : vector<4x8xf32>
    %85 = tpu.matmul %82, %84, %cst_81 {dimension_numbers = #tpu.dot_dimension_numbers<[1], [0], [0], [1], [0, 0, 1, 1], [], []>} : vector<4x16xbf16>, vector<16x8xbf16>, vector<4x8xf32> -> vector<4x8xf32>
    %86 = arith.addf %80, %85 : vector<4x8xf32>
    %87 = tpu.iota {dimensions = array<i32: 0>} : vector<4x1xi32>
    %c2_i32 = arith.constant 2 : i32
    %c0_i32 = arith.constant 0 : i32
    %88 = arith.cmpi eq, %c2_i32, %c0_i32 : i32
    %c1_i32 = arith.constant 1 : i32
    %89 = arith.select %88, %c1_i32, %c2_i32 : i32
    %90 = vector.broadcast %89 : i32 to vector<4x1xi32>
    %91 = arith.remsi %87, %90 : vector<4x1xi32>
    %c0_i32_82 = arith.constant 0 : i32
    %92 = vector.broadcast %c0_i32_82 : i32 to vector<4x1xi32>
    %93 = arith.cmpi ne, %91, %92 : vector<4x1xi32>
    %c0_i32_83 = arith.constant 0 : i32
    %94 = vector.broadcast %c0_i32_83 : i32 to vector<4x1xi32>
    %95 = arith.cmpi slt, %91, %94 : vector<4x1xi32>
    %c0_i32_84 = arith.constant 0 : i32
    %96 = arith.cmpi slt, %89, %c0_i32_84 : i32
    %97 = vector.broadcast %96 : i1 to vector<4x1xi1>
    %98 = vector.broadcast %97 : vector<4x1xi1> to vector<4x1xi1>
    %99 = arith.xori %95, %98 : vector<4x1xi1>
    %100 = arith.andi %99, %93 : vector<4x1xi1>
    %101 = vector.broadcast %89 : i32 to vector<4x1xi32>
    %102 = arith.addi %91, %101 : vector<4x1xi32>
    %103 = arith.select %100, %102, %91 : vector<4x1xi1>, vector<4x1xi32>
    %c0_i32_85 = arith.constant 0 : i32
    %104 = vector.broadcast %c0_i32_85 : i32 to vector<4x1xi32>
    %105 = arith.cmpi ne, %103, %104 : vector<4x1xi32>
    %cst_86 = arith.constant 0.000000e+00 : f32
    %106 = vector.shape_cast %105 : vector<4x1xi1> to vector<4x1xi1>
    %107 = vector.broadcast %106 : vector<4x1xi1> to vector<4x8xi1>
    %108 = vector.broadcast %cst_86 : f32 to vector<4x8xf32>
    %109 = arith.select %107, %48, %108 : vector<4x8xi1>, vector<4x8xf32>
    %110 = arith.addf %109, %67 : vector<4x8xf32>
    %c1_i32_87 = arith.constant 1 : i32
    %111 = vector.broadcast %c1_i32_87 : i32 to vector<4x1xi32>
    %112 = arith.cmpi ne, %103, %111 : vector<4x1xi32>
    %cst_88 = arith.constant 0.000000e+00 : f32
    %113 = vector.shape_cast %112 : vector<4x1xi1> to vector<4x1xi1>
    %114 = vector.broadcast %113 : vector<4x1xi1> to vector<4x8xi1>
    %115 = vector.broadcast %cst_88 : f32 to vector<4x8xf32>
    %116 = arith.select %114, %86, %115 : vector<4x8xi1>, vector<4x8xf32>
    %117 = arith.addf %110, %116 : vector<4x8xf32>
    %c0_89 = arith.constant 0 : index
    %c0_90 = arith.constant 0 : index
    %c0_91 = arith.constant 0 : index
    %118 = vector.load %arg9[%c0_89, %c0_90, %c0_91] : memref<1x4x32xbf16, #tpu.memory_space<vmem>>, vector<1x4x32xbf16>
    %119 = vector.shape_cast %118 : vector<1x4x32xbf16> to vector<4x32xbf16>
    %120 = vector.shape_cast %1 : vector<4x32xbf16> to vector<1x4x32xbf16>
    tpu.vector_store %arg9[%c0_89, %c0_90, %c0_91], %120 {strides = array<i32>} : memref<1x4x32xbf16, #tpu.memory_space<vmem>>, vector<1x4x32xbf16>,
    %121 = arith.truncf %117 : vector<4x8xf32> to vector<4x8xbf16>
    %c0_92 = arith.constant 0 : index
    %c0_93 = arith.constant 0 : index
    %c16 = arith.constant 16 : index
    %122 = vector.load %arg9[%c0_92, %c0_93, %c16] : memref<1x4x32xbf16, #tpu.memory_space<vmem>>, vector<1x4x8xbf16>
    %123 = vector.shape_cast %122 : vector<1x4x8xbf16> to vector<4x8xbf16>
    %124 = vector.shape_cast %121 : vector<4x8xbf16> to vector<1x4x8xbf16>
    tpu.vector_store %arg9[%c0_92, %c0_93, %c16], %124 {strides = array<i32>} : memref<1x4x32xbf16, #tpu.memory_space<vmem>>, vector<1x4x8xbf16>,
    return
  }
  func.func @transform_0(%arg0: i32, %arg1: memref<2xi32, #tpu.memory_space<smem>>) -> (i32, i32, i32) {
    %c0_i32 = arith.constant 0 : i32
    %c0_i32_0 = arith.constant 0 : i32
    %c0_i32_1 = arith.constant 0 : i32
    return %arg0, %c0_i32, %c0_i32_0 : i32, i32, i32
  }
  func.func @transform_1(%arg0: i32, %arg1: memref<2xi32, #tpu.memory_space<smem>>) -> (i32, i32, i32) {
    %0 = arith.index_cast %arg0 : i32 to index
    %1 = memref.load %arg1[%0] : memref<2xi32, #tpu.memory_space<smem>>
    %c0_i32 = arith.constant 0 : i32
    %c0_i32_0 = arith.constant 0 : i32
    %c0_i32_1 = arith.constant 0 : i32
    return %1, %c0_i32, %c0_i32_0 : i32, i32, i32
  }
  func.func @transform_2(%arg0: i32, %arg1: memref<2xi32, #tpu.memory_space<smem>>) -> (i32, i32, i32) {
    %0 = arith.index_cast %arg0 : i32 to index
    %1 = memref.load %arg1[%0] : memref<2xi32, #tpu.memory_space<smem>>
    %c0_i32 = arith.constant 0 : i32
    %c0_i32_0 = arith.constant 0 : i32
    %c0_i32_1 = arith.constant 0 : i32
    return %1, %c0_i32, %c0_i32_0 : i32, i32, i32
  }
  func.func @transform_3(%arg0: i32, %arg1: memref<2xi32, #tpu.memory_space<smem>>) -> (i32, i32, i32) {
    %0 = arith.index_cast %arg0 : i32 to index
    %1 = memref.load %arg1[%0] : memref<2xi32, #tpu.memory_space<smem>>
    %c0_i32 = arith.constant 0 : i32
    %c0_i32_0 = arith.constant 0 : i32
    %c0_i32_1 = arith.constant 0 : i32
    return %1, %c0_i32, %c0_i32_0 : i32, i32, i32
  }
  func.func @transform_4(%arg0: i32, %arg1: memref<2xi32, #tpu.memory_space<smem>>) -> (i32, i32, i32) {
    %0 = arith.index_cast %arg0 : i32 to index
    %1 = memref.load %arg1[%0] : memref<2xi32, #tpu.memory_space<smem>>
    %c0_i32 = arith.constant 0 : i32
    %c0_i32_0 = arith.constant 0 : i32
    %c0_i32_1 = arith.constant 0 : i32
    return %1, %c0_i32, %c0_i32_0 : i32, i32, i32
  }
  func.func @transform_5(%arg0: i32, %arg1: memref<2xi32, #tpu.memory_space<smem>>) -> (i32, i32, i32) {
    %0 = arith.index_cast %arg0 : i32 to index
    %1 = memref.load %arg1[%0] : memref<2xi32, #tpu.memory_space<smem>>
    %c0_i32 = arith.constant 0 : i32
    %c0_i32_0 = arith.constant 0 : i32
    %c0_i32_1 = arith.constant 0 : i32
    return %1, %c0_i32, %c0_i32_0 : i32, i32, i32
  }
  func.func @transform_6(%arg0: i32, %arg1: memref<2xi32, #tpu.memory_space<smem>>) -> (i32, i32, i32, i32) {
    %0 = arith.index_cast %arg0 : i32 to index
    %1 = memref.load %arg1[%0] : memref<2xi32, #tpu.memory_space<smem>>
    %c0_i32 = arith.constant 0 : i32
    %c0_i32_0 = arith.constant 0 : i32
    %c0_i32_1 = arith.constant 0 : i32
    %c0_i32_2 = arith.constant 0 : i32
    return %1, %c0_i32, %c0_i32_0, %c0_i32_1 : i32, i32, i32, i32
  }
  func.func @transform_7(%arg0: i32, %arg1: memref<2xi32, #tpu.memory_space<smem>>) -> (i32, i32, i32) {
    %c0_i32 = arith.constant 0 : i32
    %c0_i32_0 = arith.constant 0 : i32
    %c0_i32_1 = arith.constant 0 : i32
    return %arg0, %c0_i32, %c0_i32_0 : i32, i32, i32
  }
}

module attributes {stable_mosaic.version = 11 : i64} {
  func.func @kernel(%arg0: i32, %arg1: memref<2xi32, #tpu.memory_space<smem>>, %arg2: memref<1x16x32xbf16, #tpu.memory_space<vmem>>, %arg3: memref<1x1x32xf32, #tpu.memory_space<vmem>>, %arg4: memref<1x1x32xf32, #tpu.memory_space<vmem>>, %arg5: memref<1x32x16xbf16, #tpu.memory_space<vmem>>, %arg6: memref<4x16xbf16, #tpu.memory_space<vmem>>, %arg7: memref<1x4x32xbf16, #tpu.memory_space<vmem>>) attributes {dimension_semantics = [#tpu.dimension_semantics<parallel>], iteration_bounds = array<i64: 2>, scalar_prefetch = 1 : i64, scratch_operands = 0 : i64, tpu.core_type = #tpu.core_type<tc>, window_params = [{transform_indices = @transform_0, window_bounds = array<i64: 1, 16, 32>}, {transform_indices = @transform_1, window_bounds = array<i64: 1, 1, 32>}, {transform_indices = @transform_2, window_bounds = array<i64: 1, 1, 32>}, {transform_indices = @transform_3, window_bounds = array<i64: 1, 32, 16>}, {pipeline_mode = #tpu.pipeline_mode<synchronous>, transform_indices = @transform_4, window_bounds = array<i64: 4, 16>}, {transform_indices = @transform_5, window_bounds = array<i64: 1, 4, 32>}]} {
    %c0 = arith.constant 0 : index
    %c0_0 = arith.constant 0 : index
    %c0_1 = arith.constant 0 : index
    %0 = vector.load %arg2[%c0, %c0_0, %c0_1] : memref<1x16x32xbf16, #tpu.memory_space<vmem>>, vector<1x16x32xbf16>
    %1 = vector.shape_cast %0 : vector<1x16x32xbf16> to vector<16x32xbf16>
    %2 = arith.extf %1 : vector<16x32xbf16> to vector<16x32xf32>
    %c0_2 = arith.constant 0 : index
    %c0_3 = arith.constant 0 : index
    %c0_4 = arith.constant 0 : index
    %3 = vector.load %arg3[%c0_2, %c0_3, %c0_4] : memref<1x1x32xf32, #tpu.memory_space<vmem>>, vector<1x1x32xf32>
    %4 = vector.shape_cast %3 : vector<1x1x32xf32> to vector<1x32xf32>
    %5 = vector.broadcast %4 : vector<1x32xf32> to vector<16x32xf32>
    %6 = arith.mulf %2, %5 : vector<16x32xf32>
    %c0_5 = arith.constant 0 : index
    %c0_6 = arith.constant 0 : index
    %c0_7 = arith.constant 0 : index
    %7 = vector.load %arg4[%c0_5, %c0_6, %c0_7] : memref<1x1x32xf32, #tpu.memory_space<vmem>>, vector<1x1x32xf32>
    %8 = vector.shape_cast %7 : vector<1x1x32xf32> to vector<1x32xf32>
    %9 = vector.broadcast %8 : vector<1x32xf32> to vector<16x32xf32>
    %10 = arith.addf %6, %9 : vector<16x32xf32>
    %cst = arith.constant 0.000000e+00 : f32
    %11 = vector.broadcast %cst : f32 to vector<16x32xf32>
    %12 = arith.maximumf %10, %11 : vector<16x32xf32>
    %13 = arith.truncf %12 : vector<16x32xf32> to vector<16x32xbf16>
    %c0_8 = arith.constant 0 : index
    %c0_9 = arith.constant 0 : index
    %14 = vector.load %arg6[%c0_8, %c0_9] : memref<4x16xbf16, #tpu.memory_space<vmem>>, vector<4x16xbf16>
    %cst_10 = arith.constant dense<0.000000e+00> : vector<4x32xf32>
    %15 = tpu.matmul %14, %13, %cst_10 {dimension_numbers = #tpu.dot_dimension_numbers<[1], [0], [0], [1], [0, 0, 1, 1], [], []>} : vector<4x16xbf16>, vector<16x32xbf16>, vector<4x32xf32> -> vector<4x32xf32>
    %16 = arith.truncf %15 : vector<4x32xf32> to vector<4x32xbf16>
    %c0_11 = arith.constant 0 : index
    %c0_12 = arith.constant 0 : index
    %c0_13 = arith.constant 0 : index
    %17 = vector.load %arg5[%c0_11, %c0_12, %c0_13] : memref<1x32x16xbf16, #tpu.memory_space<vmem>>, vector<1x32x16xbf16>
    %18 = vector.shape_cast %17 : vector<1x32x16xbf16> to vector<32x16xbf16>
    %cst_14 = arith.constant dense<0.000000e+00> : vector<4x16xf32>
    %19 = tpu.matmul %16, %18, %cst_14 {dimension_numbers = #tpu.dot_dimension_numbers<[1], [0], [0], [1], [0, 0, 1, 1], [], []>} : vector<4x32xbf16>, vector<32x16xbf16>, vector<4x16xf32> -> vector<4x16xf32>
    %cst_15 = arith.constant 0.000000e+00 : bf16
    %20 = vector.broadcast %cst_15 : bf16 to vector<4x32xbf16>
    %c0_16 = arith.constant 0 : index
    %c0_17 = arith.constant 0 : index
    %c0_18 = arith.constant 0 : index
    %21 = vector.load %arg7[%c0_16, %c0_17, %c0_18] : memref<1x4x32xbf16, #tpu.memory_space<vmem>>, vector<1x4x32xbf16>
    %22 = vector.shape_cast %21 : vector<1x4x32xbf16> to vector<4x32xbf16>
    %23 = vector.shape_cast %20 : vector<4x32xbf16> to vector<1x4x32xbf16>
    tpu.vector_store %arg7[%c0_16, %c0_17, %c0_18], %23 {strides = array<i32>} : memref<1x4x32xbf16, #tpu.memory_space<vmem>>, vector<1x4x32xbf16>,
    %24 = arith.truncf %19 : vector<4x16xf32> to vector<4x16xbf16>
    %c0_19 = arith.constant 0 : index
    %c0_20 = arith.constant 0 : index
    %c0_21 = arith.constant 0 : index
    %25 = vector.load %arg7[%c0_19, %c0_20, %c0_21] : memref<1x4x32xbf16, #tpu.memory_space<vmem>>, vector<1x4x16xbf16>
    %26 = vector.shape_cast %25 : vector<1x4x16xbf16> to vector<4x16xbf16>
    %27 = vector.shape_cast %24 : vector<4x16xbf16> to vector<1x4x16xbf16>
    tpu.vector_store %arg7[%c0_19, %c0_20, %c0_21], %27 {strides = array<i32>} : memref<1x4x32xbf16, #tpu.memory_space<vmem>>, vector<1x4x16xbf16>,
    return
  }
  func.func @transform_0(%arg0: i32, %arg1: memref<2xi32, #tpu.memory_space<smem>>) -> (i32, i32, i32) {
    %c0_i32 = arith.constant 0 : i32
    %c0_i32_0 = arith.constant 0 : i32
    %c0_i32_1 = arith.constant 0 : i32
    return %arg0, %c0_i32, %c0_i32_0 : i32, i32, i32
  }
  func.func @transform_1(%arg0: i32, %arg1: memref<2xi32, #tpu.memory_space<smem>>) -> (i32, i32, i32) {
    %0 = arith.index_cast %arg0 : i32 to index
    %1 = memref.load %arg1[%0] : memref<2xi32, #tpu.memory_space<smem>>
    %c0_i32 = arith.constant 0 : i32
    %c0_i32_0 = arith.constant 0 : i32
    %c0_i32_1 = arith.constant 0 : i32
    return %1, %c0_i32, %c0_i32_0 : i32, i32, i32
  }
  func.func @transform_2(%arg0: i32, %arg1: memref<2xi32, #tpu.memory_space<smem>>) -> (i32, i32, i32) {
    %0 = arith.index_cast %arg0 : i32 to index
    %1 = memref.load %arg1[%0] : memref<2xi32, #tpu.memory_space<smem>>
    %c0_i32 = arith.constant 0 : i32
    %c0_i32_0 = arith.constant 0 : i32
    %c0_i32_1 = arith.constant 0 : i32
    return %1, %c0_i32, %c0_i32_0 : i32, i32, i32
  }
  func.func @transform_3(%arg0: i32, %arg1: memref<2xi32, #tpu.memory_space<smem>>) -> (i32, i32, i32) {
    %0 = arith.index_cast %arg0 : i32 to index
    %1 = memref.load %arg1[%0] : memref<2xi32, #tpu.memory_space<smem>>
    %c0_i32 = arith.constant 0 : i32
    %c0_i32_0 = arith.constant 0 : i32
    %c0_i32_1 = arith.constant 0 : i32
    return %1, %c0_i32, %c0_i32_0 : i32, i32, i32
  }
  func.func @transform_4(%arg0: i32, %arg1: memref<2xi32, #tpu.memory_space<smem>>) -> (i32, i32) {
    %c0_i32 = arith.constant 0 : i32
    %c0_i32_0 = arith.constant 0 : i32
    %c0_i32_1 = arith.constant 0 : i32
    return %c0_i32, %c0_i32_0 : i32, i32
  }
  func.func @transform_5(%arg0: i32, %arg1: memref<2xi32, #tpu.memory_space<smem>>) -> (i32, i32, i32) {
    %c0_i32 = arith.constant 0 : i32
    %c0_i32_0 = arith.constant 0 : i32
    %c0_i32_1 = arith.constant 0 : i32
    return %arg0, %c0_i32, %c0_i32_0 : i32, i32, i32
  }
}

module attributes {stable_mosaic.version = 11 : i64} {
  func.func @_head_pool_kernel(%arg0: i32, %arg1: memref<1x4x32xbf16, #tpu.memory_space<vmem>>, %arg2: memref<1x1x32xf32, #tpu.memory_space<vmem>>, %arg3: memref<1x1x32xf32, #tpu.memory_space<vmem>>, %arg4: memref<1x1x32xf32, #tpu.memory_space<vmem>>) attributes {dimension_semantics = [#tpu.dimension_semantics<parallel>], iteration_bounds = array<i64: 2>, scalar_prefetch = 0 : i64, scratch_operands = 0 : i64, tpu.core_type = #tpu.core_type<tc>, window_params = [{transform_indices = @transform_0, window_bounds = array<i64: 1, 4, 32>}, {pipeline_mode = #tpu.pipeline_mode<synchronous>, transform_indices = @transform_1, window_bounds = array<i64: 1, 1, 32>}, {pipeline_mode = #tpu.pipeline_mode<synchronous>, transform_indices = @transform_2, window_bounds = array<i64: 1, 1, 32>}, {transform_indices = @transform_3, window_bounds = array<i64: 1, 1, 32>}]} {
    %c0 = arith.constant 0 : index
    %c0_0 = arith.constant 0 : index
    %c0_1 = arith.constant 0 : index
    %0 = vector.load %arg1[%c0, %c0_0, %c0_1] : memref<1x4x32xbf16, #tpu.memory_space<vmem>>, vector<1x4x32xbf16>
    %1 = vector.shape_cast %0 : vector<1x4x32xbf16> to vector<4x32xbf16>
    %2 = arith.extf %1 : vector<4x32xbf16> to vector<4x32xf32>
    %c0_2 = arith.constant 0 : index
    %c0_3 = arith.constant 0 : index
    %c0_4 = arith.constant 0 : index
    %3 = vector.load %arg2[%c0_2, %c0_3, %c0_4] : memref<1x1x32xf32, #tpu.memory_space<vmem>>, vector<1x1x32xf32>
    %4 = vector.shape_cast %3 : vector<1x1x32xf32> to vector<1x32xf32>
    %5 = vector.broadcast %4 : vector<1x32xf32> to vector<4x32xf32>
    %6 = arith.mulf %2, %5 : vector<4x32xf32>
    %c0_5 = arith.constant 0 : index
    %c0_6 = arith.constant 0 : index
    %c0_7 = arith.constant 0 : index
    %7 = vector.load %arg3[%c0_5, %c0_6, %c0_7] : memref<1x1x32xf32, #tpu.memory_space<vmem>>, vector<1x1x32xf32>
    %8 = vector.shape_cast %7 : vector<1x1x32xf32> to vector<1x32xf32>
    %9 = vector.broadcast %8 : vector<1x32xf32> to vector<4x32xf32>
    %10 = arith.addf %6, %9 : vector<4x32xf32>
    %cst = arith.constant 0.000000e+00 : f32
    %11 = vector.broadcast %cst : f32 to vector<4x32xf32>
    %12 = arith.maximumf %10, %11 : vector<4x32xf32>
    %cst_8 = arith.constant dense<0.000000e+00> : vector<32xf32>
    %13 = vector.multi_reduction <add>, %12, %cst_8 [0] : vector<4x32xf32> to vector<32xf32>
    %14 = vector.shape_cast %13 : vector<32xf32> to vector<1x32xf32>
    %cst_9 = arith.constant 4.000000e+00 : f32
    %15 = vector.broadcast %cst_9 : f32 to vector<1x32xf32>
    %16 = arith.divf %14, %15 : vector<1x32xf32>
    %c0_10 = arith.constant 0 : index
    %c0_11 = arith.constant 0 : index
    %c0_12 = arith.constant 0 : index
    %17 = vector.load %arg4[%c0_10, %c0_11, %c0_12] : memref<1x1x32xf32, #tpu.memory_space<vmem>>, vector<1x1x32xf32>
    %18 = vector.shape_cast %17 : vector<1x1x32xf32> to vector<1x32xf32>
    %19 = vector.shape_cast %16 : vector<1x32xf32> to vector<1x1x32xf32>
    tpu.vector_store %arg4[%c0_10, %c0_11, %c0_12], %19 {strides = array<i32>} : memref<1x1x32xf32, #tpu.memory_space<vmem>>, vector<1x1x32xf32>,
    return
  }
  func.func @transform_0(%arg0: i32) -> (i32, i32, i32) {
    %c0_i32 = arith.constant 0 : i32
    %c0_i32_0 = arith.constant 0 : i32
    %c0_i32_1 = arith.constant 0 : i32
    return %arg0, %c0_i32, %c0_i32_0 : i32, i32, i32
  }
  func.func @transform_1(%arg0: i32) -> (i32, i32, i32) {
    %c0_i32 = arith.constant 0 : i32
    %c0_i32_0 = arith.constant 0 : i32
    %c0_i32_1 = arith.constant 0 : i32
    %c0_i32_2 = arith.constant 0 : i32
    return %c0_i32, %c0_i32_0, %c0_i32_1 : i32, i32, i32
  }
  func.func @transform_2(%arg0: i32) -> (i32, i32, i32) {
    %c0_i32 = arith.constant 0 : i32
    %c0_i32_0 = arith.constant 0 : i32
    %c0_i32_1 = arith.constant 0 : i32
    %c0_i32_2 = arith.constant 0 : i32
    return %c0_i32, %c0_i32_0, %c0_i32_1 : i32, i32, i32
  }
  func.func @transform_3(%arg0: i32) -> (i32, i32, i32) {
    %c0_i32 = arith.constant 0 : i32
    %c0_i32_0 = arith.constant 0 : i32
    %c0_i32_1 = arith.constant 0 : i32
    return %arg0, %c0_i32, %c0_i32_0 : i32, i32, i32
  }
}

module attributes {stable_mosaic.version = 11 : i64} {
  func.func @kernel(%arg0: i32, %arg1: memref<2xi32, #tpu.memory_space<smem>>, %arg2: memref<1x4x32xbf16, #tpu.memory_space<vmem>>, %arg3: memref<1x1x32xf32, #tpu.memory_space<vmem>>, %arg4: memref<1x1x32xf32, #tpu.memory_space<vmem>>, %arg5: memref<1x32x16xbf16, #tpu.memory_space<vmem>>, %arg6: memref<1x1x16xf32, #tpu.memory_space<vmem>>, %arg7: memref<1x1x16xf32, #tpu.memory_space<vmem>>, %arg8: memref<1x9x16x8xbf16, #tpu.memory_space<vmem>>, %arg9: memref<1x4x32xbf16, #tpu.memory_space<vmem>>, %arg10: memref<16x16xf32, #tpu.memory_space<vmem>>) attributes {dimension_semantics = [#tpu.dimension_semantics<parallel>], iteration_bounds = array<i64: 2>, scalar_prefetch = 1 : i64, scratch_operands = 1 : i64, tpu.core_type = #tpu.core_type<tc>, window_params = [{transform_indices = @transform_0, window_bounds = array<i64: 1, 4, 32>}, {transform_indices = @transform_1, window_bounds = array<i64: 1, 1, 32>}, {transform_indices = @transform_2, window_bounds = array<i64: 1, 1, 32>}, {transform_indices = @transform_3, window_bounds = array<i64: 1, 32, 16>}, {transform_indices = @transform_4, window_bounds = array<i64: 1, 1, 16>}, {transform_indices = @transform_5, window_bounds = array<i64: 1, 1, 16>}, {transform_indices = @transform_6, window_bounds = array<i64: 1, 9, 16, 8>}, {transform_indices = @transform_7, window_bounds = array<i64: 1, 4, 32>}]} {
    %c0 = arith.constant 0 : index
    %c0_0 = arith.constant 0 : index
    %c0_1 = arith.constant 0 : index
    %0 = vector.load %arg2[%c0, %c0_0, %c0_1] : memref<1x4x32xbf16, #tpu.memory_space<vmem>>, vector<1x4x32xbf16>
    %1 = vector.shape_cast %0 : vector<1x4x32xbf16> to vector<4x32xbf16>
    %2 = arith.extf %1 : vector<4x32xbf16> to vector<4x32xf32>
    %c0_2 = arith.constant 0 : index
    %c0_3 = arith.constant 0 : index
    %c0_4 = arith.constant 0 : index
    %3 = vector.load %arg3[%c0_2, %c0_3, %c0_4] : memref<1x1x32xf32, #tpu.memory_space<vmem>>, vector<1x1x32xf32>
    %4 = vector.shape_cast %3 : vector<1x1x32xf32> to vector<1x32xf32>
    %5 = vector.broadcast %4 : vector<1x32xf32> to vector<4x32xf32>
    %6 = arith.mulf %2, %5 : vector<4x32xf32>
    %c0_5 = arith.constant 0 : index
    %c0_6 = arith.constant 0 : index
    %c0_7 = arith.constant 0 : index
    %7 = vector.load %arg4[%c0_5, %c0_6, %c0_7] : memref<1x1x32xf32, #tpu.memory_space<vmem>>, vector<1x1x32xf32>
    %8 = vector.shape_cast %7 : vector<1x1x32xf32> to vector<1x32xf32>
    %9 = vector.broadcast %8 : vector<1x32xf32> to vector<4x32xf32>
    %10 = arith.addf %6, %9 : vector<4x32xf32>
    %cst = arith.constant 0.000000e+00 : f32
    %11 = vector.broadcast %cst : f32 to vector<4x32xf32>
    %12 = arith.maximumf %10, %11 : vector<4x32xf32>
    %13 = arith.truncf %12 : vector<4x32xf32> to vector<4x32xbf16>
    %c0_8 = arith.constant 0 : index
    %c0_9 = arith.constant 0 : index
    %c0_10 = arith.constant 0 : index
    %14 = vector.load %arg5[%c0_8, %c0_9, %c0_10] : memref<1x32x16xbf16, #tpu.memory_space<vmem>>, vector<1x32x16xbf16>
    %15 = vector.shape_cast %14 : vector<1x32x16xbf16> to vector<32x16xbf16>
    %cst_11 = arith.constant dense<0.000000e+00> : vector<4x16xf32>
    %16 = tpu.matmul %13, %15, %cst_11 {dimension_numbers = #tpu.dot_dimension_numbers<[1], [0], [0], [1], [0, 0, 1, 1], [], []>} : vector<4x32xbf16>, vector<32x16xbf16>, vector<4x16xf32> -> vector<4x16xf32>
    %c0_12 = arith.constant 0 : index
    %c0_13 = arith.constant 0 : index
    %c0_14 = arith.constant 0 : index
    %17 = vector.load %arg6[%c0_12, %c0_13, %c0_14] : memref<1x1x16xf32, #tpu.memory_space<vmem>>, vector<1x1x16xf32>
    %18 = vector.shape_cast %17 : vector<1x1x16xf32> to vector<1x16xf32>
    %19 = vector.broadcast %18 : vector<1x16xf32> to vector<4x16xf32>
    %20 = arith.mulf %16, %19 : vector<4x16xf32>
    %c0_15 = arith.constant 0 : index
    %c0_16 = arith.constant 0 : index
    %c0_17 = arith.constant 0 : index
    %21 = vector.load %arg7[%c0_15, %c0_16, %c0_17] : memref<1x1x16xf32, #tpu.memory_space<vmem>>, vector<1x1x16xf32>
    %22 = vector.shape_cast %21 : vector<1x1x16xf32> to vector<1x16xf32>
    %23 = vector.broadcast %22 : vector<1x16xf32> to vector<4x16xf32>
    %24 = arith.addf %20, %23 : vector<4x16xf32>
    %cst_18 = arith.constant 0.000000e+00 : f32
    %25 = vector.broadcast %cst_18 : f32 to vector<4x16xf32>
    %26 = arith.maximumf %24, %25 : vector<4x16xf32>
    %cst_19 = arith.constant 0.000000e+00 : f32
    %27 = vector.broadcast %cst_19 : f32 to vector<16x16xf32>
    %c0_20 = arith.constant 0 : index
    %c0_21 = arith.constant 0 : index
    %28 = vector.load %arg10[%c0_20, %c0_21] : memref<16x16xf32, #tpu.memory_space<vmem>>, vector<16x16xf32>
    tpu.vector_store %arg10[%c0_20, %c0_21], %27 {strides = array<i32>} : memref<16x16xf32, #tpu.memory_space<vmem>>, vector<16x16xf32>,
    %c3 = arith.constant 3 : index
    %c0_22 = arith.constant 0 : index
    %29 = vector.load %arg10[%c3, %c0_22] : memref<16x16xf32, #tpu.memory_space<vmem>>, vector<4x16xf32>
    tpu.vector_store %arg10[%c3, %c0_22], %26 {strides = array<i32>} : memref<16x16xf32, #tpu.memory_space<vmem>>, vector<4x16xf32>,
    %cst_23 = arith.constant 0.000000e+00 : f32
    %30 = vector.broadcast %cst_23 : f32 to vector<4x8xf32>
    %c0_24 = arith.constant 0 : index
    %c0_25 = arith.constant 0 : index
    %31 = vector.load %arg10[%c0_24, %c0_25] : memref<16x16xf32, #tpu.memory_space<vmem>>, vector<4x16xf32>
    %32 = arith.truncf %31 : vector<4x16xf32> to vector<4x16xbf16>
    %c0_26 = arith.constant 0 : index
    %c0_27 = arith.constant 0 : index
    %c0_28 = arith.constant 0 : index
    %c0_29 = arith.constant 0 : index
    %33 = vector.load %arg8[%c0_26, %c0_27, %c0_28, %c0_29] : memref<1x9x16x8xbf16, #tpu.memory_space<vmem>>, vector<1x1x16x8xbf16>
    %34 = vector.shape_cast %33 : vector<1x1x16x8xbf16> to vector<16x8xbf16>
    %cst_30 = arith.constant dense<0.000000e+00> : vector<4x8xf32>
    %35 = tpu.matmul %32, %34, %cst_30 {dimension_numbers = #tpu.dot_dimension_numbers<[1], [0], [0], [1], [0, 0, 1, 1], [], []>} : vector<4x16xbf16>, vector<16x8xbf16>, vector<4x8xf32> -> vector<4x8xf32>
    %36 = arith.addf %30, %35 : vector<4x8xf32>
    %c2 = arith.constant 2 : index
    %c0_31 = arith.constant 0 : index
    %37 = vector.load %arg10[%c2, %c0_31] : memref<16x16xf32, #tpu.memory_space<vmem>>, vector<4x16xf32>
    %38 = arith.truncf %37 : vector<4x16xf32> to vector<4x16xbf16>
    %c0_32 = arith.constant 0 : index
    %c3_33 = arith.constant 3 : index
    %c0_34 = arith.constant 0 : index
    %c0_35 = arith.constant 0 : index
    %39 = vector.load %arg8[%c0_32, %c3_33, %c0_34, %c0_35] : memref<1x9x16x8xbf16, #tpu.memory_space<vmem>>, vector<1x1x16x8xbf16>
    %40 = vector.shape_cast %39 : vector<1x1x16x8xbf16> to vector<16x8xbf16>
    %cst_36 = arith.constant dense<0.000000e+00> : vector<4x8xf32>
    %41 = tpu.matmul %38, %40, %cst_36 {dimension_numbers = #tpu.dot_dimension_numbers<[1], [0], [0], [1], [0, 0, 1, 1], [], []>} : vector<4x16xbf16>, vector<16x8xbf16>, vector<4x8xf32> -> vector<4x8xf32>
    %42 = arith.addf %36, %41 : vector<4x8xf32>
    %c4 = arith.constant 4 : index
    %c0_37 = arith.constant 0 : index
    %43 = vector.load %arg10[%c4, %c0_37] : memref<16x16xf32, #tpu.memory_space<vmem>>, vector<4x16xf32>
    %44 = arith.truncf %43 : vector<4x16xf32> to vector<4x16xbf16>
    %c0_38 = arith.constant 0 : index
    %c6 = arith.constant 6 : index
    %c0_39 = arith.constant 0 : index
    %c0_40 = arith.constant 0 : index
    %45 = vector.load %arg8[%c0_38, %c6, %c0_39, %c0_40] : memref<1x9x16x8xbf16, #tpu.memory_space<vmem>>, vector<1x1x16x8xbf16>
    %46 = vector.shape_cast %45 : vector<1x1x16x8xbf16> to vector<16x8xbf16>
    %cst_41 = arith.constant dense<0.000000e+00> : vector<4x8xf32>
    %47 = tpu.matmul %44, %46, %cst_41 {dimension_numbers = #tpu.dot_dimension_numbers<[1], [0], [0], [1], [0, 0, 1, 1], [], []>} : vector<4x16xbf16>, vector<16x8xbf16>, vector<4x8xf32> -> vector<4x8xf32>
    %48 = arith.addf %42, %47 : vector<4x8xf32>
    %cst_42 = arith.constant 0.000000e+00 : f32
    %49 = vector.broadcast %cst_42 : f32 to vector<4x8xf32>
    %c1 = arith.constant 1 : index
    %c0_43 = arith.constant 0 : index
    %50 = vector.load %arg10[%c1, %c0_43] : memref<16x16xf32, #tpu.memory_space<vmem>>, vector<4x16xf32>
    %51 = arith.truncf %50 : vector<4x16xf32> to vector<4x16xbf16>
    %c0_44 = arith.constant 0 : index
    %c1_45 = arith.constant 1 : index
    %c0_46 = arith.constant 0 : index
    %c0_47 = arith.constant 0 : index
    %52 = vector.load %arg8[%c0_44, %c1_45, %c0_46, %c0_47] : memref<1x9x16x8xbf16, #tpu.memory_space<vmem>>, vector<1x1x16x8xbf16>
    %53 = vector.shape_cast %52 : vector<1x1x16x8xbf16> to vector<16x8xbf16>
    %cst_48 = arith.constant dense<0.000000e+00> : vector<4x8xf32>
    %54 = tpu.matmul %51, %53, %cst_48 {dimension_numbers = #tpu.dot_dimension_numbers<[1], [0], [0], [1], [0, 0, 1, 1], [], []>} : vector<4x16xbf16>, vector<16x8xbf16>, vector<4x8xf32> -> vector<4x8xf32>
    %55 = arith.addf %49, %54 : vector<4x8xf32>
    %c3_49 = arith.constant 3 : index
    %c0_50 = arith.constant 0 : index
    %56 = vector.load %arg10[%c3_49, %c0_50] : memref<16x16xf32, #tpu.memory_space<vmem>>, vector<4x16xf32>
    %57 = arith.truncf %56 : vector<4x16xf32> to vector<4x16xbf16>
    %c0_51 = arith.constant 0 : index
    %c4_52 = arith.constant 4 : index
    %c0_53 = arith.constant 0 : index
    %c0_54 = arith.constant 0 : index
    %58 = vector.load %arg8[%c0_51, %c4_52, %c0_53, %c0_54] : memref<1x9x16x8xbf16, #tpu.memory_space<vmem>>, vector<1x1x16x8xbf16>
    %59 = vector.shape_cast %58 : vector<1x1x16x8xbf16> to vector<16x8xbf16>
    %cst_55 = arith.constant dense<0.000000e+00> : vector<4x8xf32>
    %60 = tpu.matmul %57, %59, %cst_55 {dimension_numbers = #tpu.dot_dimension_numbers<[1], [0], [0], [1], [0, 0, 1, 1], [], []>} : vector<4x16xbf16>, vector<16x8xbf16>, vector<4x8xf32> -> vector<4x8xf32>
    %61 = arith.addf %55, %60 : vector<4x8xf32>
    %c5 = arith.constant 5 : index
    %c0_56 = arith.constant 0 : index
    %62 = vector.load %arg10[%c5, %c0_56] : memref<16x16xf32, #tpu.memory_space<vmem>>, vector<4x16xf32>
    %63 = arith.truncf %62 : vector<4x16xf32> to vector<4x16xbf16>
    %c0_57 = arith.constant 0 : index
    %c7 = arith.constant 7 : index
    %c0_58 = arith.constant 0 : index
    %c0_59 = arith.constant 0 : index
    %64 = vector.load %arg8[%c0_57, %c7, %c0_58, %c0_59] : memref<1x9x16x8xbf16, #tpu.memory_space<vmem>>, vector<1x1x16x8xbf16>
    %65 = vector.shape_cast %64 : vector<1x1x16x8xbf16> to vector<16x8xbf16>
    %cst_60 = arith.constant dense<0.000000e+00> : vector<4x8xf32>
    %66 = tpu.matmul %63, %65, %cst_60 {dimension_numbers = #tpu.dot_dimension_numbers<[1], [0], [0], [1], [0, 0, 1, 1], [], []>} : vector<4x16xbf16>, vector<16x8xbf16>, vector<4x8xf32> -> vector<4x8xf32>
    %67 = arith.addf %61, %66 : vector<4x8xf32>
    %cst_61 = arith.constant 0.000000e+00 : f32
    %68 = vector.broadcast %cst_61 : f32 to vector<4x8xf32>
    %c2_62 = arith.constant 2 : index
    %c0_63 = arith.constant 0 : index
    %69 = vector.load %arg10[%c2_62, %c0_63] : memref<16x16xf32, #tpu.memory_space<vmem>>, vector<4x16xf32>
    %70 = arith.truncf %69 : vector<4x16xf32> to vector<4x16xbf16>
    %c0_64 = arith.constant 0 : index
    %c2_65 = arith.constant 2 : index
    %c0_66 = arith.constant 0 : index
    %c0_67 = arith.constant 0 : index
    %71 = vector.load %arg8[%c0_64, %c2_65, %c0_66, %c0_67] : memref<1x9x16x8xbf16, #tpu.memory_space<vmem>>, vector<1x1x16x8xbf16>
    %72 = vector.shape_cast %71 : vector<1x1x16x8xbf16> to vector<16x8xbf16>
    %cst_68 = arith.constant dense<0.000000e+00> : vector<4x8xf32>
    %73 = tpu.matmul %70, %72, %cst_68 {dimension_numbers = #tpu.dot_dimension_numbers<[1], [0], [0], [1], [0, 0, 1, 1], [], []>} : vector<4x16xbf16>, vector<16x8xbf16>, vector<4x8xf32> -> vector<4x8xf32>
    %74 = arith.addf %68, %73 : vector<4x8xf32>
    %c4_69 = arith.constant 4 : index
    %c0_70 = arith.constant 0 : index
    %75 = vector.load %arg10[%c4_69, %c0_70] : memref<16x16xf32, #tpu.memory_space<vmem>>, vector<4x16xf32>
    %76 = arith.truncf %75 : vector<4x16xf32> to vector<4x16xbf16>
    %c0_71 = arith.constant 0 : index
    %c5_72 = arith.constant 5 : index
    %c0_73 = arith.constant 0 : index
    %c0_74 = arith.constant 0 : index
    %77 = vector.load %arg8[%c0_71, %c5_72, %c0_73, %c0_74] : memref<1x9x16x8xbf16, #tpu.memory_space<vmem>>, vector<1x1x16x8xbf16>
    %78 = vector.shape_cast %77 : vector<1x1x16x8xbf16> to vector<16x8xbf16>
    %cst_75 = arith.constant dense<0.000000e+00> : vector<4x8xf32>
    %79 = tpu.matmul %76, %78, %cst_75 {dimension_numbers = #tpu.dot_dimension_numbers<[1], [0], [0], [1], [0, 0, 1, 1], [], []>} : vector<4x16xbf16>, vector<16x8xbf16>, vector<4x8xf32> -> vector<4x8xf32>
    %80 = arith.addf %74, %79 : vector<4x8xf32>
    %c6_76 = arith.constant 6 : index
    %c0_77 = arith.constant 0 : index
    %81 = vector.load %arg10[%c6_76, %c0_77] : memref<16x16xf32, #tpu.memory_space<vmem>>, vector<4x16xf32>
    %82 = arith.truncf %81 : vector<4x16xf32> to vector<4x16xbf16>
    %c0_78 = arith.constant 0 : index
    %c8 = arith.constant 8 : index
    %c0_79 = arith.constant 0 : index
    %c0_80 = arith.constant 0 : index
    %83 = vector.load %arg8[%c0_78, %c8, %c0_79, %c0_80] : memref<1x9x16x8xbf16, #tpu.memory_space<vmem>>, vector<1x1x16x8xbf16>
    %84 = vector.shape_cast %83 : vector<1x1x16x8xbf16> to vector<16x8xbf16>
    %cst_81 = arith.constant dense<0.000000e+00> : vector<4x8xf32>
    %85 = tpu.matmul %82, %84, %cst_81 {dimension_numbers = #tpu.dot_dimension_numbers<[1], [0], [0], [1], [0, 0, 1, 1], [], []>} : vector<4x16xbf16>, vector<16x8xbf16>, vector<4x8xf32> -> vector<4x8xf32>
    %86 = arith.addf %80, %85 : vector<4x8xf32>
    %87 = tpu.iota {dimensions = array<i32: 0>} : vector<4x1xi32>
    %c2_i32 = arith.constant 2 : i32
    %c0_i32 = arith.constant 0 : i32
    %88 = arith.cmpi eq, %c2_i32, %c0_i32 : i32
    %c1_i32 = arith.constant 1 : i32
    %89 = arith.select %88, %c1_i32, %c2_i32 : i32
    %90 = vector.broadcast %89 : i32 to vector<4x1xi32>
    %91 = arith.remsi %87, %90 : vector<4x1xi32>
    %c0_i32_82 = arith.constant 0 : i32
    %92 = vector.broadcast %c0_i32_82 : i32 to vector<4x1xi32>
    %93 = arith.cmpi ne, %91, %92 : vector<4x1xi32>
    %c0_i32_83 = arith.constant 0 : i32
    %94 = vector.broadcast %c0_i32_83 : i32 to vector<4x1xi32>
    %95 = arith.cmpi slt, %91, %94 : vector<4x1xi32>
    %c0_i32_84 = arith.constant 0 : i32
    %96 = arith.cmpi slt, %89, %c0_i32_84 : i32
    %97 = vector.broadcast %96 : i1 to vector<4x1xi1>
    %98 = vector.broadcast %97 : vector<4x1xi1> to vector<4x1xi1>
    %99 = arith.xori %95, %98 : vector<4x1xi1>
    %100 = arith.andi %99, %93 : vector<4x1xi1>
    %101 = vector.broadcast %89 : i32 to vector<4x1xi32>
    %102 = arith.addi %91, %101 : vector<4x1xi32>
    %103 = arith.select %100, %102, %91 : vector<4x1xi1>, vector<4x1xi32>
    %c0_i32_85 = arith.constant 0 : i32
    %104 = vector.broadcast %c0_i32_85 : i32 to vector<4x1xi32>
    %105 = arith.cmpi ne, %103, %104 : vector<4x1xi32>
    %cst_86 = arith.constant 0.000000e+00 : f32
    %106 = vector.shape_cast %105 : vector<4x1xi1> to vector<4x1xi1>
    %107 = vector.broadcast %106 : vector<4x1xi1> to vector<4x8xi1>
    %108 = vector.broadcast %cst_86 : f32 to vector<4x8xf32>
    %109 = arith.select %107, %48, %108 : vector<4x8xi1>, vector<4x8xf32>
    %110 = arith.addf %109, %67 : vector<4x8xf32>
    %c1_i32_87 = arith.constant 1 : i32
    %111 = vector.broadcast %c1_i32_87 : i32 to vector<4x1xi32>
    %112 = arith.cmpi ne, %103, %111 : vector<4x1xi32>
    %cst_88 = arith.constant 0.000000e+00 : f32
    %113 = vector.shape_cast %112 : vector<4x1xi1> to vector<4x1xi1>
    %114 = vector.broadcast %113 : vector<4x1xi1> to vector<4x8xi1>
    %115 = vector.broadcast %cst_88 : f32 to vector<4x8xf32>
    %116 = arith.select %114, %86, %115 : vector<4x8xi1>, vector<4x8xf32>
    %117 = arith.addf %110, %116 : vector<4x8xf32>
    %c0_89 = arith.constant 0 : index
    %c0_90 = arith.constant 0 : index
    %c0_91 = arith.constant 0 : index
    %118 = vector.load %arg9[%c0_89, %c0_90, %c0_91] : memref<1x4x32xbf16, #tpu.memory_space<vmem>>, vector<1x4x32xbf16>
    %119 = vector.shape_cast %118 : vector<1x4x32xbf16> to vector<4x32xbf16>
    %120 = vector.shape_cast %1 : vector<4x32xbf16> to vector<1x4x32xbf16>
    tpu.vector_store %arg9[%c0_89, %c0_90, %c0_91], %120 {strides = array<i32>} : memref<1x4x32xbf16, #tpu.memory_space<vmem>>, vector<1x4x32xbf16>,
    %121 = arith.truncf %117 : vector<4x8xf32> to vector<4x8xbf16>
    %c0_92 = arith.constant 0 : index
    %c0_93 = arith.constant 0 : index
    %c24 = arith.constant 24 : index
    %122 = vector.load %arg9[%c0_92, %c0_93, %c24] : memref<1x4x32xbf16, #tpu.memory_space<vmem>>, vector<1x4x8xbf16>
    %123 = vector.shape_cast %122 : vector<1x4x8xbf16> to vector<4x8xbf16>
    %124 = vector.shape_cast %121 : vector<4x8xbf16> to vector<1x4x8xbf16>
    tpu.vector_store %arg9[%c0_92, %c0_93, %c24], %124 {strides = array<i32>} : memref<1x4x32xbf16, #tpu.memory_space<vmem>>, vector<1x4x8xbf16>,
    return
  }
  func.func @transform_0(%arg0: i32, %arg1: memref<2xi32, #tpu.memory_space<smem>>) -> (i32, i32, i32) {
    %c0_i32 = arith.constant 0 : i32
    %c0_i32_0 = arith.constant 0 : i32
    %c0_i32_1 = arith.constant 0 : i32
    return %arg0, %c0_i32, %c0_i32_0 : i32, i32, i32
  }
  func.func @transform_1(%arg0: i32, %arg1: memref<2xi32, #tpu.memory_space<smem>>) -> (i32, i32, i32) {
    %0 = arith.index_cast %arg0 : i32 to index
    %1 = memref.load %arg1[%0] : memref<2xi32, #tpu.memory_space<smem>>
    %c0_i32 = arith.constant 0 : i32
    %c0_i32_0 = arith.constant 0 : i32
    %c0_i32_1 = arith.constant 0 : i32
    return %1, %c0_i32, %c0_i32_0 : i32, i32, i32
  }
  func.func @transform_2(%arg0: i32, %arg1: memref<2xi32, #tpu.memory_space<smem>>) -> (i32, i32, i32) {
    %0 = arith.index_cast %arg0 : i32 to index
    %1 = memref.load %arg1[%0] : memref<2xi32, #tpu.memory_space<smem>>
    %c0_i32 = arith.constant 0 : i32
    %c0_i32_0 = arith.constant 0 : i32
    %c0_i32_1 = arith.constant 0 : i32
    return %1, %c0_i32, %c0_i32_0 : i32, i32, i32
  }
  func.func @transform_3(%arg0: i32, %arg1: memref<2xi32, #tpu.memory_space<smem>>) -> (i32, i32, i32) {
    %0 = arith.index_cast %arg0 : i32 to index
    %1 = memref.load %arg1[%0] : memref<2xi32, #tpu.memory_space<smem>>
    %c0_i32 = arith.constant 0 : i32
    %c0_i32_0 = arith.constant 0 : i32
    %c0_i32_1 = arith.constant 0 : i32
    return %1, %c0_i32, %c0_i32_0 : i32, i32, i32
  }
  func.func @transform_4(%arg0: i32, %arg1: memref<2xi32, #tpu.memory_space<smem>>) -> (i32, i32, i32) {
    %0 = arith.index_cast %arg0 : i32 to index
    %1 = memref.load %arg1[%0] : memref<2xi32, #tpu.memory_space<smem>>
    %c0_i32 = arith.constant 0 : i32
    %c0_i32_0 = arith.constant 0 : i32
    %c0_i32_1 = arith.constant 0 : i32
    return %1, %c0_i32, %c0_i32_0 : i32, i32, i32
  }
  func.func @transform_5(%arg0: i32, %arg1: memref<2xi32, #tpu.memory_space<smem>>) -> (i32, i32, i32) {
    %0 = arith.index_cast %arg0 : i32 to index
    %1 = memref.load %arg1[%0] : memref<2xi32, #tpu.memory_space<smem>>
    %c0_i32 = arith.constant 0 : i32
    %c0_i32_0 = arith.constant 0 : i32
    %c0_i32_1 = arith.constant 0 : i32
    return %1, %c0_i32, %c0_i32_0 : i32, i32, i32
  }
  func.func @transform_6(%arg0: i32, %arg1: memref<2xi32, #tpu.memory_space<smem>>) -> (i32, i32, i32, i32) {
    %0 = arith.index_cast %arg0 : i32 to index
    %1 = memref.load %arg1[%0] : memref<2xi32, #tpu.memory_space<smem>>
    %c0_i32 = arith.constant 0 : i32
    %c0_i32_0 = arith.constant 0 : i32
    %c0_i32_1 = arith.constant 0 : i32
    %c0_i32_2 = arith.constant 0 : i32
    return %1, %c0_i32, %c0_i32_0, %c0_i32_1 : i32, i32, i32, i32
  }
  func.func @transform_7(%arg0: i32, %arg1: memref<2xi32, #tpu.memory_space<smem>>) -> (i32, i32, i32) {
    %c0_i32 = arith.constant 0 : i32
    %c0_i32_0 = arith.constant 0 : i32
    %c0_i32_1 = arith.constant 0 : i32
    return %arg0, %c0_i32, %c0_i32_0 : i32, i32, i32
  }
}

module attributes {stable_mosaic.version = 11 : i64} {
  func.func @_head_fc_kernel(%arg0: i32, %arg1: memref<2x32xbf16, #tpu.memory_space<vmem>>, %arg2: memref<32x28xbf16, #tpu.memory_space<vmem>>, %arg3: memref<1x28xf32, #tpu.memory_space<vmem>>, %arg4: memref<2x28xf32, #tpu.memory_space<vmem>>) attributes {dimension_semantics = [#tpu.dimension_semantics<arbitrary>], iteration_bounds = array<i64: 1>, scalar_prefetch = 0 : i64, scratch_operands = 0 : i64, tpu.core_type = #tpu.core_type<tc>, window_params = [{pipeline_mode = #tpu.pipeline_mode<synchronous>, transform_indices = @transform_0, window_bounds = array<i64: 2, 32>}, {pipeline_mode = #tpu.pipeline_mode<synchronous>, transform_indices = @transform_1, window_bounds = array<i64: 32, 28>}, {pipeline_mode = #tpu.pipeline_mode<synchronous>, transform_indices = @transform_2, window_bounds = array<i64: 1, 28>}, {pipeline_mode = #tpu.pipeline_mode<synchronous>, transform_indices = @transform_3, window_bounds = array<i64: 2, 28>}]} {
    %c0 = arith.constant 0 : index
    %c0_0 = arith.constant 0 : index
    %0 = vector.load %arg1[%c0, %c0_0] : memref<2x32xbf16, #tpu.memory_space<vmem>>, vector<2x32xbf16>
    %c0_1 = arith.constant 0 : index
    %c0_2 = arith.constant 0 : index
    %1 = vector.load %arg2[%c0_1, %c0_2] : memref<32x28xbf16, #tpu.memory_space<vmem>>, vector<32x28xbf16>
    %cst = arith.constant dense<0.000000e+00> : vector<2x28xf32>
    %2 = tpu.matmul %0, %1, %cst {dimension_numbers = #tpu.dot_dimension_numbers<[1], [0], [0], [1], [0, 0, 1, 1], [], []>} : vector<2x32xbf16>, vector<32x28xbf16>, vector<2x28xf32> -> vector<2x28xf32>
    %c0_3 = arith.constant 0 : index
    %c0_4 = arith.constant 0 : index
    %3 = vector.load %arg3[%c0_3, %c0_4] : memref<1x28xf32, #tpu.memory_space<vmem>>, vector<1x28xf32>
    %4 = vector.broadcast %3 : vector<1x28xf32> to vector<2x28xf32>
    %5 = arith.addf %2, %4 : vector<2x28xf32>
    %cst_5 = arith.constant 0.000000e+00 : f32
    %6 = vector.broadcast %cst_5 : f32 to vector<2x28xf32>
    %7 = arith.subf %6, %5 : vector<2x28xf32>
    %8 = math.exp %7 : vector<2x28xf32>
    %cst_6 = arith.constant 1.000000e+00 : f32
    %9 = vector.broadcast %cst_6 : f32 to vector<2x28xf32>
    %10 = arith.addf %9, %8 : vector<2x28xf32>
    %cst_7 = arith.constant 1.000000e+00 : f32
    %11 = vector.broadcast %cst_7 : f32 to vector<2x28xf32>
    %12 = arith.divf %11, %10 : vector<2x28xf32>
    %c0_8 = arith.constant 0 : index
    %c0_9 = arith.constant 0 : index
    %13 = vector.load %arg4[%c0_8, %c0_9] : memref<2x28xf32, #tpu.memory_space<vmem>>, vector<2x28xf32>
    tpu.vector_store %arg4[%c0_8, %c0_9], %12 {strides = array<i32>} : memref<2x28xf32, #tpu.memory_space<vmem>>, vector<2x28xf32>,
    return
  }
  func.func @transform_0(%arg0: i32) -> (i32, i32) {
    %c0_i32 = arith.constant 0 : i32
    %c0_i32_0 = arith.constant 0 : i32
    %c0_i32_1 = arith.constant 0 : i32
    return %c0_i32, %c0_i32_0 : i32, i32
  }
  func.func @transform_1(%arg0: i32) -> (i32, i32) {
    %c0_i32 = arith.constant 0 : i32
    %c0_i32_0 = arith.constant 0 : i32
    %c0_i32_1 = arith.constant 0 : i32
    return %c0_i32, %c0_i32_0 : i32, i32
  }
  func.func @transform_2(%arg0: i32) -> (i32, i32) {
    %c0_i32 = arith.constant 0 : i32
    %c0_i32_0 = arith.constant 0 : i32
    %c0_i32_1 = arith.constant 0 : i32
    return %c0_i32, %c0_i32_0 : i32, i32
  }
  func.func @transform_3(%arg0: i32) -> (i32, i32) {
    %c0_i32 = arith.constant 0 : i32
    %c0_i32_0 = arith.constant 0 : i32
    %c0_i32_1 = arith.constant 0 : i32
    return %c0_i32, %c0_i32_0 : i32, i32
  }
}

</mosaic_0001>

<bundles_post_ra>
// kernel: st_densenet_forward.8
= control target key start
LH: loop header
LB: loop body
LE: loop exit
PB: predicated region body
PF: predicated region fallthrough
CT: control target
= control target key end

     0   :  { %s761_s15 = smov 0   ;;  %s864_s0 = inlined_call_operand.vmem [shape: bf16[128,256], index: 0, kind: input, shape index: {}]   ;;  %s865_s1 = inlined_call_operand.vmem [shape: bf16[256,16], index: 1, kind: input, shape index: {}]   ;;  %s866_s2 = inlined_call_operand.vmem [shape: f32[1,16], index: 2, kind: input, shape index: {}]   ;;  %s867_s3 = inlined_call_operand.vmem [shape: f32[1,16], index: 3, kind: input, shape index: {}]   ;;  %s868_s4 = inlined_call_operand.vmem [shape: bf16[128,16], index: 4, kind: output, shape index: {}]  }
   0x1 LB: > { %s581_s16 = sadd.s32 4294967295, %s734_s15   ;;  %p585_p0 = scmp.ge.s32.totalorder %s734_s15, 1  ;;  %s734_s15 = sphi %s761_s15, %s14_s15  }
   0x2   : > { %p164_p1 = scmp.lt.s32.totalorder %s734_s15, 3 }
   0x4   : > { %p165_p2 = pnand %p585_p0, %p164_p1 }
   0x5   : > { %v700_v0 = vld [vmem:[%s865_s1 + $0x40] sm:$0xff] (!%p165_p2)   ;;  %s586_s19 = sshll.u32 (!%p165_p2), %s581_s16, 3  ;;  %v702_v2 = vld [vmem:[%s865_s1 + $0x48] sm:$0xff] (!%p165_p2)   ;;  %v704_v4 = vld [vmem:[%s865_s1 + $0x50] sm:$0xff] (!%p165_p2)   ;;  %vm516_vm0 = vcmask (!%p165_p2), 125952  }
   0x6   : > { %168 = sbr.rel (%p165_p2) target bundleno = 273 (0x111), region = 36  ;;  %v701_v1 = vld [vmem:[%s865_s1] sm:$0xff] (!%p165_p2)   ;;  %636 = vmatprep.subr.bf16.mxu0 (!%p165_p2), %v700_v0  ;;  %676 = vmatprep.subr.bf16.mxu1 (!%p165_p2), %v700_v0  ;;  %v703_v3 = vld [vmem:[%s865_s1 + $0x8] sm:$0xff] (!%p165_p2)   ;;  %p192_p3 = scmp.lt.s32.totalorder (!%p165_p2), %s586_s19, 15  ;;  %v705_v5 = vld [vmem:[%s865_s1 + $0x10] sm:$0xff] (!%p165_p2)  }
   0x7   : > { %637 = vmatpush3.bf16.msra.mxu0 (!%p165_p2), %v701_v1  ;;  %684 = vmatpush3.bf16.msra.mxu1 (!%p165_p2), %v701_v1  ;;  %v706_v6 = vld [vmem:[%s865_s1 + $0x58] sm:$0xff] (!%p165_p2)   ;;  %v708_v8 = vld [vmem:[%s865_s1 + $0x60] sm:$0xff] (!%p165_p2)   ;;  %v710_v10 = vld [vmem:[%s865_s1 + $0x68] sm:$0xff] (!%p165_p2)  }
   0x8   : > { %638 = vmatprep.subr.bf16.mxu0 (!%p165_p2), %v702_v2  ;;  %677 = vmatprep.subr.bf16.mxu1 (!%p165_p2), %v702_v2  ;;  %v707_v7 = vld [vmem:[%s865_s1 + $0x18] sm:$0xff] (!%p165_p2)   ;;  %v709_v9 = vld [vmem:[%s865_s1 + $0x20] sm:$0xff] (!%p165_p2)   ;;  %v711_v13 = vld [vmem:[%s865_s1 + $0x28] sm:$0xff] (!%p165_p2)  }
   0x9   : > { %v712_v14 = vld [vmem:[%s865_s1 + $0x70] sm:$0xff] (!%p165_p2)   ;;  %v714_v16 = vld [vmem:[%s865_s1 + $0x78] sm:$0xff] (!%p165_p2)   ;;  %v615_v27 = vld [vmem:[%s866_s2] ss:$0 sm:$0xff] (!%p165_p2) }
   0xa   : > { %v713_v15 = vld [vmem:[%s865_s1 + $0x30] sm:$0xff] (!%p165_p2)   ;;  %v715_v17 = vld [vmem:[%s865_s1 + $0x38] sm:$0xff] (!%p165_p2)   ;;  %v616_v33 = vld [vmem:[%s867_s3] ss:$0 sm:$0xff] (!%p165_p2) }
   0xb   : > { %639 = vmatpush3.bf16.msra.mxu0 (!%p165_p2), %v703_v3  ;;  %685 = vmatpush3.bf16.msra.mxu1 (!%p165_p2), %v703_v3 }
   0xc   : > { %640 = vmatprep.subr.bf16.mxu0 (!%p165_p2), %v704_v4  ;;  %678 = vmatprep.subr.bf16.mxu1 (!%p165_p2), %v704_v4 }
   0xd   : > { %s870_s19 = smov (!%p192_p3, %s586_s19), 15 }
   0xe   : > { %s627_s8 = sshll.u32 %s870_s19, 3 }
   0xf   : > { %641 = vmatpush3.bf16.msra.mxu0 %v705_v5  ;;  %686 = vmatpush3.bf16.msra.mxu1 %v705_v5  ;;  %s802_s13 = scalar_lea.vmem %s864_s0, %s627_s8  ;;  %s590_s8 = sshll.u32 %s870_s19, 2 }
  0x10   : > { %642 = vmatprep.subr.bf16.mxu0 %v706_v6  ;;  %679 = vmatprep.subr.bf16.mxu1 %v706_v6  ;;  %v718_v11 = vld [vmem:[%s802_s13 + $0x4] ss:$8 sps:$4 sm:$0xff]   ;;  %v716_v18 = vld [vmem:[%s802_s13] ss:$8 sps:$4 sm:$0xff]   ;;  %v722_v20 = vld [vmem:[%s802_s13 + $0x14] ss:$8 sps:$4 sm:$0xff]   ;;  %s843_s11 = scalar_lea.vmem %s868_s4, %s590_s8 }
  0x11   : > { %v721_v12 = vld [vmem:[%s802_s13 + $0x24] ss:$8 sps:$4 sm:$0xff]   ;;  %413 = vmatprep.mubr.bf16.mxu0 %v718_v11  ;;  %v719_v19 = vld [vmem:[%s802_s13 + $0x20] ss:$8 sps:$4 sm:$0xff]   ;;  %v724_v21 = vld [vmem:[%s802_s13 + $0x34] ss:$8 sps:$4 sm:$0xff]  }
  0x12   : > { %429 = vmatprep.mubr.bf16.mxu1 %v721_v12  ;;  %v726_v22 = vld [vmem:[%s802_s13 + $0x10] ss:$8 sps:$4 sm:$0xff]  }
  0x13   : > { %643 = vmatpush3.bf16.msra.mxu0 %v707_v7  ;;  %687 = vmatpush3.bf16.msra.mxu1 %v707_v7  ;;  %v727_v23 = vld [vmem:[%s802_s13 + $0x30] ss:$8 sps:$4 sm:$0xff]  }
  0x14   : > { %644 = vmatprep.subr.bf16.mxu0 %v708_v8  ;;  %680 = vmatprep.subr.bf16.mxu1 %v708_v8 }
  0x17   : > { %645 = vmatpush3.bf16.msra.mxu0 %v709_v9  ;;  %688 = vmatpush3.bf16.msra.mxu1 %v709_v9 }
  0x18   : > { %646 = vmatprep.subr.bf16.mxu0 %v710_v10  ;;  %681 = vmatprep.subr.bf16.mxu1 %v710_v10 }
  0x1b   : > { %647 = vmatpush3.bf16.msra.mxu0 %v711_v13  ;;  %689 = vmatpush3.bf16.msra.mxu1 %v711_v13 }
  0x1c   : > { %648 = vmatprep.subr.bf16.mxu0 %v712_v14  ;;  %682 = vmatprep.subr.bf16.mxu1 %v712_v14 }
  0x1f   : > { %649 = vmatpush3.bf16.msra.mxu0 %v713_v15  ;;  %690 = vmatpush3.bf16.msra.mxu1 %v713_v15 }
  0x20   : > { %650 = vmatprep.subr.bf16.mxu0 %v714_v16  ;;  %683 = vmatprep.subr.bf16.mxu1 %v714_v16 }
  0x23   : > { %651 = vmatpush3.bf16.msra.mxu0 %v715_v17  ;;  %691 = vmatpush3.bf16.msra.mxu1 %v715_v17 }
  0x26   : > { %414 = vmatmul.mubr.bf16.vlgmr.msra.gmra.mrb[0].mxu0 %v716_v18  ;;  %430 = vmatmul.mubr.bf16.vlgmr.msra.gmra.mrb[0].mxu1 %v719_v19 }
  0x27   : > { %421 = vmatprep.mubr.bf16.mxu0 %v722_v20  ;;  %437 = vmatprep.mubr.bf16.mxu1 %v724_v21 }
  0x2e   : > { %422 = vmatmul.mubr.bf16.gmra.mrb[4].mxu0 %v726_v22  ;;  %438 = vmatmul.mubr.bf16.gmra.mrb[4].mxu1 %v727_v23 }
  0xf9   : > { %v652_v24 = vpop.f32.mrb[0].mxu0  ;;  %v664_v25 = vpop.f32.mrb[0].mxu1 }
  0xfa   : > { %v653_v26 = vpop.f32.mrb[1].mxu0  ;;  %v665_v28 = vpop.f32.mrb[1].mxu1 }
  0xfb   : > { %v654_v29 = vadd.f32 %v653_v26, %v652_v24  ;;  %v666_v30 = vadd.f32 %v665_v28, %v664_v25  ;;  %v655_v31 = vpop.f32.mrb[2].mxu0  ;;  %v667_v32 = vpop.f32.mrb[2].mxu1 }
  0xfc   : > { %v656_v34 = vpop.f32.mrb[3].mxu0  ;;  %v668_v35 = vpop.f32.mrb[3].mxu1 }
  0xfd   : > { %v453_v36 = vmul.f32 %v654_v29, %v615_v27  ;;  %v457_v37 = vmul.f32 %v666_v30, %v615_v27  ;;  %v657_v38 = vadd.f32 %v656_v34, %v655_v31  ;;  %v669_v39 = vadd.f32 %v668_v35, %v667_v32 }
  0xff   : > { %v468_v40 = vadd.f32 %v616_v33, %v453_v36  ;;  %v472_v41 = vadd.f32 %v616_v33, %v457_v37  ;;  %v454_v42 = vmul.f32 %v657_v38, %v615_v27  ;;  %v458_v43 = vmul.f32 %v669_v39, %v615_v27 }
 0x101   : > { %v476_v44 = vmax.f32 %v468_v40, 0.0  ;;  %v480_v45 = vmax.f32 %v472_v41, 0.0  ;;  %v469_v46 = vadd.f32 %v616_v33, %v454_v42  ;;  %v473_v47 = vadd.f32 %v616_v33, %v458_v43  ;;  %v658_v48 = vpop.f32.mrb[4].mxu0  ;;  %v670_v49 = vpop.f32.mrb[4].mxu1 }
 0x102   : > { %v659_v50 = vpop.f32.mrb[5].mxu0  ;;  %v671_v51 = vpop.f32.mrb[5].mxu1 }
 0x103   : > { %v628_v52 = vpack.c.bf16 %v476_v44, %v476_v44  ;;  %v632_v53 = vpack.c.bf16 %v480_v45, %v480_v45  ;;  %v477_v54 = vmax.f32 %v469_v46, 0.0  ;;  %v481_v55 = vmax.f32 %v473_v47, 0.0  ;;  %v661_v56 = vpop.f32.mrb[6].mxu0  ;;  %v673_v57 = vpop.f32.mrb[6].mxu1 }
 0x104   : > { %v660_v58 = vadd.f32 %v659_v50, %v658_v48  ;;  %v672_v59 = vadd.f32 %v671_v51, %v670_v49  ;;  %v662_v60 = vpop.f32.mrb[7].mxu0  ;;  %v674_v61 = vpop.f32.mrb[7].mxu1 }
 0x105   : > { %517 = vst.msk [vmem:[%s843_s11] sm:$0xf] %vm516_vm0, %v628_v52  ;;  %521 = vst.msk [vmem:[%s843_s11 + $0x10] sm:$0xf] %vm516_vm0, %v632_v53  ;;  %v629_v62 = vpack.c.bf16 %v477_v54, %v477_v54  ;;  %v633_v63 = vpack.c.bf16 %v481_v55, %v481_v55  ;;  %v663_v0 = vadd.f32 %v662_v60, %v661_v56 }
 0x106   : > { %v675_v1 = vadd.f32 %v674_v61, %v673_v57  ;;  %v455_v2 = vmul.f32 %v660_v58, %v615_v27  ;;  %v459_v3 = vmul.f32 %v672_v59, %v615_v27 }
 0x107   : > { %518 = vst.msk [vmem:[%s843_s11 + $0x4] sm:$0xf] %vm516_vm0, %v629_v62  ;;  %522 = vst.msk [vmem:[%s843_s11 + $0x14] sm:$0xf] %vm516_vm0, %v633_v63  ;;  %v456_v4 = vmul.f32 %v663_v0, %v615_v27 }
 0x108   : > { %v460_v5 = vmul.f32 %v675_v1, %v615_v27  ;;  %v470_v6 = vadd.f32 %v616_v33, %v455_v2  ;;  %v474_v7 = vadd.f32 %v616_v33, %v459_v3 }
 0x109   : > { %v471_v8 = vadd.f32 %v616_v33, %v456_v4 }
 0x10a   : > { %v475_v9 = vadd.f32 %v616_v33, %v460_v5  ;;  %v478_v10 = vmax.f32 %v470_v6, 0.0  ;;  %v482_v11 = vmax.f32 %v474_v7, 0.0 }
 0x10b   : > { %v479_v12 = vmax.f32 %v471_v8, 0.0 }
 0x10c   : > { %v483_v13 = vmax.f32 %v475_v9, 0.0  ;;  %v630_v14 = vpack.c.bf16 %v478_v10, %v478_v10  ;;  %v634_v15 = vpack.c.bf16 %v482_v11, %v482_v11 }
 0x10d   : > { %v631_v16 = vpack.c.bf16 %v479_v12, %v479_v12 }
 0x10e   : > { %v635_v17 = vpack.c.bf16 %v483_v13, %v483_v13  ;;  %519 = vst.msk [vmem:[%s843_s11 + $0x8] sm:$0xf] %vm516_vm0, %v630_v14  ;;  %523 = vst.msk [vmem:[%s843_s11 + $0x18] sm:$0xf] %vm516_vm0, %v634_v15 }
 0x10f   : > { %520 = vst.msk [vmem:[%s843_s11 + $0xc] sm:$0xf] %vm516_vm0, %v631_v16 }
 0x110   : > { %524 = vst.msk [vmem:[%s843_s11 + $0x1c] sm:$0xf] %vm516_vm0, %v635_v17 }
 0x111 PF: > { %s14_s15 = sadd.s32 1, %s734_s15  }
 0x112   : > { %p11_p4 = scmp.ge.s32.totalorder %s14_s15, 4  }
 0x114   :  { %13 = sbr.rel (!%p11_p4) target bundleno = 1 (0x1), region = 66 }

// kernel: st_densenet_forward.9
= control target key start
LH: loop header
LB: loop body
LE: loop exit
PB: predicated region body
PF: predicated region fallthrough
CT: control target
= control target key end

     0   :  { %s1613_s0 = inlined_call_operand.vmem [shape: s32[2], index: 0, kind: input, shape index: {}]   ;;  %s1614_s1 = inlined_call_operand.vmem [shape: bf16[2,16,32], index: 1, kind: input, shape index: {}]   ;;  %s1615_s2 = inlined_call_operand.vmem [shape: f32[2,1,32], index: 2, kind: input, shape index: {}]   ;;  %s1616_s3 = inlined_call_operand.vmem [shape: f32[2,1,32], index: 3, kind: input, shape index: {}]   ;;  %s1617_s4 = inlined_call_operand.vmem [shape: bf16[2,32,16], index: 4, kind: input, shape index: {}]   ;;  %s1618_s5 = inlined_call_operand.vmem [shape: f32[2,1,16], index: 5, kind: input, shape index: {}]   ;;  %s1619_s6 = inlined_call_operand.vmem [shape: f32[2,1,16], index: 6, kind: input, shape index: {}]   ;;  %s1620_s7 = inlined_call_operand.vmem [shape: bf16[2,9,16,8], index: 7, kind: input, shape index: {}]   ;;  %s1621_s8 = inlined_call_operand.vmem [shape: bf16[2,16,32], index: 8, kind: output, shape index: {}]  }
   0x1   :  { %s13_s29 = sshll.u32 %s1613_s0, 4  ;;  %s14_s29 = int_to_ptr.vmem [resolvable:$true] %s13_s29 }
   0x2   :  { %s1412_s30 = scalar_lea.vmem %s14_s29, 16  ;;  %p1417_p1 = scmp.lt.s32.totalorder %s14_s29, %s14_s29 }
   0x3   :  { %p1413_p0 = scmp.ne.s32.totalorder %s14_s29, %s1412_s30  ;;  %p1418_p2 = scmp.lt.s32.totalorder %s1412_s30, %s1412_s30 }
   0x5   :  { %p1419_p3 = por %p1418_p2, %p1417_p1 }
   0x7   :  { %p1420_p4 = pnand %p1419_p3, %p1413_p0 }
   0x9   :  { %1423 = shalt.err (!%p1420_p4)  }
   0xa   :  { %s1434_s9 = smov [#allocation4]  }
   0xb   :  { %16 = dma.vmem_to_smem %s14_s29, 16, %s1434_s9, [#allocation3] }
   0xc   :  { %1428 = dma.done.wait [#allocation3], 16 }
   0xd   :  { %1429 = vsyncadd [#allocation3], 4294967280 }
   0xe   :  { %18 = sfence }
   0xf   :  { %s1486_s10 = smov 0  }
  0x10 LB: > { %s1492_s0 = sadd.s32 4294967295, %s1432_s10   ;;  %p1231_p5 = scmp.ge.s32.totalorder %s1432_s10, 1  ;;  %s1432_s10 = sphi %s1486_s10, %s24_s10  }
  0x11   : > { %p320_p6 = scmp.lt.s32.totalorder %s1432_s10, 3 }
  0x13   : > { %p321_p7 = pnand %p1231_p5, %p320_p6 }
  0x14   : > { %s395_s11 = sld [smem:[#allocation4 + %s1492_s0]] (!%p321_p7)  ;;  %p380_p8 = scmp.lt.s32.totalorder (!%p321_p7), %s1492_s0, 1  ;;  %v1435_v0 = vmov (!%p321_p7), 0.0   ;;  %vm1436_vm0 = vmmov (!%p321_p7), 0   ;;  %vm466_vm1 = vcmask (!%p321_p7), 261120   ;;  %vm531_vm2 = vcmask (!%p321_p7), 130048  }
  0x15   : > { %324 = sbr.rel (%p321_p7) target bundleno = 651 (0x28b), region = 48  ;;  %1310 = vmatprep.subr.bf16.mxu1 (!%p321_p7), %v1435_v0  ;;  %1314 = vmatprep.mubr.msk.bf16.mxu1 (!%p321_p7), %vm1436_vm0, %v1435_v0  ;;  %s385_s12 = sld [smem:[#allocation4 + %s1492_s0]] (!%p321_p7)  ;;  %532 = vst.msk [vmem:[#allocation2] sm:$0xff] (!%p321_p7), %vm531_vm2, %v1435_v0  ;;  %533 = vst.msk [vmem:[#allocation2 + $0x8] sm:$0xff] (!%p321_p7), %vm531_vm2, %v1435_v0  ;;  %vm1094_vm3 = vcmask (!%p321_p7), 257024   ;;  %vm1109_vm8 = vcmask (!%p321_p7), 191616  }
  0x16   : > { %s390_s13 = sld [smem:[#allocation4 + %s1492_s0]] (!%p321_p7)  ;;  %1336 = vmatprep.subr.bf16.mxu0 (!%p321_p7), %v1435_v0  ;;  %1338 = vmatprep.mubr.msk.bf16.mxu0 (!%p321_p7), %vm1436_vm0, %v1435_v0  ;;  %534 = vst.msk [vmem:[#allocation2 + $0x10] sm:$0xff] (!%p321_p7), %vm531_vm2, %v1435_v0  ;;  %535 = vst.msk [vmem:[#allocation2 + $0x18] sm:$0xff] (!%p321_p7), %vm531_vm2, %v1435_v0 }
  0x17   : > { %s412_s29 = sld [smem:[#allocation4 + %s1492_s0]] (!%p321_p7) }
  0x18   : > { %s407_s16 = sld [smem:[#allocation4 + %s1492_s0]] (!%p321_p7) }
  0x1a   : > { %p396_p9 = scmp.lt.s32.totalorder (!%p321_p7), %s395_s11, 1 }
  0x1b   : > { %p386_p10 = scmp.lt.s32.totalorder (!%p321_p7), %s385_s12, 1 }
  0x1c   : > { %s1504_s14 = scalar_select %p380_p8, %s1492_s0, 1 }
  0x1d   : > { %p391_p11 = scmp.lt.s32.totalorder %s390_s13, 1  ;;  %s1623_s11 = smov (!%p396_p9, %s395_s11), 1 }
  0x1e   : > { %s1284_s15 = sshll.u32 %s1504_s14, 3  ;;  %s1625_s12 = smov (!%p386_p10, %s385_s12), 1 }
  0x1f   : > { %s384_s18 = scalar_lea.vmem %s1614_s1, %s1284_s15  ;;  %s1285_s19 = sshll.u32 %s1623_s11, 4 }
  0x20   : > { %v1515_v1 = vld [vmem:[%s384_s18] sm:$0xf]  ;;  %v1517_v2 = vld [vmem:[%s384_s18 + $0x4] sm:$0xf]  ;;  %s400_s22 = scalar_lea.vmem %s1617_s4, %s1285_s19  ;;  %s388_s25 = scalar_lea.vmem %s1615_s2, %s1625_s12 }
  0x21   : > { %v427_v3 = vunpack.c.l.bf16 %v1515_v1  ;;  %v428_v4 = vunpack.c.l.bf16 %v1517_v2  ;;  %v1401_v5 = vld [vmem:[%s400_s22] sm:$0xff]   ;;  %s1627_s13 = smov (!%p391_p11, %s390_s13), 1  ;;  %v1402_v6 = vld [vmem:[%s400_s22 + $0x8] sm:$0xff]   ;;  %p413_p12 = scmp.lt.s32.totalorder %s412_s29, 1 }
  0x22   : > { %1311 = vmatpush3.bf16.msra.mxu1 %v1401_v5  ;;  %s393_s28 = scalar_lea.vmem %s1616_s3, %s1627_s13  ;;  %v1239_v7 = vld [vmem:[%s388_s25] ss:$0 sm:$0xff]  ;;  %s402_s13 = sld [smem:[#allocation4 + %s1492_s0]] }
  0x23   : > { %1312 = vmatprep.subr.bf16.mxu1 %v1435_v0  ;;  %v436_v8 = vmul.f32 %v1239_v7, %v427_v3  ;;  %v437_v9 = vmul.f32 %v1239_v7, %v428_v4  ;;  %v1240_v10 = vld [vmem:[%s393_s28] ss:$0 sm:$0xff]  ;;  %s1629_s29 = smov (!%p413_p12, %s412_s29), 1  ;;  %p408_p0 = scmp.lt.s32.totalorder %s407_s16, 1 }
  0x24   : > { %s1388_s30 = smul.u32 72, %s1629_s29  ;;  %s1602_s24 = scalar_lea.vmem %s1621_s8, %s1284_s15 }
  0x25   : > { %v445_v11 = vadd.f32 %v1240_v10, %v436_v8  ;;  %v446_v12 = vadd.f32 %v1240_v10, %v437_v9  ;;  %s1633_s16 = smov (!%p408_p0, %s407_s16), 1  ;;  %1095 = vst.msk [vmem:[%s1602_s24] sm:$0xf] %vm1094_vm3, %v1515_v1  ;;  %1096 = vst.msk [vmem:[%s1602_s24 + $0x4] sm:$0xf] %vm1094_vm3, %v1517_v2  ;;  %v1047_v9 = vlaneseq  ;;  %s1437_s14 = smov 16  }
  0x26   : > { %1313 = vmatpush3.bf16.msra.mxu1 %v1402_v6  ;;  %s1546_s12 = scalar_lea.vmem %s1620_s7, %s1388_s30  ;;  %s410_s22 = scalar_lea.vmem %s1619_s6, %s1633_s16 }
  0x27   : > { %v447_v13 = vmax.f32 %v445_v11, 0.0  ;;  %v448_v14 = vmax.f32 %v446_v12, 0.0  ;;  %1318 = vmatprep.subr.bf16.mxu1 %v1435_v0  ;;  %v1403_v16 = vld [vmem:[%s1546_s12 + $0x20] sm:$0xff]   ;;  %v1404_v17 = vld [vmem:[%s1546_s12 + $0x18] sm:$0xff]   ;;  %v1405_v31 = vld [vmem:[%s1546_s12 + $0x8] sm:$0xff]   ;;  %v1048_v10 = vshrl.u32 %v1047_v9, 7 }
  0x28   : > { %1337 = vmatpush3.bf16.msra.mxu0 %v1403_v16  ;;  %p403_p13 = scmp.lt.s32.totalorder %s402_s13, 1  ;;  %v1245_v20 = vld [vmem:[%s410_s22] ss:$0 sm:$0xff]  ;;  %v1407_v40 = vld [vmem:[%s1546_s12 + $0x28] sm:$0xff]   ;;  %v1409_v44 = vld [vmem:[%s1546_s12 + $0x30] sm:$0xff]  }
  0x29   : > { %v449_v15 = vpack.c.bf16 %v448_v14, %v447_v13  ;;  %1342 = vmatprep.subr.bf16.mxu0 %v1435_v0  ;;  %v1406_v32 = vld [vmem:[%s1546_s12] sm:$0xff]   ;;  %v1408_v48 = vld [vmem:[%s1546_s12 + $0x10] sm:$0xff]   ;;  %v1411_v51 = vld [vmem:[%s1546_s12 + $0x38] sm:$0xff]   ;;  %v1049_v13 = vadd.s32 8, %v1048_v10 }
  0x2a   : > { %s1631_s13 = smov (!%p403_p13, %s402_s13), 1  ;;  %v1410_v55 = vld [vmem:[%s1546_s12 + $0x40] sm:$0xff]  }
  0x2b   : > { %1315 = vmatmul.mubr.msk.bf16.vlgmr.msra.gmra.mrb[0].mxu1 %vm466_vm1, %v449_v15  ;;  %s405_s19 = scalar_lea.vmem %s1618_s5, %s1631_s13  ;;  %v1054_v15 = vand.u32 3, %v1048_v10  ;;  %v1061_v16 = vand.u32 3, %v1049_v13 }
  0x2c   : > { %1320 = vmatprep.mubr.msk.bf16.mxu1 %vm1436_vm0, %v1435_v0  ;;  %1319 = vmatpush3.bf16.msra.mxu1 %v1404_v17  ;;  %v1244_v18 = vld [vmem:[%s405_s19] ss:$0 sm:$0xff] }
  0x2d   : > { %1324 = vmatprep.subr.bf16.mxu1 %v1435_v0  ;;  %vm1074_vm4 = vcmp.ne.s32.totalorder %v1054_v15, 0  ;;  %vm1075_vm5 = vcmp.ne.s32.totalorder %v1061_v16, 0  ;;  %vm1084_vm6 = vcmp.ne.s32.totalorder %v1054_v15, 3  ;;  %vm1085_vm7 = vcmp.ne.s32.totalorder %v1061_v16, 3 }
  0xfe   : > { %v504_v19 = vpop.f32.mrb[0].mxu1 }
  0xff   : > { %v518_v21 = vmul.f32 %v1244_v18, %v504_v19  ;;  %v1316_v22 = vpop.f32.mrb[1].mxu1 }
 0x100   : > { %v507_v23 = vpop.f32.mrb[2].mxu1 }
 0x101   : > { %v527_v24 = vadd.f32 %v1245_v20, %v518_v21  ;;  %v519_v25 = vmul.f32 %v1244_v18, %v507_v23  ;;  %v1317_v26 = vpop.f32.mrb[3].mxu1 }
 0x103   : > { %v529_v27 = vmax.f32 %v527_v24, 0.0  ;;  %v528_v28 = vadd.f32 %v1245_v20, %v519_v25 }
 0x105   : > { %536 = vst.msk [vmem:[#allocation2 + $0x5] sm:$0xff] %vm531_vm2, %v529_v27  ;;  %v530_v29 = vmax.f32 %v528_v28, 0.0 }
 0x107   : > { %537 = vst.msk [vmem:[#allocation2 + $0xd] sm:$0xff] %vm531_vm2, %v530_v29 }
 0x10c   : > { %v543_v30 = vld [vmem:[#allocation2 + $0x4] sm:$0xff] }
 0x10d   : > { %v713_v34 = vld [vmem:[#allocation2 + $0x5] sm:$0xff] }
 0x10e   : > { %v544_v33 = vld [vmem:[#allocation2 + $0xc] sm:$0xff]  ;;  %v707_v39 = vld [vmem:[#allocation2 + $0x1] sm:$0xff] }
 0x10f   : > { %v714_v35 = vld [vmem:[#allocation2 + $0xd] sm:$0xff]  ;;  %v545_v36 = vpack.c.bf16 %v544_v33, %v543_v30  ;;  %v538_v43 = vld [vmem:[#allocation2] sm:$0xff] }
 0x110   : > { %v715_v37 = vpack.c.bf16 %v714_v35, %v713_v34  ;;  %v708_v38 = vld [vmem:[#allocation2 + $0x9] sm:$0xff]  ;;  %v820_v57 = vld [vmem:[#allocation2 + $0x11] sm:$0xff] }
 0x111   : > { %1321 = vmatmul.mubr.msk.bf16.vlgmr.msra.gmra.mrb[4].mxu1 %vm531_vm2, %v545_v36  ;;  %v709_v41 = vpack.c.bf16 %v708_v38, %v707_v39  ;;  %v539_v42 = vld [vmem:[#allocation2 + $0x8] sm:$0xff]  ;;  %v650_v50 = vld [vmem:[#allocation2 + $0x10] sm:$0xff]  ;;  %v821_v58 = vpack.c.bf16 %v820_v57, %v708_v38 }
 0x112   : > { %1339 = vmatmul.mubr.msk.bf16.vlgmr.msra.gmra.mrb[0].mxu0 %vm531_vm2, %v715_v37  ;;  %1325 = vmatpush3.bf16.msra.mxu1 %v1406_v32  ;;  %v540_v45 = vpack.c.bf16 %v539_v42, %v538_v43  ;;  %v883_v46 = vld [vmem:[#allocation2 + $0x6] sm:$0xff]  ;;  %v884_v47 = vld [vmem:[#allocation2 + $0xe] sm:$0xff]  ;;  %v651_v52 = vpack.c.bf16 %v650_v50, %v539_v42 }
 0x113   : > { %1343 = vmatpush3.bf16.msra.mxu0 %v1405_v31  ;;  %1344 = vmatprep.mubr.msk.bf16.mxu0 %vm1436_vm0, %v1435_v0  ;;  %v885_v49 = vpack.c.bf16 %v884_v47, %v883_v46  ;;  %v878_v53 = vld [vmem:[#allocation2 + $0xa] sm:$0xff]  ;;  %v877_v54 = vld [vmem:[#allocation2 + $0x2] sm:$0xff]  ;;  %v990_v59 = vld [vmem:[#allocation2 + $0x12] sm:$0xff] }
 0x114   : > { %1354 = vmatprep.subr.bf16.mxu0 %v1435_v0  ;;  %1326 = vmatprep.mubr.msk.bf16.mxu1 %vm1436_vm0, %v1435_v0  ;;  %v879_v56 = vpack.c.bf16 %v878_v53, %v877_v54  ;;  %v991_v60 = vpack.c.bf16 %v990_v59, %v878_v53 }
 0x115   : > { %1330 = vmatprep.subr.bf16.mxu1 %v1435_v0 }
 0x11a   : > { %1345 = vmatmul.mubr.msk.bf16.vlgmr.msra.gmra.mrb[4].mxu0 %vm531_vm2, %v709_v41 }
 0x11b   : > { %1355 = vmatpush3.bf16.msra.mxu0 %v1407_v40  ;;  %1356 = vmatprep.mubr.msk.bf16.mxu0 %vm1436_vm0, %v1435_v0 }
 0x11c   : > { %1360 = vmatprep.subr.bf16.mxu0 %v1435_v0 }
 0x11d   : > { %1327 = vmatmul.mubr.msk.bf16.vlgmr.msra.gmra.mrb[4].mxu1 %vm531_vm2, %v540_v45 }
 0x11e   : > { %1331 = vmatpush3.bf16.msra.mxu1 %v1409_v44  ;;  %1332 = vmatprep.mubr.msk.bf16.mxu1 %vm1436_vm0, %v1435_v0 }
 0x11f   : > { %1348 = vmatprep.subr.bf16.mxu1 %v1435_v0 }
 0x122   : > { %1357 = vmatmul.mubr.msk.bf16.vlgmr.msra.gmra.mrb[8].mxu0 %vm531_vm2, %v885_v49 }
 0x123   : > { %1361 = vmatpush3.bf16.msra.mxu0 %v1408_v48  ;;  %1362 = vmatprep.mubr.msk.bf16.mxu0 %vm1436_vm0, %v1435_v0 }
 0x124   : > { %1366 = vmatprep.subr.bf16.mxu0 %v1435_v0 }
 0x129   : > { %1333 = vmatmul.mubr.msk.bf16.vlgmr.msra.gmra.mrb[4].mxu1 %vm531_vm2, %v651_v52 }
 0x12a   : > { %1349 = vmatpush3.bf16.msra.mxu1 %v1411_v51  ;;  %1350 = vmatprep.mubr.msk.bf16.mxu1 %vm1436_vm0, %v1435_v0 }
 0x12e   : > { %1363 = vmatmul.mubr.msk.bf16.vlgmr.msra.gmra.mrb[8].mxu0 %vm531_vm2, %v879_v56 }
 0x12f   : > { %1367 = vmatpush3.bf16.msra.mxu0 %v1410_v55  ;;  %1368 = vmatprep.mubr.msk.bf16.mxu0 %vm1436_vm0, %v1435_v0 }
 0x131   : > { %1351 = vmatmul.mubr.msk.bf16.vlgmr.msra.gmra.mrb[8].mxu1 %vm531_vm2, %v821_v58 }
 0x13a   : > { %1369 = vmatmul.mubr.msk.bf16.vlgmr.msra.gmra.mrb[8].mxu0 %vm531_vm2, %v991_v60 }
 0x1e5   : > { %v762_v61 = vpop.f32.mrb[0].mxu0 }
 0x1e6   : > { %v1340_v62 = vpop.f32.mrb[1].mxu0 }
 0x1e7   : > { %v765_v63 = vpop.f32.mrb[2].mxu0 }
 0x1e8   : > { %v1341_v0 = vpop.f32.mrb[3].mxu0 }
 0x1ed   : > { %v812_v3 = vpop.f32.mrb[4].mxu0 }
 0x1ee   : > { %v813_v4 = vadd.f32 %v812_v3, %v762_v61  ;;  %v1346_v5 = vpop.f32.mrb[5].mxu0 }
 0x1ef   : > { %v815_v6 = vpop.f32.mrb[6].mxu0 }
 0x1f0   : > { %v816_v7 = vadd.f32 %v815_v6, %v765_v63  ;;  %v1347_v8 = vpop.f32.mrb[7].mxu0 }
 0x1fc   : > { %v698_v11 = vpop.f32.mrb[4].mxu1 }
 0x1fd   : > { %v1334_v12 = vpop.f32.mrb[5].mxu1  ;;  %v1080_v19 = vsel %vm1074_vm4, %v698_v11, 0.0 }
 0x1fe   : > { %v701_v14 = vpop.f32.mrb[6].mxu1 }
 0x1ff   : > { %v1335_v1 = vpop.f32.mrb[7].mxu1  ;;  %v1081_v24 = vsel %vm1075_vm5, %v701_v14, 0.0 }
 0x204   : > { %v868_v2 = vpop.f32.mrb[8].mxu1 }
 0x205   : > { %v875_v17 = vadd.f32 %v868_v2, %v813_v4  ;;  %v1352_v18 = vpop.f32.mrb[9].mxu1 }
 0x206   : > { %v871_v20 = vpop.f32.mrb[10].mxu1 }
 0x207   : > { %v1082_v21 = vadd.f32 %v1080_v19, %v875_v17  ;;  %v876_v22 = vadd.f32 %v871_v20, %v816_v7  ;;  %v1353_v23 = vpop.f32.mrb[11].mxu1 }
 0x209   : > { %v1083_v25 = vadd.f32 %v1081_v24, %v876_v22 }
 0x20d   : > { %v1038_v26 = vpop.f32.mrb[8].mxu0 }
 0x20e   : > { %v1090_v27 = vsel %vm1084_vm6, %v1038_v26, 0.0  ;;  %v1370_v28 = vpop.f32.mrb[9].mxu0 }
 0x20f   : > { %v1092_v29 = vadd.f32 %v1090_v27, %v1082_v21  ;;  %v1041_v30 = vpop.f32.mrb[10].mxu0 }
 0x210   : > { %v1091_v31 = vsel %vm1085_vm7, %v1041_v30, 0.0  ;;  %v1371_v32 = vpop.f32.mrb[11].mxu0 }
 0x211   : > { %v1093_v33 = vadd.f32 %v1091_v31, %v1083_v25  ;;  %v1287_v34 = vpack.c.bf16 %v1092_v29, %v1092_v29 }
 0x213   : > { %1103 = vrot.lane.b32.xlu0 %v1287_v34, %s1437_s14  ;;  %v1288_v35 = vpack.c.bf16 %v1093_v33, %v1093_v33 }
 0x217   : > { %1105 = vrot.lane.b32.xlu0 %v1288_v35, %s1437_s14 }
 0x285   : > { %v1104_v36 = vpop.permute.xlu0 %1103 }
 0x286   : > { %1110 = vst.msk [vmem:[%s1602_s24] sm:$0xf] %vm1109_vm8, %v1104_v36 }
 0x289   : > { %v1106_v37 = vpop.permute.xlu0 %1105 }
 0x28a   : > { %1111 = vst.msk [vmem:[%s1602_s24 + $0x4] sm:$0xf] %vm1109_vm8, %v1106_v37 }
 0x28b PF: > { %s24_s10 = sadd.s32 1, %s1432_s10  }
 0x28c   : > { %p21_p1 = scmp.ge.s32.totalorder %s24_s10, 4  }
 0x28e   :  { %23 = sbr.rel (!%p21_p1) target bundleno = 16 (0x10), region = 104 }

// kernel: st_densenet_forward.11
= control target key start
LH: loop header
LB: loop body
LE: loop exit
PB: predicated region body
PF: predicated region fallthrough
CT: control target
= control target key end

     0   :  { %s673_s0 = inlined_call_operand.vmem [shape: s32[2], index: 0, kind: input, shape index: {}]   ;;  %s674_s1 = inlined_call_operand.vmem [shape: bf16[2,16,32], index: 1, kind: input, shape index: {}]   ;;  %s675_s2 = inlined_call_operand.vmem [shape: f32[2,1,32], index: 2, kind: input, shape index: {}]   ;;  %s676_s3 = inlined_call_operand.vmem [shape: f32[2,1,32], index: 3, kind: input, shape index: {}]   ;;  %s677_s4 = inlined_call_operand.vmem [shape: bf16[2,32,16], index: 4, kind: input, shape index: {}]   ;;  %s678_s5 = inlined_call_operand.vmem [shape: bf16[4,16], index: 5, kind: input, shape index: {}]   ;;  %s679_s6 = inlined_call_operand.vmem [shape: bf16[2,4,32], index: 6, kind: output, shape index: {}]  }
   0x1   :  { %s11_s23 = sshll.u32 %s673_s0, 4  ;;  %s12_s23 = int_to_ptr.vmem [resolvable:$true] %s11_s23 }
   0x2   :  { %s576_s24 = scalar_lea.vmem %s12_s23, 16  ;;  %p581_p1 = scmp.lt.s32.totalorder %s12_s23, %s12_s23 }
   0x3   :  { %p577_p0 = scmp.ne.s32.totalorder %s12_s23, %s576_s24  ;;  %p582_p2 = scmp.lt.s32.totalorder %s576_s24, %s576_s24 }
   0x5   :  { %p583_p3 = por %p582_p2, %p581_p1 }
   0x7   :  { %p584_p4 = pnand %p583_p3, %p577_p0 }
   0x9   :  { %587 = shalt.err (!%p584_p4)  }
   0xa   :  { %s598_s25 = smov [#allocation3]  }
   0xb   :  { %14 = dma.vmem_to_smem %s12_s23, 16, %s598_s25, [#allocation2] }
   0xc   :  { %592 = dma.done.wait [#allocation2], 16 }
   0xd   :  { %593 = vsyncadd [#allocation2], 4294967280 }
   0xe   :  { %16 = sfence }
   0xf   :  { %s640_s26 = smov 0  }
  0x10 LB: > { %s519_s0 = sadd.s32 4294967295, %s596_s26   ;;  %p523_p5 = scmp.ge.s32.totalorder %s596_s26, 1  ;;  %s596_s26 = sphi %s640_s26, %s22_s26  }
  0x11   : > { %p232_p6 = scmp.lt.s32.totalorder %s596_s26, 3 }
  0x13   : > { %p233_p7 = pnand %p523_p5, %p232_p6 }
  0x14   : > { %p273_p8 = scmp.lt.s32.totalorder (!%p233_p7), %s519_s0, 1  ;;  %s278_s27 = sld [smem:[#allocation3 + %s519_s0]] (!%p233_p7)  ;;  %v599_v0 = vmov (!%p233_p7), 0.0   ;;  %vm600_vm0 = vmmov (!%p233_p7), 0   ;;  %v325_v14 = vld [vmem:[%s678_s5] sm:$0x3] (!%p233_p7) }
  0x15   : > { %236 = sbr.rel (%p233_p7) target bundleno = 474 (0x1da), region = 40  ;;  %548 = vmatprep.subr.bf16.mxu0 (!%p233_p7), %v599_v0  ;;  %s283_s28 = sld [smem:[#allocation3 + %s519_s0]] (!%p233_p7)  ;;  %550 = vmatprep.mubr.msk.bf16.mxu0 (!%p233_p7), %vm600_vm0, %v599_v0  ;;  %vm326_vm1 = vcmask (!%p233_p7), 130048   ;;  %vm387_vm2 = vcmask (!%p233_p7), 261120   ;;  %vm431_vm3 = vcmask (!%p233_p7), 254976   ;;  %v601_v21 = vmov (!%p233_p7), 0  }
  0x16   : > { %s288_s29 = sld [smem:[#allocation3 + %s519_s0]] (!%p233_p7)  ;;  %554 = vmatprep.subr.bf16.mxu1 (!%p233_p7), %v599_v0  ;;  %558 = vmatprep.mubr.msk.bf16.mxu1 (!%p233_p7), %vm600_vm0, %v599_v0  ;;  %vm434_vm4 = vcmask (!%p233_p7), 123904  }
  0x1a   : > { %p279_p9 = scmp.lt.s32.totalorder (!%p233_p7), %s278_s27, 1 }
  0x1b   : > { %p284_p10 = scmp.lt.s32.totalorder (!%p233_p7), %s283_s28, 1 }
  0x1c   : > { %s681_s0 = smov (!%p273_p8, %s519_s0), 1  ;;  %p289_p11 = scmp.lt.s32.totalorder %s288_s29, 1 }
  0x1d   : > { %s537_s30 = sshll.u32 %s681_s0, 3  ;;  %s683_s27 = smov (!%p279_p9, %s278_s27), 1 }
  0x1e   : > { %s277_s9 = scalar_lea.vmem %s674_s1, %s537_s30  ;;  %s685_s28 = smov (!%p284_p10, %s283_s28), 1 }
  0x1f   : > { %v540_v1 = vld [vmem:[%s277_s9] sm:$0xff]   ;;  %s281_s12 = scalar_lea.vmem %s675_s2, %s683_s27  ;;  %s286_s15 = scalar_lea.vmem %s676_s3, %s685_s28 }
  0x20   : > { %v541_v2 = vunpack.c.l.bf16 %v540_v1  ;;  %v542_v3 = vunpack.c.h.bf16 %v540_v1  ;;  %v529_v4 = vld [vmem:[%s281_s12] ss:$0 sm:$0xff]  ;;  %s687_s29 = smov (!%p289_p11, %s288_s29), 1  ;;  %s528_s22 = sshll.u32 %s681_s0, 1 }
  0x21   : > { %v530_v7 = vld [vmem:[%s286_s15] ss:$0 sm:$0xff]  ;;  %s538_s16 = sshll.u32 %s687_s29, 4  ;;  %s298_s25 = scalar_lea.vmem %s679_s6, %s528_s22 }
  0x22   : > { %v311_v5 = vmul.f32 %v541_v2, %v529_v4  ;;  %v312_v6 = vmul.f32 %v542_v3, %v529_v4  ;;  %s293_s19 = scalar_lea.vmem %s677_s4, %s538_s16  ;;  %432 = vst.msk [vmem:[%s298_s25] sm:$0x3] %vm431_vm3, %v601_v21 }
  0x23   : > { %v574_v12 = vld [vmem:[%s293_s19] sm:$0xff]   ;;  %v575_v15 = vld [vmem:[%s293_s19 + $0x8] sm:$0xff]  }
  0x24   : > { %v320_v8 = vadd.f32 %v530_v7, %v311_v5  ;;  %v321_v9 = vadd.f32 %v530_v7, %v312_v6  ;;  %555 = vmatpush3.bf16.msra.mxu1 %v574_v12 }
  0x25   : > { %556 = vmatprep.subr.bf16.mxu1 %v599_v0 }
  0x26   : > { %v322_v10 = vmax.f32 %v320_v8, 0.0  ;;  %v323_v11 = vmax.f32 %v321_v9, 0.0 }
  0x28   : > { %v324_v13 = vpack.c.bf16 %v323_v11, %v322_v10  ;;  %557 = vmatpush3.bf16.msra.mxu1 %v575_v15 }
  0x2a   : > { %549 = vmatpush3.bf16.msra.mxu0 %v324_v13 }
  0x2d   : > { %551 = vmatmul.mubr.msk.bf16.vlgmr.msra.gmra.mrb[0].mxu0 %vm326_vm1, %v325_v14 }
 0x100   : > { %v364_v16 = vpop.f32.mrb[0].mxu0 }
 0x101   : > { %v370_v17 = vpack.c.bf16 %v364_v16, %v364_v16  ;;  %v552_v18 = vpop.f32.mrb[1].mxu0 }
 0x102   : > { %v367_v19 = vpop.f32.mrb[2].mxu0 }
 0x103   : > { %v553_v20 = vpop.f32.mrb[3].mxu0  ;;  %559 = vmatmul.mubr.msk.bf16.vlgmr.msra.gmra.mrb[0].mxu1 %vm387_vm2, %v370_v17 }
 0x1d6   : > { %v425_v22 = vpop.f32.mrb[0].mxu1 }
 0x1d7   : > { %v433_v23 = vpack.c.bf16 %v425_v22, %v425_v22  ;;  %v560_v24 = vpop.f32.mrb[1].mxu1 }
 0x1d8   : > { %v428_v25 = vpop.f32.mrb[2].mxu1 }
 0x1d9   : > { %435 = vst.msk [vmem:[%s298_s25] sm:$0x3] %vm434_vm4, %v433_v23  ;;  %v561_v26 = vpop.f32.mrb[3].mxu1 }
 0x1da PF: > { %s22_s26 = sadd.s32 1, %s596_s26  }
 0x1db   : > { %p19_p12 = scmp.ge.s32.totalorder %s22_s26, 4  }
 0x1dd   :  { %21 = sbr.rel (!%p19_p12) target bundleno = 16 (0x10), region = 79 }

// kernel: st_densenet_forward.10
= control target key start
LH: loop header
LB: loop body
LE: loop exit
PB: predicated region body
PF: predicated region fallthrough
CT: control target
= control target key end

     0   :  { %s1613_s0 = inlined_call_operand.vmem [shape: s32[2], index: 0, kind: input, shape index: {}]   ;;  %s1614_s1 = inlined_call_operand.vmem [shape: bf16[2,16,32], index: 1, kind: input, shape index: {}]   ;;  %s1615_s2 = inlined_call_operand.vmem [shape: f32[2,1,32], index: 2, kind: input, shape index: {}]   ;;  %s1616_s3 = inlined_call_operand.vmem [shape: f32[2,1,32], index: 3, kind: input, shape index: {}]   ;;  %s1617_s4 = inlined_call_operand.vmem [shape: bf16[2,32,16], index: 4, kind: input, shape index: {}]   ;;  %s1618_s5 = inlined_call_operand.vmem [shape: f32[2,1,16], index: 5, kind: input, shape index: {}]   ;;  %s1619_s6 = inlined_call_operand.vmem [shape: f32[2,1,16], index: 6, kind: input, shape index: {}]   ;;  %s1620_s7 = inlined_call_operand.vmem [shape: bf16[2,9,16,8], index: 7, kind: input, shape index: {}]   ;;  %s1621_s8 = inlined_call_operand.vmem [shape: bf16[2,16,32], index: 8, kind: output, shape index: {}]  }
   0x1   :  { %s13_s29 = sshll.u32 %s1613_s0, 4  ;;  %s14_s29 = int_to_ptr.vmem [resolvable:$true] %s13_s29 }
   0x2   :  { %s1412_s30 = scalar_lea.vmem %s14_s29, 16  ;;  %p1417_p1 = scmp.lt.s32.totalorder %s14_s29, %s14_s29 }
   0x3   :  { %p1413_p0 = scmp.ne.s32.totalorder %s14_s29, %s1412_s30  ;;  %p1418_p2 = scmp.lt.s32.totalorder %s1412_s30, %s1412_s30 }
   0x5   :  { %p1419_p3 = por %p1418_p2, %p1417_p1 }
   0x7   :  { %p1420_p4 = pnand %p1419_p3, %p1413_p0 }
   0x9   :  { %1423 = shalt.err (!%p1420_p4)  }
   0xa   :  { %s1434_s9 = smov [#allocation4]  }
   0xb   :  { %16 = dma.vmem_to_smem %s14_s29, 16, %s1434_s9, [#allocation3] }
   0xc   :  { %1428 = dma.done.wait [#allocation3], 16 }
   0xd   :  { %1429 = vsyncadd [#allocation3], 4294967280 }
   0xe   :  { %18 = sfence }
   0xf   :  { %s1486_s10 = smov 0  }
  0x10 LB: > { %s1492_s0 = sadd.s32 4294967295, %s1432_s10   ;;  %p1231_p5 = scmp.ge.s32.totalorder %s1432_s10, 1  ;;  %s1432_s10 = sphi %s1486_s10, %s24_s10  }
  0x11   : > { %p320_p6 = scmp.lt.s32.totalorder %s1432_s10, 3 }
  0x13   : > { %p321_p7 = pnand %p1231_p5, %p320_p6 }
  0x14   : > { %s395_s11 = sld [smem:[#allocation4 + %s1492_s0]] (!%p321_p7)  ;;  %p380_p8 = scmp.lt.s32.totalorder (!%p321_p7), %s1492_s0, 1  ;;  %v1435_v0 = vmov (!%p321_p7), 0.0   ;;  %vm1436_vm0 = vmmov (!%p321_p7), 0   ;;  %vm466_vm1 = vcmask (!%p321_p7), 261120   ;;  %vm531_vm2 = vcmask (!%p321_p7), 130048  }
  0x15   : > { %324 = sbr.rel (%p321_p7) target bundleno = 651 (0x28b), region = 48  ;;  %1310 = vmatprep.subr.bf16.mxu1 (!%p321_p7), %v1435_v0  ;;  %1314 = vmatprep.mubr.msk.bf16.mxu1 (!%p321_p7), %vm1436_vm0, %v1435_v0  ;;  %s385_s12 = sld [smem:[#allocation4 + %s1492_s0]] (!%p321_p7)  ;;  %532 = vst.msk [vmem:[#allocation2] sm:$0xff] (!%p321_p7), %vm531_vm2, %v1435_v0  ;;  %533 = vst.msk [vmem:[#allocation2 + $0x8] sm:$0xff] (!%p321_p7), %vm531_vm2, %v1435_v0  ;;  %vm1094_vm3 = vcmask (!%p321_p7), 257024   ;;  %vm1109_vm8 = vcmask (!%p321_p7), 257216  }
  0x16   : > { %s390_s13 = sld [smem:[#allocation4 + %s1492_s0]] (!%p321_p7)  ;;  %1336 = vmatprep.subr.bf16.mxu0 (!%p321_p7), %v1435_v0  ;;  %1338 = vmatprep.mubr.msk.bf16.mxu0 (!%p321_p7), %vm1436_vm0, %v1435_v0  ;;  %534 = vst.msk [vmem:[#allocation2 + $0x10] sm:$0xff] (!%p321_p7), %vm531_vm2, %v1435_v0  ;;  %535 = vst.msk [vmem:[#allocation2 + $0x18] sm:$0xff] (!%p321_p7), %vm531_vm2, %v1435_v0 }
  0x17   : > { %s412_s29 = sld [smem:[#allocation4 + %s1492_s0]] (!%p321_p7) }
  0x18   : > { %s407_s16 = sld [smem:[#allocation4 + %s1492_s0]] (!%p321_p7) }
  0x1a   : > { %p396_p9 = scmp.lt.s32.totalorder (!%p321_p7), %s395_s11, 1 }
  0x1b   : > { %p386_p10 = scmp.lt.s32.totalorder (!%p321_p7), %s385_s12, 1 }
  0x1c   : > { %s1504_s14 = scalar_select %p380_p8, %s1492_s0, 1 }
  0x1d   : > { %p391_p11 = scmp.lt.s32.totalorder %s390_s13, 1  ;;  %s1623_s11 = smov (!%p396_p9, %s395_s11), 1 }
  0x1e   : > { %s1284_s15 = sshll.u32 %s1504_s14, 3  ;;  %s1625_s12 = smov (!%p386_p10, %s385_s12), 1 }
  0x1f   : > { %s384_s18 = scalar_lea.vmem %s1614_s1, %s1284_s15  ;;  %s1285_s19 = sshll.u32 %s1623_s11, 4 }
  0x20   : > { %v1515_v1 = vld [vmem:[%s384_s18] sm:$0xf]  ;;  %v1517_v2 = vld [vmem:[%s384_s18 + $0x4] sm:$0xf]  ;;  %s400_s22 = scalar_lea.vmem %s1617_s4, %s1285_s19  ;;  %s388_s25 = scalar_lea.vmem %s1615_s2, %s1625_s12 }
  0x21   : > { %v427_v3 = vunpack.c.l.bf16 %v1515_v1  ;;  %v428_v4 = vunpack.c.l.bf16 %v1517_v2  ;;  %v1401_v5 = vld [vmem:[%s400_s22] sm:$0xff]   ;;  %s1627_s13 = smov (!%p391_p11, %s390_s13), 1  ;;  %v1402_v6 = vld [vmem:[%s400_s22 + $0x8] sm:$0xff]   ;;  %p413_p12 = scmp.lt.s32.totalorder %s412_s29, 1 }
  0x22   : > { %1311 = vmatpush3.bf16.msra.mxu1 %v1401_v5  ;;  %s393_s28 = scalar_lea.vmem %s1616_s3, %s1627_s13  ;;  %v1239_v7 = vld [vmem:[%s388_s25] ss:$0 sm:$0xff]  ;;  %s402_s13 = sld [smem:[#allocation4 + %s1492_s0]] }
  0x23   : > { %1312 = vmatprep.subr.bf16.mxu1 %v1435_v0  ;;  %v436_v8 = vmul.f32 %v1239_v7, %v427_v3  ;;  %v437_v9 = vmul.f32 %v1239_v7, %v428_v4  ;;  %v1240_v10 = vld [vmem:[%s393_s28] ss:$0 sm:$0xff]  ;;  %s1629_s29 = smov (!%p413_p12, %s412_s29), 1  ;;  %p408_p0 = scmp.lt.s32.totalorder %s407_s16, 1 }
  0x24   : > { %s1388_s30 = smul.u32 72, %s1629_s29  ;;  %s1602_s24 = scalar_lea.vmem %s1621_s8, %s1284_s15 }
  0x25   : > { %v445_v11 = vadd.f32 %v1240_v10, %v436_v8  ;;  %v446_v12 = vadd.f32 %v1240_v10, %v437_v9  ;;  %s1633_s16 = smov (!%p408_p0, %s407_s16), 1  ;;  %1095 = vst.msk [vmem:[%s1602_s24] sm:$0xf] %vm1094_vm3, %v1515_v1  ;;  %1096 = vst.msk [vmem:[%s1602_s24 + $0x4] sm:$0xf] %vm1094_vm3, %v1517_v2  ;;  %v1047_v9 = vlaneseq  ;;  %s1437_s14 = smov 24  }
  0x26   : > { %1313 = vmatpush3.bf16.msra.mxu1 %v1402_v6  ;;  %s1546_s12 = scalar_lea.vmem %s1620_s7, %s1388_s30  ;;  %s410_s22 = scalar_lea.vmem %s1619_s6, %s1633_s16 }
  0x27   : > { %v447_v13 = vmax.f32 %v445_v11, 0.0  ;;  %v448_v14 = vmax.f32 %v446_v12, 0.0  ;;  %1318 = vmatprep.subr.bf16.mxu1 %v1435_v0  ;;  %v1403_v16 = vld [vmem:[%s1546_s12 + $0x20] sm:$0xff]   ;;  %v1404_v17 = vld [vmem:[%s1546_s12 + $0x18] sm:$0xff]   ;;  %v1405_v31 = vld [vmem:[%s1546_s12 + $0x8] sm:$0xff]   ;;  %v1048_v10 = vshrl.u32 %v1047_v9, 7 }
  0x28   : > { %1337 = vmatpush3.bf16.msra.mxu0 %v1403_v16  ;;  %p403_p13 = scmp.lt.s32.totalorder %s402_s13, 1  ;;  %v1245_v20 = vld [vmem:[%s410_s22] ss:$0 sm:$0xff]  ;;  %v1407_v40 = vld [vmem:[%s1546_s12 + $0x28] sm:$0xff]   ;;  %v1409_v44 = vld [vmem:[%s1546_s12 + $0x30] sm:$0xff]  }
  0x29   : > { %v449_v15 = vpack.c.bf16 %v448_v14, %v447_v13  ;;  %1342 = vmatprep.subr.bf16.mxu0 %v1435_v0  ;;  %v1406_v32 = vld [vmem:[%s1546_s12] sm:$0xff]   ;;  %v1408_v48 = vld [vmem:[%s1546_s12 + $0x10] sm:$0xff]   ;;  %v1411_v51 = vld [vmem:[%s1546_s12 + $0x38] sm:$0xff]   ;;  %v1049_v13 = vadd.s32 8, %v1048_v10 }
  0x2a   : > { %s1631_s13 = smov (!%p403_p13, %s402_s13), 1  ;;  %v1410_v55 = vld [vmem:[%s1546_s12 + $0x40] sm:$0xff]  }
  0x2b   : > { %1315 = vmatmul.mubr.msk.bf16.vlgmr.msra.gmra.mrb[0].mxu1 %vm466_vm1, %v449_v15  ;;  %s405_s19 = scalar_lea.vmem %s1618_s5, %s1631_s13  ;;  %v1054_v15 = vand.u32 3, %v1048_v10  ;;  %v1061_v16 = vand.u32 3, %v1049_v13 }
  0x2c   : > { %1320 = vmatprep.mubr.msk.bf16.mxu1 %vm1436_vm0, %v1435_v0  ;;  %1319 = vmatpush3.bf16.msra.mxu1 %v1404_v17  ;;  %v1244_v18 = vld [vmem:[%s405_s19] ss:$0 sm:$0xff] }
  0x2d   : > { %1324 = vmatprep.subr.bf16.mxu1 %v1435_v0  ;;  %vm1074_vm4 = vcmp.ne.s32.totalorder %v1054_v15, 0  ;;  %vm1075_vm5 = vcmp.ne.s32.totalorder %v1061_v16, 0  ;;  %vm1084_vm6 = vcmp.ne.s32.totalorder %v1054_v15, 3  ;;  %vm1085_vm7 = vcmp.ne.s32.totalorder %v1061_v16, 3 }
  0xfe   : > { %v504_v19 = vpop.f32.mrb[0].mxu1 }
  0xff   : > { %v518_v21 = vmul.f32 %v1244_v18, %v504_v19  ;;  %v1316_v22 = vpop.f32.mrb[1].mxu1 }
 0x100   : > { %v507_v23 = vpop.f32.mrb[2].mxu1 }
 0x101   : > { %v527_v24 = vadd.f32 %v1245_v20, %v518_v21  ;;  %v519_v25 = vmul.f32 %v1244_v18, %v507_v23  ;;  %v1317_v26 = vpop.f32.mrb[3].mxu1 }
 0x103   : > { %v529_v27 = vmax.f32 %v527_v24, 0.0  ;;  %v528_v28 = vadd.f32 %v1245_v20, %v519_v25 }
 0x105   : > { %536 = vst.msk [vmem:[#allocation2 + $0x5] sm:$0xff] %vm531_vm2, %v529_v27  ;;  %v530_v29 = vmax.f32 %v528_v28, 0.0 }
 0x107   : > { %537 = vst.msk [vmem:[#allocation2 + $0xd] sm:$0xff] %vm531_vm2, %v530_v29 }
 0x10c   : > { %v543_v30 = vld [vmem:[#allocation2 + $0x4] sm:$0xff] }
 0x10d   : > { %v713_v34 = vld [vmem:[#allocation2 + $0x5] sm:$0xff] }
 0x10e   : > { %v544_v33 = vld [vmem:[#allocation2 + $0xc] sm:$0xff]  ;;  %v707_v39 = vld [vmem:[#allocation2 + $0x1] sm:$0xff] }
 0x10f   : > { %v714_v35 = vld [vmem:[#allocation2 + $0xd] sm:$0xff]  ;;  %v545_v36 = vpack.c.bf16 %v544_v33, %v543_v30  ;;  %v538_v43 = vld [vmem:[#allocation2] sm:$0xff] }
 0x110   : > { %v715_v37 = vpack.c.bf16 %v714_v35, %v713_v34  ;;  %v708_v38 = vld [vmem:[#allocation2 + $0x9] sm:$0xff]  ;;  %v820_v57 = vld [vmem:[#allocation2 + $0x11] sm:$0xff] }
 0x111   : > { %1321 = vmatmul.mubr.msk.bf16.vlgmr.msra.gmra.mrb[4].mxu1 %vm531_vm2, %v545_v36  ;;  %v709_v41 = vpack.c.bf16 %v708_v38, %v707_v39  ;;  %v539_v42 = vld [vmem:[#allocation2 + $0x8] sm:$0xff]  ;;  %v650_v50 = vld [vmem:[#allocation2 + $0x10] sm:$0xff]  ;;  %v821_v58 = vpack.c.bf16 %v820_v57, %v708_v38 }
 0x112   : > { %1339 = vmatmul.mubr.msk.bf16.vlgmr.msra.gmra.mrb[0].mxu0 %vm531_vm2, %v715_v37  ;;  %1325 = vmatpush3.bf16.msra.mxu1 %v1406_v32  ;;  %v540_v45 = vpack.c.bf16 %v539_v42, %v538_v43  ;;  %v883_v46 = vld [vmem:[#allocation2 + $0x6] sm:$0xff]  ;;  %v884_v47 = vld [vmem:[#allocation2 + $0xe] sm:$0xff]  ;;  %v651_v52 = vpack.c.bf16 %v650_v50, %v539_v42 }
 0x113   : > { %1343 = vmatpush3.bf16.msra.mxu0 %v1405_v31  ;;  %1344 = vmatprep.mubr.msk.bf16.mxu0 %vm1436_vm0, %v1435_v0  ;;  %v885_v49 = vpack.c.bf16 %v884_v47, %v883_v46  ;;  %v878_v53 = vld [vmem:[#allocation2 + $0xa] sm:$0xff]  ;;  %v877_v54 = vld [vmem:[#allocation2 + $0x2] sm:$0xff]  ;;  %v990_v59 = vld [vmem:[#allocation2 + $0x12] sm:$0xff] }
 0x114   : > { %1354 = vmatprep.subr.bf16.mxu0 %v1435_v0  ;;  %1326 = vmatprep.mubr.msk.bf16.mxu1 %vm1436_vm0, %v1435_v0  ;;  %v879_v56 = vpack.c.bf16 %v878_v53, %v877_v54  ;;  %v991_v60 = vpack.c.bf16 %v990_v59, %v878_v53 }
 0x115   : > { %1330 = vmatprep.subr.bf16.mxu1 %v1435_v0 }
 0x11a   : > { %1345 = vmatmul.mubr.msk.bf16.vlgmr.msra.gmra.mrb[4].mxu0 %vm531_vm2, %v709_v41 }
 0x11b   : > { %1355 = vmatpush3.bf16.msra.mxu0 %v1407_v40  ;;  %1356 = vmatprep.mubr.msk.bf16.mxu0 %vm1436_vm0, %v1435_v0 }
 0x11c   : > { %1360 = vmatprep.subr.bf16.mxu0 %v1435_v0 }
 0x11d   : > { %1327 = vmatmul.mubr.msk.bf16.vlgmr.msra.gmra.mrb[4].mxu1 %vm531_vm2, %v540_v45 }
 0x11e   : > { %1331 = vmatpush3.bf16.msra.mxu1 %v1409_v44  ;;  %1332 = vmatprep.mubr.msk.bf16.mxu1 %vm1436_vm0, %v1435_v0 }
 0x11f   : > { %1348 = vmatprep.subr.bf16.mxu1 %v1435_v0 }
 0x122   : > { %1357 = vmatmul.mubr.msk.bf16.vlgmr.msra.gmra.mrb[8].mxu0 %vm531_vm2, %v885_v49 }
 0x123   : > { %1361 = vmatpush3.bf16.msra.mxu0 %v1408_v48  ;;  %1362 = vmatprep.mubr.msk.bf16.mxu0 %vm1436_vm0, %v1435_v0 }
 0x124   : > { %1366 = vmatprep.subr.bf16.mxu0 %v1435_v0 }
 0x129   : > { %1333 = vmatmul.mubr.msk.bf16.vlgmr.msra.gmra.mrb[4].mxu1 %vm531_vm2, %v651_v52 }
 0x12a   : > { %1349 = vmatpush3.bf16.msra.mxu1 %v1411_v51  ;;  %1350 = vmatprep.mubr.msk.bf16.mxu1 %vm1436_vm0, %v1435_v0 }
 0x12e   : > { %1363 = vmatmul.mubr.msk.bf16.vlgmr.msra.gmra.mrb[8].mxu0 %vm531_vm2, %v879_v56 }
 0x12f   : > { %1367 = vmatpush3.bf16.msra.mxu0 %v1410_v55  ;;  %1368 = vmatprep.mubr.msk.bf16.mxu0 %vm1436_vm0, %v1435_v0 }
 0x131   : > { %1351 = vmatmul.mubr.msk.bf16.vlgmr.msra.gmra.mrb[8].mxu1 %vm531_vm2, %v821_v58 }
 0x13a   : > { %1369 = vmatmul.mubr.msk.bf16.vlgmr.msra.gmra.mrb[8].mxu0 %vm531_vm2, %v991_v60 }
 0x1e5   : > { %v762_v61 = vpop.f32.mrb[0].mxu0 }
 0x1e6   : > { %v1340_v62 = vpop.f32.mrb[1].mxu0 }
 0x1e7   : > { %v765_v63 = vpop.f32.mrb[2].mxu0 }
 0x1e8   : > { %v1341_v0 = vpop.f32.mrb[3].mxu0 }
 0x1ed   : > { %v812_v3 = vpop.f32.mrb[4].mxu0 }
 0x1ee   : > { %v813_v4 = vadd.f32 %v812_v3, %v762_v61  ;;  %v1346_v5 = vpop.f32.mrb[5].mxu0 }
 0x1ef   : > { %v815_v6 = vpop.f32.mrb[6].mxu0 }
 0x1f0   : > { %v816_v7 = vadd.f32 %v815_v6, %v765_v63  ;;  %v1347_v8 = vpop.f32.mrb[7].mxu0 }
 0x1fc   : > { %v698_v11 = vpop.f32.mrb[4].mxu1 }
 0x1fd   : > { %v1334_v12 = vpop.f32.mrb[5].mxu1  ;;  %v1080_v19 = vsel %vm1074_vm4, %v698_v11, 0.0 }
 0x1fe   : > { %v701_v14 = vpop.f32.mrb[6].mxu1 }
 0x1ff   : > { %v1335_v1 = vpop.f32.mrb[7].mxu1  ;;  %v1081_v24 = vsel %vm1075_vm5, %v701_v14, 0.0 }
 0x204   : > { %v868_v2 = vpop.f32.mrb[8].mxu1 }
 0x205   : > { %v875_v17 = vadd.f32 %v868_v2, %v813_v4  ;;  %v1352_v18 = vpop.f32.mrb[9].mxu1 }
 0x206   : > { %v871_v20 = vpop.f32.mrb[10].mxu1 }
 0x207   : > { %v1082_v21 = vadd.f32 %v1080_v19, %v875_v17  ;;  %v876_v22 = vadd.f32 %v871_v20, %v816_v7  ;;  %v1353_v23 = vpop.f32.mrb[11].mxu1 }
 0x209   : > { %v1083_v25 = vadd.f32 %v1081_v24, %v876_v22 }
 0x20d   : > { %v1038_v26 = vpop.f32.mrb[8].mxu0 }
 0x20e   : > { %v1090_v27 = vsel %vm1084_vm6, %v1038_v26, 0.0  ;;  %v1370_v28 = vpop.f32.mrb[9].mxu0 }
 0x20f   : > { %v1092_v29 = vadd.f32 %v1090_v27, %v1082_v21  ;;  %v1041_v30 = vpop.f32.mrb[10].mxu0 }
 0x210   : > { %v1091_v31 = vsel %vm1085_vm7, %v1041_v30, 0.0  ;;  %v1371_v32 = vpop.f32.mrb[11].mxu0 }
 0x211   : > { %v1093_v33 = vadd.f32 %v1091_v31, %v1083_v25  ;;  %v1287_v34 = vpack.c.bf16 %v1092_v29, %v1092_v29 }
 0x213   : > { %1103 = vrot.lane.b32.xlu0 %v1287_v34, %s1437_s14  ;;  %v1288_v35 = vpack.c.bf16 %v1093_v33, %v1093_v33 }
 0x217   : > { %1105 = vrot.lane.b32.xlu0 %v1288_v35, %s1437_s14 }
 0x285   : > { %v1104_v36 = vpop.permute.xlu0 %1103 }
 0x286   : > { %1110 = vst.msk [vmem:[%s1602_s24] sm:$0xf] %vm1109_vm8, %v1104_v36 }
 0x289   : > { %v1106_v37 = vpop.permute.xlu0 %1105 }
 0x28a   : > { %1111 = vst.msk [vmem:[%s1602_s24 + $0x4] sm:$0xf] %vm1109_vm8, %v1106_v37 }
 0x28b PF: > { %s24_s10 = sadd.s32 1, %s1432_s10  }
 0x28c   : > { %p21_p1 = scmp.ge.s32.totalorder %s24_s10, 4  }
 0x28e   :  { %23 = sbr.rel (!%p21_p1) target bundleno = 16 (0x10), region = 104 }

// kernel: st_densenet_forward.12
= control target key start
LH: loop header
LB: loop body
LE: loop exit
PB: predicated region body
PF: predicated region fallthrough
CT: control target
= control target key end

     0   :  { %s1521_s0 = inlined_call_operand.vmem [shape: s32[2], index: 0, kind: input, shape index: {}]   ;;  %s1522_s1 = inlined_call_operand.vmem [shape: bf16[2,4,32], index: 1, kind: input, shape index: {}]   ;;  %s1523_s2 = inlined_call_operand.vmem [shape: f32[2,1,32], index: 2, kind: input, shape index: {}]   ;;  %s1524_s3 = inlined_call_operand.vmem [shape: f32[2,1,32], index: 3, kind: input, shape index: {}]   ;;  %s1525_s4 = inlined_call_operand.vmem [shape: bf16[2,32,16], index: 4, kind: input, shape index: {}]   ;;  %s1526_s5 = inlined_call_operand.vmem [shape: f32[2,1,16], index: 5, kind: input, shape index: {}]   ;;  %s1527_s6 = inlined_call_operand.vmem [shape: f32[2,1,16], index: 6, kind: input, shape index: {}]   ;;  %s1528_s7 = inlined_call_operand.vmem [shape: bf16[2,9,16,8], index: 7, kind: input, shape index: {}]   ;;  %s1529_s8 = inlined_call_operand.vmem [shape: bf16[2,4,32], index: 8, kind: output, shape index: {}]  }
   0x1   :  { %s13_s29 = sshll.u32 %s1521_s0, 4  ;;  %s14_s29 = int_to_ptr.vmem [resolvable:$true] %s13_s29 }
   0x2   :  { %s1331_s30 = scalar_lea.vmem %s14_s29, 16  ;;  %p1336_p1 = scmp.lt.s32.totalorder %s14_s29, %s14_s29 }
   0x3   :  { %p1332_p0 = scmp.ne.s32.totalorder %s14_s29, %s1331_s30  ;;  %p1337_p2 = scmp.lt.s32.totalorder %s1331_s30, %s1331_s30 }
   0x5   :  { %p1338_p3 = por %p1337_p2, %p1336_p1 }
   0x7   :  { %p1339_p4 = pnand %p1338_p3, %p1332_p0 }
   0x9   :  { %1342 = shalt.err (!%p1339_p4)  }
   0xa   :  { %s1353_s9 = smov [#allocation4]  }
   0xb   :  { %16 = dma.vmem_to_smem %s14_s29, 16, %s1353_s9, [#allocation3] }
   0xc   :  { %1347 = dma.done.wait [#allocation3], 16 }
   0xd   :  { %1348 = vsyncadd [#allocation3], 4294967280 }
   0xe   :  { %18 = sfence }
   0xf   :  { %s1406_s10 = smov 0  }
  0x10 LB: > { %s1412_s0 = sadd.s32 4294967295, %s1351_s10   ;;  %p1157_p5 = scmp.ge.s32.totalorder %s1351_s10, 1  ;;  %s1351_s10 = sphi %s1406_s10, %s24_s10  }
  0x11   : > { %p319_p6 = scmp.lt.s32.totalorder %s1351_s10, 3 }
  0x13   : > { %p320_p7 = pnand %p1157_p5, %p319_p6 }
  0x14   : > { %s391_s11 = sld [smem:[#allocation4 + %s1412_s0]] (!%p320_p7)  ;;  %p377_p8 = scmp.lt.s32.totalorder (!%p320_p7), %s1412_s0, 1  ;;  %v1354_v0 = vmov (!%p320_p7), 0.0   ;;  %vm1355_vm0 = vmmov (!%p320_p7), 0   ;;  %vm456_vm1 = vcmask (!%p320_p7), 261120   ;;  %vm517_vm2 = vcmask (!%p320_p7), 130048  }
  0x15   : > { %323 = sbr.rel (%p320_p7) target bundleno = 647 (0x287), region = 48  ;;  %1228 = vmatprep.subr.bf16.mxu1 (!%p320_p7), %v1354_v0  ;;  %1232 = vmatprep.mubr.msk.bf16.mxu1 (!%p320_p7), %vm1355_vm0, %v1354_v0  ;;  %s381_s12 = sld [smem:[#allocation4 + %s1412_s0]] (!%p320_p7)  ;;  %518 = vst.msk [vmem:[#allocation2] sm:$0xff] (!%p320_p7), %vm517_vm2, %v1354_v0  ;;  %519 = vst.msk [vmem:[#allocation2 + $0x8] sm:$0xff] (!%p320_p7), %vm517_vm2, %v1354_v0  ;;  %vm520_vm3 = vcmask (!%p320_p7), 125952   ;;  %vm1024_vm4 = vcmask (!%p320_p7), 254976   ;;  %v1000_v52 = vlaneseq (!%p320_p7) }
  0x16   : > { %s386_s13 = sld [smem:[#allocation4 + %s1412_s0]] (!%p320_p7)  ;;  %1254 = vmatprep.subr.bf16.mxu0 (!%p320_p7), %v1354_v0  ;;  %1256 = vmatprep.mubr.msk.bf16.mxu0 (!%p320_p7), %vm1355_vm0, %v1354_v0  ;;  %vm1038_vm7 = vcmask (!%p320_p7), 189568  }
  0x17   : > { %s408_s29 = sld [smem:[#allocation4 + %s1412_s0]] (!%p320_p7)  ;;  %v1001_v53 = vshrl.u32 (!%p320_p7), %v1000_v52, 7 }
  0x18   : > { %s403_s16 = sld [smem:[#allocation4 + %s1412_s0]] (!%p320_p7) }
  0x19   : > { %v1006_v57 = vand.u32 (!%p320_p7), 1, %v1001_v53 }
  0x1a   : > { %p392_p9 = scmp.lt.s32.totalorder (!%p320_p7), %s391_s11, 1 }
  0x1b   : > { %p382_p10 = scmp.lt.s32.totalorder (!%p320_p7), %s381_s12, 1  ;;  %vm1014_vm5 = vcmp.ne.s32.totalorder (!%p320_p7), %v1006_v57, 0  ;;  %vm1019_vm6 = vcmp.ne.s32.totalorder (!%p320_p7), %v1006_v57, 1 }
  0x1c   : > { %s1424_s14 = scalar_select %p377_p8, %s1412_s0, 1 }
  0x1d   : > { %p387_p11 = scmp.lt.s32.totalorder %s386_s13, 1  ;;  %s1531_s11 = smov (!%p392_p9, %s391_s11), 1 }
  0x1e   : > { %s1158_s15 = sshll.u32 %s1424_s14, 1  ;;  %s1533_s12 = smov (!%p382_p10, %s381_s12), 1 }
  0x1f   : > { %s380_s18 = scalar_lea.vmem %s1522_s1, %s1158_s15  ;;  %s1206_s19 = sshll.u32 %s1531_s11, 4 }
  0x20   : > { %v1435_v1 = vld [vmem:[%s380_s18] sm:$0x3]  ;;  %s396_s22 = scalar_lea.vmem %s1525_s4, %s1206_s19  ;;  %s384_s25 = scalar_lea.vmem %s1523_s2, %s1533_s12 }
  0x21   : > { %v421_v2 = vunpack.c.l.bf16 %v1435_v1  ;;  %v1320_v3 = vld [vmem:[%s396_s22] sm:$0xff]   ;;  %s1535_s13 = smov (!%p387_p11, %s386_s13), 1  ;;  %v1321_v4 = vld [vmem:[%s396_s22 + $0x8] sm:$0xff]   ;;  %p409_p12 = scmp.lt.s32.totalorder %s408_s29, 1 }
  0x22   : > { %1229 = vmatpush3.bf16.msra.mxu1 %v1320_v3  ;;  %s389_s28 = scalar_lea.vmem %s1524_s3, %s1535_s13  ;;  %v1163_v5 = vld [vmem:[%s384_s25] ss:$0 sm:$0xff]  ;;  %s398_s13 = sld [smem:[#allocation4 + %s1412_s0]] }
  0x23   : > { %1230 = vmatprep.subr.bf16.mxu1 %v1354_v0  ;;  %v429_v6 = vmul.f32 %v1163_v5, %v421_v2  ;;  %v1164_v7 = vld [vmem:[%s389_s28] ss:$0 sm:$0xff]  ;;  %s1537_s29 = smov (!%p409_p12, %s408_s29), 1  ;;  %p404_p0 = scmp.lt.s32.totalorder %s403_s16, 1 }
  0x24   : > { %s1306_s30 = smul.u32 72, %s1537_s29  ;;  %s1513_s24 = scalar_lea.vmem %s1529_s8, %s1158_s15 }
  0x25   : > { %v437_v8 = vadd.f32 %v1164_v7, %v429_v6  ;;  %s1541_s16 = smov (!%p404_p0, %s403_s16), 1  ;;  %1025 = vst.msk [vmem:[%s1513_s24] sm:$0x3] %vm1024_vm4, %v1435_v1  ;;  %s1357_s14 = smov 16  }
  0x26   : > { %1231 = vmatpush3.bf16.msra.mxu1 %v1321_v4  ;;  %s1459_s12 = scalar_lea.vmem %s1528_s7, %s1306_s30  ;;  %s406_s22 = scalar_lea.vmem %s1527_s6, %s1541_s16 }
  0x27   : > { %v438_v9 = vmax.f32 %v437_v8, 0.0  ;;  %1236 = vmatprep.subr.bf16.mxu1 %v1354_v0  ;;  %v1322_v11 = vld [vmem:[%s1459_s12 + $0x20] sm:$0xff]   ;;  %v1323_v12 = vld [vmem:[%s1459_s12 + $0x18] sm:$0xff]   ;;  %v1324_v22 = vld [vmem:[%s1459_s12 + $0x8] sm:$0xff]  }
  0x28   : > { %1255 = vmatpush3.bf16.msra.mxu0 %v1322_v11  ;;  %p399_p13 = scmp.lt.s32.totalorder %s398_s13, 1  ;;  %v1169_v15 = vld [vmem:[%s406_s22] ss:$0 sm:$0xff]  ;;  %v1326_v29 = vld [vmem:[%s1459_s12 + $0x28] sm:$0xff]   ;;  %v1328_v32 = vld [vmem:[%s1459_s12 + $0x30] sm:$0xff]  }
  0x29   : > { %v439_v10 = vpack.c.bf16 %v438_v9, %v438_v9  ;;  %1260 = vmatprep.subr.bf16.mxu0 %v1354_v0  ;;  %v1325_v25 = vld [vmem:[%s1459_s12] sm:$0xff]   ;;  %v1327_v35 = vld [vmem:[%s1459_s12 + $0x10] sm:$0xff]   ;;  %v1330_v37 = vld [vmem:[%s1459_s12 + $0x38] sm:$0xff]  }
  0x2a   : > { %s1539_s13 = smov (!%p399_p13, %s398_s13), 1  ;;  %v1329_v38 = vld [vmem:[%s1459_s12 + $0x40] sm:$0xff]  }
  0x2b   : > { %1233 = vmatmul.mubr.msk.bf16.vlgmr.msra.gmra.mrb[0].mxu1 %vm456_vm1, %v439_v10  ;;  %s401_s19 = scalar_lea.vmem %s1526_s5, %s1539_s13 }
  0x2c   : > { %1238 = vmatprep.mubr.msk.bf16.mxu1 %vm1355_vm0, %v1354_v0  ;;  %1237 = vmatpush3.bf16.msra.mxu1 %v1323_v12  ;;  %v1168_v13 = vld [vmem:[%s401_s19] ss:$0 sm:$0xff] }
  0x2d   : > { %1242 = vmatprep.subr.bf16.mxu1 %v1354_v0 }
  0xfe   : > { %v494_v14 = vpop.f32.mrb[0].mxu1 }
  0xff   : > { %v507_v16 = vmul.f32 %v1168_v13, %v494_v14  ;;  %v1234_v17 = vpop.f32.mrb[1].mxu1 }
 0x100   : > { %v497_v18 = vpop.f32.mrb[2].mxu1 }
 0x101   : > { %v515_v19 = vadd.f32 %v1169_v15, %v507_v16  ;;  %v1235_v20 = vpop.f32.mrb[3].mxu1 }
 0x103   : > { %v516_v21 = vmax.f32 %v515_v19, 0.0 }
 0x105   : > { %521 = vst.msk [vmem:[#allocation2 + $0x3] sm:$0xf] %vm520_vm3, %v516_v21 }
 0x10c   : > { %v526_v23 = vld [vmem:[#allocation2 + $0x2] sm:$0xf]  ;;  %v945_v41 = vld [vmem:[#allocation2 + $0x6] sm:$0xf] }
 0x10d   : > { %v689_v24 = vld [vmem:[#allocation2 + $0x3] sm:$0xf]  ;;  %v527_v26 = vpack.c.bf16 %v526_v23, %v526_v23  ;;  %v946_v42 = vpack.c.bf16 %v945_v41, %v945_v41 }
 0x10e   : > { %v690_v27 = vpack.c.bf16 %v689_v24, %v689_v24  ;;  %v684_v28 = vld [vmem:[#allocation2 + $0x1] sm:$0xf]  ;;  %v792_v39 = vld [vmem:[#allocation2 + $0x5] sm:$0xf] }
 0x10f   : > { %1239 = vmatmul.mubr.msk.bf16.vlgmr.msra.gmra.mrb[4].mxu1 %vm517_vm2, %v527_v26  ;;  %v685_v30 = vpack.c.bf16 %v684_v28, %v684_v28  ;;  %v522_v31 = vld [vmem:[#allocation2] sm:$0xf]  ;;  %v629_v34 = vld [vmem:[#allocation2 + $0x4] sm:$0xf]  ;;  %v793_v40 = vpack.c.bf16 %v792_v39, %v792_v39 }
 0x110   : > { %1257 = vmatmul.mubr.msk.bf16.vlgmr.msra.gmra.mrb[0].mxu0 %vm517_vm2, %v690_v27  ;;  %1243 = vmatpush3.bf16.msra.mxu1 %v1325_v25  ;;  %v523_v33 = vpack.c.bf16 %v522_v31, %v522_v31  ;;  %v630_v36 = vpack.c.bf16 %v629_v34, %v629_v34 }
 0x111   : > { %1261 = vmatpush3.bf16.msra.mxu0 %v1324_v22  ;;  %1262 = vmatprep.mubr.msk.bf16.mxu0 %vm1355_vm0, %v1354_v0 }
 0x112   : > { %1272 = vmatprep.subr.bf16.mxu0 %v1354_v0  ;;  %1244 = vmatprep.mubr.msk.bf16.mxu1 %vm1355_vm0, %v1354_v0 }
 0x113   : > { %1248 = vmatprep.subr.bf16.mxu1 %v1354_v0 }
 0x118   : > { %1263 = vmatmul.mubr.msk.bf16.vlgmr.msra.gmra.mrb[4].mxu0 %vm517_vm2, %v685_v30 }
 0x119   : > { %1273 = vmatpush3.bf16.msra.mxu0 %v1326_v29  ;;  %1274 = vmatprep.mubr.msk.bf16.mxu0 %vm1355_vm0, %v1354_v0 }
 0x11a   : > { %1278 = vmatprep.subr.bf16.mxu0 %v1354_v0 }
 0x11b   : > { %1245 = vmatmul.mubr.msk.bf16.vlgmr.msra.gmra.mrb[4].mxu1 %vm517_vm2, %v523_v33 }
 0x11c   : > { %1249 = vmatpush3.bf16.msra.mxu1 %v1328_v32  ;;  %1250 = vmatprep.mubr.msk.bf16.mxu1 %vm1355_vm0, %v1354_v0 }
 0x11d   : > { %1266 = vmatprep.subr.bf16.mxu1 %v1354_v0 }
 0x120   : > { %1275 = vmatmul.mubr.msk.bf16.vlgmr.msra.gmra.mrb[8].mxu0 %vm517_vm2, %v630_v36 }
 0x121   : > { %1279 = vmatpush3.bf16.msra.mxu0 %v1327_v35  ;;  %1280 = vmatprep.mubr.msk.bf16.mxu0 %vm1355_vm0, %v1354_v0 }
 0x122   : > { %1284 = vmatprep.subr.bf16.mxu0 %v1354_v0 }
 0x127   : > { %1251 = vmatmul.mubr.msk.bf16.vlgmr.msra.gmra.mrb[4].mxu1 %vm517_vm2, %v630_v36 }
 0x128   : > { %1267 = vmatpush3.bf16.msra.mxu1 %v1330_v37  ;;  %1268 = vmatprep.mubr.msk.bf16.mxu1 %vm1355_vm0, %v1354_v0 }
 0x12c   : > { %1281 = vmatmul.mubr.msk.bf16.vlgmr.msra.gmra.mrb[8].mxu0 %vm517_vm2, %v527_v26 }
 0x12d   : > { %1285 = vmatpush3.bf16.msra.mxu0 %v1329_v38  ;;  %1286 = vmatprep.mubr.msk.bf16.mxu0 %vm1355_vm0, %v1354_v0  ;;  %v1356_v0 = vmov 1983009808  }
 0x12e   : > { %v1029_v1 = vunpack.c.l.s4 %v1356_v0 }
 0x12f   : > { %1269 = vmatmul.mubr.msk.bf16.vlgmr.msra.gmra.mrb[8].mxu1 %vm517_vm2, %v793_v40 }
 0x130   : > { %v1030_v4 = vunpack.c.0.s8 %v1029_v1 }
 0x132   : > { %v1033_v10 = vsub.s32 %v1030_v4, %v1001_v53 }
 0x138   : > { %1287 = vmatmul.mubr.msk.bf16.vlgmr.msra.gmra.mrb[8].mxu0 %vm517_vm2, %v946_v42 }
 0x1e3   : > { %v737_v43 = vpop.f32.mrb[0].mxu0 }
 0x1e4   : > { %v1258_v44 = vpop.f32.mrb[1].mxu0 }
 0x1e5   : > { %v740_v45 = vpop.f32.mrb[2].mxu0 }
 0x1e6   : > { %v1259_v46 = vpop.f32.mrb[3].mxu0 }
 0x1eb   : > { %v786_v47 = vpop.f32.mrb[4].mxu0 }
 0x1ec   : > { %v787_v48 = vadd.f32 %v786_v47, %v737_v43  ;;  %v1264_v49 = vpop.f32.mrb[5].mxu0 }
 0x1ed   : > { %v789_v50 = vpop.f32.mrb[6].mxu0 }
 0x1ee   : > { %v1265_v51 = vpop.f32.mrb[7].mxu0 }
 0x1fa   : > { %v677_v54 = vpop.f32.mrb[4].mxu1 }
 0x1fb   : > { %v1252_v55 = vpop.f32.mrb[5].mxu1  ;;  %v1017_v62 = vsel %vm1014_vm5, %v677_v54, 0.0 }
 0x1fc   : > { %v680_v56 = vpop.f32.mrb[6].mxu1 }
 0x1fd   : > { %v1253_v58 = vpop.f32.mrb[7].mxu1 }
 0x202   : > { %v840_v59 = vpop.f32.mrb[8].mxu1 }
 0x203   : > { %v846_v60 = vadd.f32 %v840_v59, %v787_v48  ;;  %v1270_v61 = vpop.f32.mrb[9].mxu1 }
 0x204   : > { %v843_v63 = vpop.f32.mrb[10].mxu1 }
 0x205   : > { %v1018_v2 = vadd.f32 %v1017_v62, %v846_v60  ;;  %v1271_v3 = vpop.f32.mrb[11].mxu1 }
 0x20b   : > { %v993_v5 = vpop.f32.mrb[8].mxu0 }
 0x20c   : > { %v1022_v6 = vsel %vm1019_vm6, %v993_v5, 0.0  ;;  %v1288_v7 = vpop.f32.mrb[9].mxu0 }
 0x20d   : > { %v1023_v8 = vadd.f32 %v1022_v6, %v1018_v2  ;;  %v996_v9 = vpop.f32.mrb[10].mxu0 }
 0x20e   : > { %v1289_v11 = vpop.f32.mrb[11].mxu0 }
 0x20f   : > { %v1026_v12 = vpack.c.bf16 %v1023_v8, %v1023_v8 }
 0x211   : > { %v1034_v13 = vrot.slane %v1026_v12, %v1033_v10 }
 0x213   : > { %1035 = vrot.lane.b32.xlu0 %v1034_v13, %s1357_s14 }
 0x285   : > { %v1036_v14 = vpop.permute.xlu0 %1035 }
 0x286   : > { %1039 = vst.msk [vmem:[%s1513_s24] sm:$0x3] %vm1038_vm7, %v1036_v14 }
 0x287 PF: > { %s24_s10 = sadd.s32 1, %s1351_s10  }
 0x288   : > { %p21_p1 = scmp.ge.s32.totalorder %s24_s10, 4  }
 0x28a   :  { %23 = sbr.rel (!%p21_p1) target bundleno = 16 (0x10), region = 104 }

// kernel: st_densenet_forward.14
= control target key start
LH: loop header
LB: loop body
LE: loop exit
PB: predicated region body
PF: predicated region fallthrough
CT: control target
= control target key end

     0   :  { %s288_s12 = smov 0   ;;  %s311_s0 = inlined_call_operand.vmem [shape: bf16[2,4,32], index: 0, kind: input, shape index: {}]   ;;  %s312_s1 = inlined_call_operand.vmem [shape: f32[1,1,32], index: 1, kind: input, shape index: {}]   ;;  %s313_s2 = inlined_call_operand.vmem [shape: f32[1,1,32], index: 2, kind: input, shape index: {}]   ;;  %s314_s3 = inlined_call_operand.vmem [shape: f32[2,1,32], index: 3, kind: output, shape index: {}]  }
   0x1 LB: > { %s242_s13 = sadd.s32 4294967295, %s266_s12   ;;  %p246_p0 = scmp.ge.s32.totalorder %s266_s12, 1  ;;  %s266_s12 = sphi %s288_s12, %s13_s12  }
   0x2   : > { %p136_p1 = scmp.lt.s32.totalorder %s266_s12, 3 }
   0x4   : > { %p137_p2 = pnand %p246_p0, %p136_p1 }
   0x5   : > { %p157_p3 = scmp.lt.s32.totalorder (!%p137_p2), %s242_s13, 1  ;;  %v248_v1 = vld [vmem:[%s312_s1] ss:$0 sm:$0xff] (!%p137_p2)  ;;  %vm183_vm0 = vcmask (!%p137_p2), 257024   ;;  %vm193_vm1 = vcmask (!%p137_p2), 253952  }
   0x6   : > { %140 = sbr.rel (%p137_p2) target bundleno = 41 (0x29), region = 32  ;;  %v249_v3 = vld [vmem:[%s313_s2] ss:$0 sm:$0xff] (!%p137_p2) }
   0xd   : > { %s316_s13 = smov (!%p157_p3, %s242_s13), 1 }
   0xe   : > { %s247_s14 = sshll.u32 %s316_s13, 1  ;;  %s163_s24 = scalar_lea.vmem %s314_s3, %s316_s13 }
   0xf   : > { %s160_s17 = scalar_lea.vmem %s311_s0, %s247_s14 }
  0x10   : > { %v164_v0 = vld [vmem:[%s160_s17] sm:$0x3] }
  0x11   : > { %v165_v2 = vunpack.c.l.bf16 %v164_v0 }
  0x13   : > { %v173_v4 = vmul.f32 %v248_v1, %v165_v2 }
  0x15   : > { %v181_v5 = vadd.f32 %v249_v3, %v173_v4 }
  0x17   : > { %v182_v6 = vmax.f32 %v181_v5, 0.0 }
  0x19   : > { %v184_v7 = vsel %vm183_vm0, %v182_v6, 0.0 }
  0x1a   : > { %v185_v8 = vrot.slane %v184_v7, 4 }
  0x1c   : > { %v186_v9 = vadd.f32 %v185_v8, %v184_v7 }
  0x1e   : > { %v187_v10 = vrot.slane %v186_v9, 2 }
  0x20   : > { %v188_v11 = vadd.f32 %v187_v10, %v186_v9 }
  0x22   : > { %v189_v12 = vrot.slane %v188_v11, 1 }
  0x24   : > { %v190_v13 = vadd.f32 %v189_v12, %v188_v11 }
  0x26   : > { %v192_v14 = vmul.f32 0.25, %v190_v13 }
  0x28   : > { %194 = vst.msk [vmem:[%s163_s24] sm:$0x1] %vm193_vm1, %v192_v14 }
  0x29 PF: > { %s13_s12 = sadd.s32 1, %s266_s12  }
  0x2a   : > { %p10_p4 = scmp.ge.s32.totalorder %s13_s12, 4  }
  0x2c   :  { %12 = sbr.rel (!%p10_p4) target bundleno = 1 (0x1), region = 62 }

// kernel: st_densenet_forward.15
= control target key start
LH: loop header
LB: loop body
LE: loop exit
PB: predicated region body
PF: predicated region fallthrough
CT: control target
= control target key end

     0   :  { %v154_v1 = vmov 0.0   ;;  %vm155_vm0 = vmmov 0   ;;  %s201_s0 = inlined_call_operand.vmem [shape: bf16[2,32], index: 0, kind: input, shape index: {}]   ;;  %s202_s1 = inlined_call_operand.vmem [shape: bf16[32,28], index: 1, kind: input, shape index: {}]   ;;  %s203_s2 = inlined_call_operand.vmem [shape: f32[1,28], index: 2, kind: input, shape index: {}]   ;;  %s204_s3 = inlined_call_operand.hbm [shape: f32[2,28], index: 3, kind: output, shape index: {}]  }
   0x1   :  { %v124_v0 = vld [vmem:[%s202_s1] sm:$0xff]   ;;  %113 = vmatprep.subr.bf16.mxu0 %v154_v1  ;;  %v125_v2 = vld [vmem:[%s202_s1 + $0x8] sm:$0xff]   ;;  %117 = vmatprep.mubr.msk.bf16.mxu0 %vm155_vm0, %v154_v1 }
   0x2   :  { %114 = vmatpush3.bf16.msra.mxu0 %v124_v0 }
   0x3   :  { %115 = vmatprep.subr.bf16.mxu0 %v154_v1 }
   0x4   :  { %8 = vsyncpa [#allocation3], 0  ;;  %v16_v3 = vld [vmem:[%s201_s0] sm:$0x1]  ;;  %vm40_vm1 = vcmask 261120   ;;  %s156_s1 = smov [#allocation2]  }
   0x5   :  { %v106_v4 = vld [vmem:[%s203_s2] ss:$0 sm:$0xff]  ;;  %s98_s20 = sshll.u32 %s156_s1, 4  ;;  %vm90_vm2 = vcmask 222208   ;;  %s99_s20 = int_to_ptr.vmem [resolvable:$true] %s98_s20 }
   0x6   :  { %116 = vmatpush3.bf16.msra.mxu0 %v125_v2  ;;  %s130_s0 = scalar_lea.vmem %s99_s20, 32  ;;  %p135_p1 = scmp.lt.s32.totalorder %s99_s20, %s99_s20 }
   0x7   :  { %p131_p0 = scmp.ne.s32.totalorder %s99_s20, %s130_s0  ;;  %p136_p2 = scmp.lt.s32.totalorder %s130_s0, %s130_s0 }
   0x9   :  { %118 = vmatmul.mubr.msk.bf16.vlgmr.msra.gmra.mrb[0].mxu0 %vm40_vm1, %v16_v3  ;;  %p137_p3 = por %p136_p2, %p135_p1 }
   0xb   :  { %p138_p4 = pnand %p137_p3, %p131_p0 }
  0xdc   :  { %v78_v5 = vpop.f32.mrb[0].mxu0 }
  0xdd   :  { %v79_v6 = vadd.f32 %v106_v4, %v78_v5  ;;  %v119_v7 = vpop.f32.mrb[1].mxu0 }
  0xde   :  { %v81_v8 = vpop.f32.mrb[2].mxu0 }
  0xdf   :  { %v84_v9 = vsub.f32 0.0, %v79_v6  ;;  %v120_v10 = vpop.f32.mrb[3].mxu0 }
  0xe1   :  { %v85_v11 = vmul.f32 1.442695, %v84_v9 }
  0xe3   :  { %126 = vpow2.f32 %v85_v11 }
  0xed   :  { %v127_v12 = vpop.eup %126 }
  0xee   :  { %v87_v13 = vadd.f32 1.0, %v127_v12 }
  0xf0   :  { %128 = vrcp.f32 %v87_v13 }
  0xfa   :  { %v129_v14 = vpop.eup %128 }
  0xfb   :  { %91 = vst.msk [vmem:[#allocation2] sm:$0x3] %vm90_vm2, %v129_v14 }
  0xfc   :  { %141 = shalt.err (!%p138_p4)
}
  0xfd   :  { %s142_s22 = scalar_lea.hbm %s204_s3, 32 }
  0xfe   :  { %p143_p5 = scmp.ne.s32.totalorder %s204_s3, %s142_s22  ;;  %p146_p6 = scmp.lt.u32.totalorder %s142_s22, %s204_s3 }
 0x100   :  { %p148_p7 = pnand %p146_p6, %p143_p5 }
 0x102   :  { %151 = shalt.err (!%p148_p7)
}
 0x103   :  { %101 = dma.vmem_to_hbm [thread:$0]  %s99_s20, 32, %s204_s3, [#allocation3]  }
 0x104   :  { %152 = dma.done.wait [#allocation3], 32  }
 0x105   :  { %153 = vsyncadd [#allocation3], 4294967264 }
 0x106   :  { %105 = vsyncpa [#allocation3], 1 }

// kernel: st_densenet_forward.13
= control target key start
LH: loop header
LB: loop body
LE: loop exit
PB: predicated region body
PF: predicated region fallthrough
CT: control target
= control target key end

     0   :  { %s1521_s0 = inlined_call_operand.vmem [shape: s32[2], index: 0, kind: input, shape index: {}]   ;;  %s1522_s1 = inlined_call_operand.vmem [shape: bf16[2,4,32], index: 1, kind: input, shape index: {}]   ;;  %s1523_s2 = inlined_call_operand.vmem [shape: f32[2,1,32], index: 2, kind: input, shape index: {}]   ;;  %s1524_s3 = inlined_call_operand.vmem [shape: f32[2,1,32], index: 3, kind: input, shape index: {}]   ;;  %s1525_s4 = inlined_call_operand.vmem [shape: bf16[2,32,16], index: 4, kind: input, shape index: {}]   ;;  %s1526_s5 = inlined_call_operand.vmem [shape: f32[2,1,16], index: 5, kind: input, shape index: {}]   ;;  %s1527_s6 = inlined_call_operand.vmem [shape: f32[2,1,16], index: 6, kind: input, shape index: {}]   ;;  %s1528_s7 = inlined_call_operand.vmem [shape: bf16[2,9,16,8], index: 7, kind: input, shape index: {}]   ;;  %s1529_s8 = inlined_call_operand.vmem [shape: bf16[2,4,32], index: 8, kind: output, shape index: {}]  }
   0x1   :  { %s13_s29 = sshll.u32 %s1521_s0, 4  ;;  %s14_s29 = int_to_ptr.vmem [resolvable:$true] %s13_s29 }
   0x2   :  { %s1331_s30 = scalar_lea.vmem %s14_s29, 16  ;;  %p1336_p1 = scmp.lt.s32.totalorder %s14_s29, %s14_s29 }
   0x3   :  { %p1332_p0 = scmp.ne.s32.totalorder %s14_s29, %s1331_s30  ;;  %p1337_p2 = scmp.lt.s32.totalorder %s1331_s30, %s1331_s30 }
   0x5   :  { %p1338_p3 = por %p1337_p2, %p1336_p1 }
   0x7   :  { %p1339_p4 = pnand %p1338_p3, %p1332_p0 }
   0x9   :  { %1342 = shalt.err (!%p1339_p4)  }
   0xa   :  { %s1353_s9 = smov [#allocation4]  }
   0xb   :  { %16 = dma.vmem_to_smem %s14_s29, 16, %s1353_s9, [#allocation3] }
   0xc   :  { %1347 = dma.done.wait [#allocation3], 16 }
   0xd   :  { %1348 = vsyncadd [#allocation3], 4294967280 }
   0xe   :  { %18 = sfence }
   0xf   :  { %s1406_s10 = smov 0  }
  0x10 LB: > { %s1412_s0 = sadd.s32 4294967295, %s1351_s10   ;;  %p1157_p5 = scmp.ge.s32.totalorder %s1351_s10, 1  ;;  %s1351_s10 = sphi %s1406_s10, %s24_s10  }
  0x11   : > { %p319_p6 = scmp.lt.s32.totalorder %s1351_s10, 3 }
  0x13   : > { %p320_p7 = pnand %p1157_p5, %p319_p6 }
  0x14   : > { %s391_s11 = sld [smem:[#allocation4 + %s1412_s0]] (!%p320_p7)  ;;  %p377_p8 = scmp.lt.s32.totalorder (!%p320_p7), %s1412_s0, 1  ;;  %v1354_v0 = vmov (!%p320_p7), 0.0   ;;  %vm1355_vm0 = vmmov (!%p320_p7), 0   ;;  %vm456_vm1 = vcmask (!%p320_p7), 261120   ;;  %vm517_vm2 = vcmask (!%p320_p7), 130048  }
  0x15   : > { %323 = sbr.rel (%p320_p7) target bundleno = 647 (0x287), region = 48  ;;  %1228 = vmatprep.subr.bf16.mxu1 (!%p320_p7), %v1354_v0  ;;  %1232 = vmatprep.mubr.msk.bf16.mxu1 (!%p320_p7), %vm1355_vm0, %v1354_v0  ;;  %s381_s12 = sld [smem:[#allocation4 + %s1412_s0]] (!%p320_p7)  ;;  %518 = vst.msk [vmem:[#allocation2] sm:$0xff] (!%p320_p7), %vm517_vm2, %v1354_v0  ;;  %519 = vst.msk [vmem:[#allocation2 + $0x8] sm:$0xff] (!%p320_p7), %vm517_vm2, %v1354_v0  ;;  %vm520_vm3 = vcmask (!%p320_p7), 125952   ;;  %vm1024_vm4 = vcmask (!%p320_p7), 254976   ;;  %v1000_v52 = vlaneseq (!%p320_p7) }
  0x16   : > { %s386_s13 = sld [smem:[#allocation4 + %s1412_s0]] (!%p320_p7)  ;;  %1254 = vmatprep.subr.bf16.mxu0 (!%p320_p7), %v1354_v0  ;;  %1256 = vmatprep.mubr.msk.bf16.mxu0 (!%p320_p7), %vm1355_vm0, %v1354_v0  ;;  %vm1038_vm7 = vcmask (!%p320_p7), 255168  }
  0x17   : > { %s408_s29 = sld [smem:[#allocation4 + %s1412_s0]] (!%p320_p7)  ;;  %v1001_v53 = vshrl.u32 (!%p320_p7), %v1000_v52, 7 }
  0x18   : > { %s403_s16 = sld [smem:[#allocation4 + %s1412_s0]] (!%p320_p7) }
  0x19   : > { %v1006_v57 = vand.u32 (!%p320_p7), 1, %v1001_v53 }
  0x1a   : > { %p392_p9 = scmp.lt.s32.totalorder (!%p320_p7), %s391_s11, 1 }
  0x1b   : > { %p382_p10 = scmp.lt.s32.totalorder (!%p320_p7), %s381_s12, 1  ;;  %vm1014_vm5 = vcmp.ne.s32.totalorder (!%p320_p7), %v1006_v57, 0  ;;  %vm1019_vm6 = vcmp.ne.s32.totalorder (!%p320_p7), %v1006_v57, 1 }
  0x1c   : > { %s1424_s14 = scalar_select %p377_p8, %s1412_s0, 1 }
  0x1d   : > { %p387_p11 = scmp.lt.s32.totalorder %s386_s13, 1  ;;  %s1531_s11 = smov (!%p392_p9, %s391_s11), 1 }
  0x1e   : > { %s1158_s15 = sshll.u32 %s1424_s14, 1  ;;  %s1533_s12 = smov (!%p382_p10, %s381_s12), 1 }
  0x1f   : > { %s380_s18 = scalar_lea.vmem %s1522_s1, %s1158_s15  ;;  %s1206_s19 = sshll.u32 %s1531_s11, 4 }
  0x20   : > { %v1435_v1 = vld [vmem:[%s380_s18] sm:$0x3]  ;;  %s396_s22 = scalar_lea.vmem %s1525_s4, %s1206_s19  ;;  %s384_s25 = scalar_lea.vmem %s1523_s2, %s1533_s12 }
  0x21   : > { %v421_v2 = vunpack.c.l.bf16 %v1435_v1  ;;  %v1320_v3 = vld [vmem:[%s396_s22] sm:$0xff]   ;;  %s1535_s13 = smov (!%p387_p11, %s386_s13), 1  ;;  %v1321_v4 = vld [vmem:[%s396_s22 + $0x8] sm:$0xff]   ;;  %p409_p12 = scmp.lt.s32.totalorder %s408_s29, 1 }
  0x22   : > { %1229 = vmatpush3.bf16.msra.mxu1 %v1320_v3  ;;  %s389_s28 = scalar_lea.vmem %s1524_s3, %s1535_s13  ;;  %v1163_v5 = vld [vmem:[%s384_s25] ss:$0 sm:$0xff]  ;;  %s398_s13 = sld [smem:[#allocation4 + %s1412_s0]] }
  0x23   : > { %1230 = vmatprep.subr.bf16.mxu1 %v1354_v0  ;;  %v429_v6 = vmul.f32 %v1163_v5, %v421_v2  ;;  %v1164_v7 = vld [vmem:[%s389_s28] ss:$0 sm:$0xff]  ;;  %s1537_s29 = smov (!%p409_p12, %s408_s29), 1  ;;  %p404_p0 = scmp.lt.s32.totalorder %s403_s16, 1 }
  0x24   : > { %s1306_s30 = smul.u32 72, %s1537_s29  ;;  %s1513_s24 = scalar_lea.vmem %s1529_s8, %s1158_s15 }
  0x25   : > { %v437_v8 = vadd.f32 %v1164_v7, %v429_v6  ;;  %s1541_s16 = smov (!%p404_p0, %s403_s16), 1  ;;  %1025 = vst.msk [vmem:[%s1513_s24] sm:$0x3] %vm1024_vm4, %v1435_v1  ;;  %s1357_s14 = smov 24  }
  0x26   : > { %1231 = vmatpush3.bf16.msra.mxu1 %v1321_v4  ;;  %s1459_s12 = scalar_lea.vmem %s1528_s7, %s1306_s30  ;;  %s406_s22 = scalar_lea.vmem %s1527_s6, %s1541_s16 }
  0x27   : > { %v438_v9 = vmax.f32 %v437_v8, 0.0  ;;  %1236 = vmatprep.subr.bf16.mxu1 %v1354_v0  ;;  %v1322_v11 = vld [vmem:[%s1459_s12 + $0x20] sm:$0xff]   ;;  %v1323_v12 = vld [vmem:[%s1459_s12 + $0x18] sm:$0xff]   ;;  %v1324_v22 = vld [vmem:[%s1459_s12 + $0x8] sm:$0xff]  }
  0x28   : > { %1255 = vmatpush3.bf16.msra.mxu0 %v1322_v11  ;;  %p399_p13 = scmp.lt.s32.totalorder %s398_s13, 1  ;;  %v1169_v15 = vld [vmem:[%s406_s22] ss:$0 sm:$0xff]  ;;  %v1326_v29 = vld [vmem:[%s1459_s12 + $0x28] sm:$0xff]   ;;  %v1328_v32 = vld [vmem:[%s1459_s12 + $0x30] sm:$0xff]  }
  0x29   : > { %v439_v10 = vpack.c.bf16 %v438_v9, %v438_v9  ;;  %1260 = vmatprep.subr.bf16.mxu0 %v1354_v0  ;;  %v1325_v25 = vld [vmem:[%s1459_s12] sm:$0xff]   ;;  %v1327_v35 = vld [vmem:[%s1459_s12 + $0x10] sm:$0xff]   ;;  %v1330_v37 = vld [vmem:[%s1459_s12 + $0x38] sm:$0xff]  }
  0x2a   : > { %s1539_s13 = smov (!%p399_p13, %s398_s13), 1  ;;  %v1329_v38 = vld [vmem:[%s1459_s12 + $0x40] sm:$0xff]  }
  0x2b   : > { %1233 = vmatmul.mubr.msk.bf16.vlgmr.msra.gmra.mrb[0].mxu1 %vm456_vm1, %v439_v10  ;;  %s401_s19 = scalar_lea.vmem %s1526_s5, %s1539_s13 }
  0x2c   : > { %1238 = vmatprep.mubr.msk.bf16.mxu1 %vm1355_vm0, %v1354_v0  ;;  %1237 = vmatpush3.bf16.msra.mxu1 %v1323_v12  ;;  %v1168_v13 = vld [vmem:[%s401_s19] ss:$0 sm:$0xff] }
  0x2d   : > { %1242 = vmatprep.subr.bf16.mxu1 %v1354_v0 }
  0xfe   : > { %v494_v14 = vpop.f32.mrb[0].mxu1 }
  0xff   : > { %v507_v16 = vmul.f32 %v1168_v13, %v494_v14  ;;  %v1234_v17 = vpop.f32.mrb[1].mxu1 }
 0x100   : > { %v497_v18 = vpop.f32.mrb[2].mxu1 }
 0x101   : > { %v515_v19 = vadd.f32 %v1169_v15, %v507_v16  ;;  %v1235_v20 = vpop.f32.mrb[3].mxu1 }
 0x103   : > { %v516_v21 = vmax.f32 %v515_v19, 0.0 }
 0x105   : > { %521 = vst.msk [vmem:[#allocation2 + $0x3] sm:$0xf] %vm520_vm3, %v516_v21 }
 0x10c   : > { %v526_v23 = vld [vmem:[#allocation2 + $0x2] sm:$0xf]  ;;  %v945_v41 = vld [vmem:[#allocation2 + $0x6] sm:$0xf] }
 0x10d   : > { %v689_v24 = vld [vmem:[#allocation2 + $0x3] sm:$0xf]  ;;  %v527_v26 = vpack.c.bf16 %v526_v23, %v526_v23  ;;  %v946_v42 = vpack.c.bf16 %v945_v41, %v945_v41 }
 0x10e   : > { %v690_v27 = vpack.c.bf16 %v689_v24, %v689_v24  ;;  %v684_v28 = vld [vmem:[#allocation2 + $0x1] sm:$0xf]  ;;  %v792_v39 = vld [vmem:[#allocation2 + $0x5] sm:$0xf] }
 0x10f   : > { %1239 = vmatmul.mubr.msk.bf16.vlgmr.msra.gmra.mrb[4].mxu1 %vm517_vm2, %v527_v26  ;;  %v685_v30 = vpack.c.bf16 %v684_v28, %v684_v28  ;;  %v522_v31 = vld [vmem:[#allocation2] sm:$0xf]  ;;  %v629_v34 = vld [vmem:[#allocation2 + $0x4] sm:$0xf]  ;;  %v793_v40 = vpack.c.bf16 %v792_v39, %v792_v39 }
 0x110   : > { %1257 = vmatmul.mubr.msk.bf16.vlgmr.msra.gmra.mrb[0].mxu0 %vm517_vm2, %v690_v27  ;;  %1243 = vmatpush3.bf16.msra.mxu1 %v1325_v25  ;;  %v523_v33 = vpack.c.bf16 %v522_v31, %v522_v31  ;;  %v630_v36 = vpack.c.bf16 %v629_v34, %v629_v34 }
 0x111   : > { %1261 = vmatpush3.bf16.msra.mxu0 %v1324_v22  ;;  %1262 = vmatprep.mubr.msk.bf16.mxu0 %vm1355_vm0, %v1354_v0 }
 0x112   : > { %1272 = vmatprep.subr.bf16.mxu0 %v1354_v0  ;;  %1244 = vmatprep.mubr.msk.bf16.mxu1 %vm1355_vm0, %v1354_v0 }
 0x113   : > { %1248 = vmatprep.subr.bf16.mxu1 %v1354_v0 }
 0x118   : > { %1263 = vmatmul.mubr.msk.bf16.vlgmr.msra.gmra.mrb[4].mxu0 %vm517_vm2, %v685_v30 }
 0x119   : > { %1273 = vmatpush3.bf16.msra.mxu0 %v1326_v29  ;;  %1274 = vmatprep.mubr.msk.bf16.mxu0 %vm1355_vm0, %v1354_v0 }
 0x11a   : > { %1278 = vmatprep.subr.bf16.mxu0 %v1354_v0 }
 0x11b   : > { %1245 = vmatmul.mubr.msk.bf16.vlgmr.msra.gmra.mrb[4].mxu1 %vm517_vm2, %v523_v33 }
 0x11c   : > { %1249 = vmatpush3.bf16.msra.mxu1 %v1328_v32  ;;  %1250 = vmatprep.mubr.msk.bf16.mxu1 %vm1355_vm0, %v1354_v0 }
 0x11d   : > { %1266 = vmatprep.subr.bf16.mxu1 %v1354_v0 }
 0x120   : > { %1275 = vmatmul.mubr.msk.bf16.vlgmr.msra.gmra.mrb[8].mxu0 %vm517_vm2, %v630_v36 }
 0x121   : > { %1279 = vmatpush3.bf16.msra.mxu0 %v1327_v35  ;;  %1280 = vmatprep.mubr.msk.bf16.mxu0 %vm1355_vm0, %v1354_v0 }
 0x122   : > { %1284 = vmatprep.subr.bf16.mxu0 %v1354_v0 }
 0x127   : > { %1251 = vmatmul.mubr.msk.bf16.vlgmr.msra.gmra.mrb[4].mxu1 %vm517_vm2, %v630_v36 }
 0x128   : > { %1267 = vmatpush3.bf16.msra.mxu1 %v1330_v37  ;;  %1268 = vmatprep.mubr.msk.bf16.mxu1 %vm1355_vm0, %v1354_v0 }
 0x12c   : > { %1281 = vmatmul.mubr.msk.bf16.vlgmr.msra.gmra.mrb[8].mxu0 %vm517_vm2, %v527_v26 }
 0x12d   : > { %1285 = vmatpush3.bf16.msra.mxu0 %v1329_v38  ;;  %1286 = vmatprep.mubr.msk.bf16.mxu0 %vm1355_vm0, %v1354_v0  ;;  %v1356_v0 = vmov 1983009808  }
 0x12e   : > { %v1029_v1 = vunpack.c.l.s4 %v1356_v0 }
 0x12f   : > { %1269 = vmatmul.mubr.msk.bf16.vlgmr.msra.gmra.mrb[8].mxu1 %vm517_vm2, %v793_v40 }
 0x130   : > { %v1030_v4 = vunpack.c.0.s8 %v1029_v1 }
 0x132   : > { %v1033_v10 = vsub.s32 %v1030_v4, %v1001_v53 }
 0x138   : > { %1287 = vmatmul.mubr.msk.bf16.vlgmr.msra.gmra.mrb[8].mxu0 %vm517_vm2, %v946_v42 }
 0x1e3   : > { %v737_v43 = vpop.f32.mrb[0].mxu0 }
 0x1e4   : > { %v1258_v44 = vpop.f32.mrb[1].mxu0 }
 0x1e5   : > { %v740_v45 = vpop.f32.mrb[2].mxu0 }
 0x1e6   : > { %v1259_v46 = vpop.f32.mrb[3].mxu0 }
 0x1eb   : > { %v786_v47 = vpop.f32.mrb[4].mxu0 }
 0x1ec   : > { %v787_v48 = vadd.f32 %v786_v47, %v737_v43  ;;  %v1264_v49 = vpop.f32.mrb[5].mxu0 }
 0x1ed   : > { %v789_v50 = vpop.f32.mrb[6].mxu0 }
 0x1ee   : > { %v1265_v51 = vpop.f32.mrb[7].mxu0 }
 0x1fa   : > { %v677_v54 = vpop.f32.mrb[4].mxu1 }
 0x1fb   : > { %v1252_v55 = vpop.f32.mrb[5].mxu1  ;;  %v1017_v62 = vsel %vm1014_vm5, %v677_v54, 0.0 }
 0x1fc   : > { %v680_v56 = vpop.f32.mrb[6].mxu1 }
 0x1fd   : > { %v1253_v58 = vpop.f32.mrb[7].mxu1 }
 0x202   : > { %v840_v59 = vpop.f32.mrb[8].mxu1 }
 0x203   : > { %v846_v60 = vadd.f32 %v840_v59, %v787_v48  ;;  %v1270_v61 = vpop.f32.mrb[9].mxu1 }
 0x204   : > { %v843_v63 = vpop.f32.mrb[10].mxu1 }
 0x205   : > { %v1018_v2 = vadd.f32 %v1017_v62, %v846_v60  ;;  %v1271_v3 = vpop.f32.mrb[11].mxu1 }
 0x20b   : > { %v993_v5 = vpop.f32.mrb[8].mxu0 }
 0x20c   : > { %v1022_v6 = vsel %vm1019_vm6, %v993_v5, 0.0  ;;  %v1288_v7 = vpop.f32.mrb[9].mxu0 }
 0x20d   : > { %v1023_v8 = vadd.f32 %v1022_v6, %v1018_v2  ;;  %v996_v9 = vpop.f32.mrb[10].mxu0 }
 0x20e   : > { %v1289_v11 = vpop.f32.mrb[11].mxu0 }
 0x20f   : > { %v1026_v12 = vpack.c.bf16 %v1023_v8, %v1023_v8 }
 0x211   : > { %v1034_v13 = vrot.slane %v1026_v12, %v1033_v10 }
 0x213   : > { %1035 = vrot.lane.b32.xlu0 %v1034_v13, %s1357_s14 }
 0x285   : > { %v1036_v14 = vpop.permute.xlu0 %1035 }
 0x286   : > { %1039 = vst.msk [vmem:[%s1513_s24] sm:$0x3] %vm1038_vm7, %v1036_v14 }
 0x287 PF: > { %s24_s10 = sadd.s32 1, %s1351_s10  }
 0x288   : > { %p21_p1 = scmp.ge.s32.totalorder %s24_s10, 4  }
 0x28a   :  { %23 = sbr.rel (!%p21_p1) target bundleno = 16 (0x10), region = 104 }

</bundles_post_ra>
